<compile_context>
chip_gen: v5e
topology: v5e:2x2
jax: 0.10.0
libtpu: 0.0.40
codegen_flags: <defaults>
</compile_context>

<pallas_src>
import functools

import jax
import jax.numpy as jnp
from jax.experimental import pallas as pl
from jax.experimental.pallas import tpu as pltpu


# ----------------------------------------------------------------------------
# Fused Pallas kernel: conv1 -> block1 -> block2 -> fc for a tile of images
# ----------------------------------------------------------------------------
def _resnet_fused_kernel(x_ref, mask_ref, w1_ref, b1_ref, w2_ref, b2_ref,
                         w3_ref, b3_ref, wfc_ref, bfc_ref, out_ref,
                         pada_ref, padb_ref, col_ref, *, H, Wp, lead):
    """Layouts (channel-major, spatial flattened onto lanes):

    x_ref   : (Bt, 1, PADLEN)  padded/flattened input; interior at [lead, lead+N)
    mask_ref: (1, N)           1.0 on real columns, 0.0 on wrap-around columns
    w1_ref  : (3, 3, 16, 1)    conv1 taps (Cout, Cin);   b*_ref: (16, 1)
    w2/w3   : (16, 144)        residual-block weight, tap-major stacked K
    wfc_ref : (10, 16, N)      fc weight in padded channel-major layout
    bfc_ref : (1, 10)
    out_ref : (Bt, 1, 10)
    pada/b  : (16, PADLEN)     VMEM scratch: padded inter-layer activations
    col_ref : (144, N)         VMEM scratch: im2col stack for the block matmul
    """
    C = b1_ref.shape[0]            # 16
    N = H * Wp                     # 896 = 7*128
    OFF = Wp + 1                   # interior offset inside a padded row buffer
    base = lead - OFF              # tap (ky,kx) reads lanes [base+ky*Wp+kx, ...+N)
    padlen = pada_ref.shape[1]
    n_img = x_ref.shape[0]
    mask = mask_ref[...]           # (1, N)

    # Zero only the 128-lane border strips (the interior is fully overwritten
    # for every image, so the strips stay valid across the in-kernel batch loop).
    zeros_head = jnp.zeros((C, lead), jnp.float32)
    zeros_tail = jnp.zeros((C, padlen - lead - N), jnp.float32)
    pada_ref[:, :lead] = zeros_head
    pada_ref[:, lead + N:padlen] = zeros_tail
    padb_ref[:, :lead] = zeros_head
    padb_ref[:, lead + N:padlen] = zeros_tail

    def residual_block(pad_ref, w_ref, b_ref, apply_mask):
        # im2col: 9 shifted copies of the padded activation -> (144, N)
        for t in range(9):
            ky, kx = divmod(t, 3)
            start = base + ky * Wp + kx
            col_ref[t * C:(t + 1) * C, :] = pad_ref[:, start:start + N]
        # one MXU matmul per block: (16,144) @ (144,N)
        a = jnp.dot(w_ref[...], col_ref[...],
                    preferred_element_type=jnp.float32)
        resid = pad_ref[:, lead:lead + N]              # aligned interior read
        y = jnp.maximum(a + b_ref[...] + resid, 0.0)
        return y * mask if apply_mask else y

    for b in range(n_img):
        # ---------- conv1 (Cin=1): 9 broadcast outer-product taps (VALU) ----
        acc = jnp.zeros((C, N), jnp.float32)
        for ky in range(3):
            for kx in range(3):
                start = base + ky * Wp + kx
                patch = x_ref[b, :, start:start + N]       # (1, N)
                acc = acc + w1_ref[ky, kx] * patch         # (16,1) * (1,N)
        act = jnp.maximum(acc + b1_ref[...], 0.0) * mask   # (16, N)
        pada_ref[:, lead:lead + N] = act                   # aligned re-pad

        # ---------- residual blocks: relu(x + conv(x)) -----------------------
        act = residual_block(pada_ref, w2_ref, b2_ref, apply_mask=True)
        padb_ref[:, lead:lead + N] = act                   # aligned re-pad
        act = residual_block(padb_ref, w3_ref, b3_ref, apply_mask=False)

        # ---------- fc: logits[j] = sum_{c,n} act[c,n] * wfc[j,c,n] ----------
        parts = []
        for j in range(wfc_ref.shape[0]):
            prod = act * wfc_ref[j]                        # (16, N)  VALU
            s = jnp.sum(prod, axis=1, keepdims=True)       # (16, 1)  XLU
            parts.append(jnp.sum(s, axis=0, keepdims=True))  # (1, 1)
        out_ref[b, :, :] = jnp.concatenate(parts, axis=1) + bfc_ref[...]


# ----------------------------------------------------------------------------
# Wrapper: the only per-call XLA glue left is flattening/padding the input.
# ----------------------------------------------------------------------------
def resnet_forward(x_nchw, kparams, *, batch_tile=1):
    """Fused Pallas forward pass. Input NCHW (B,1,28,28); output (B, 10)."""
    B, Cin, H, W = x_nchw.shape
    assert Cin == 1 and B % batch_tile == 0
    C = 16
    Wp = 32                        # padded row stride -> N = 28*32 = 896 = 7*128
    N = H * Wp
    LEAD = 128                     # 128-lane-aligned interior offset
    PADLEN = LEAD + N + 128        # taps read at most Wp+1=33 lanes past interior

    # Lay the image out exactly like the in-kernel padded activations:
    # interior (with zeroed wrap columns) at lanes [LEAD, LEAD+N), zeros elsewhere.
    xb = jnp.pad(x_nchw.reshape(B, H, W), ((0, 0), (0, 0), (0, Wp - W)))
    xb = xb.reshape(B, N)
    xb = jnp.pad(xb, ((0, 0), (LEAD, PADLEN - LEAD - N))).reshape(B, 1, PADLEN)

    kern = functools.partial(_resnet_fused_kernel, H=H, Wp=Wp, lead=LEAD)
    out = pl.pallas_call(
        kern,
        out_shape=jax.ShapeDtypeStruct((B, 1, 10), jnp.float32),
        grid=(B // batch_tile,),
        in_specs=[
            pl.BlockSpec((batch_tile, 1, PADLEN), lambda i: (i, 0, 0)),  # x
            pl.BlockSpec((1, N), lambda i: (0, 0)),                 # lane mask
            pl.BlockSpec((3, 3, C, 1), lambda i: (0, 0, 0, 0)),     # conv1 w
            pl.BlockSpec((C, 1), lambda i: (0, 0)),                 # conv1 b
            pl.BlockSpec((C, 9 * C), lambda i: (0, 0)),             # block1 w
            pl.BlockSpec((C, 1), lambda i: (0, 0)),                 # block1 b
            pl.BlockSpec((C, 9 * C), lambda i: (0, 0)),             # block2 w
            pl.BlockSpec((C, 1), lambda i: (0, 0)),                 # block2 b
            pl.BlockSpec((10, C, N), lambda i: (0, 0, 0)),          # fc w
            pl.BlockSpec((1, 10), lambda i: (0, 0)),                # fc b
        ],
        out_specs=pl.BlockSpec((batch_tile, 1, 10), lambda i: (i, 0, 0)),
        scratch_shapes=[pltpu.VMEM((C, PADLEN), jnp.float32),      # pada
                        pltpu.VMEM((C, PADLEN), jnp.float32),      # padb
                        pltpu.VMEM((9 * C, N), jnp.float32)],      # im2col
        compiler_params=pltpu.CompilerParams(
            dimension_semantics=("parallel",)),
    )(xb, kparams["mask"], kparams["w1"], kparams["b1"],
      kparams["w2"], kparams["b2"], kparams["w3"], kparams["b3"],
      kparams["wfc"], kparams["bfc"])
    return out.reshape(B, 10)


# ----------------------------------------------------------------------------
# One-time re-layout of the canonical parameters into kernel layouts
# ----------------------------------------------------------------------------
def prepare_kernel_params(params):
    C, H, W = 16, 28, 28
    Wp = 32
    N = H * Wp

    def conv1_w(w):                  # (3,3,1,16) -> (3,3,Cout=16,Cin=1)
        return jnp.transpose(w, (0, 1, 3, 2))

    def stack_w(w):                  # (3,3,Cin,Cout) -> (Cout, 9*Cin) tap-major K
        return jnp.transpose(w, (3, 0, 1, 2)).reshape(C, 9 * C)

    # 1.0 on real image columns, 0.0 on the Wp-W wrap-around columns of each row
    mask = (jnp.arange(N) % Wp < W).astype(jnp.float32).reshape(1, N)

    # fc_w rows are NCHW-flatten order (c*H*W + y*W + x); re-order into the
    # kernel's padded channel-major activation layout (10, C, H*Wp), with the
    # wrap-around columns zeroed (so the kernel needs no final mask multiply).
    wfc = params["fc_w"].reshape(C, H, W, 10)
    wfc = jnp.pad(wfc, ((0, 0), (0, 0), (0, Wp - W), (0, 0)))
    wfc = jnp.transpose(wfc, (3, 0, 1, 2)).reshape(10, C, N)

    return {
        "mask": mask,
        "w1": conv1_w(params["conv1_w"]), "b1": params["conv1_b"].reshape(C, 1),
        "w2": stack_w(params["block1_w"]), "b2": params["block1_b"].reshape(C, 1),
        "w3": stack_w(params["block2_w"]), "b3": params["block2_b"].reshape(C, 1),
        "wfc": wfc, "bfc": params["fc_b"].reshape(1, 10),
    }


# ----------------------------------------------------------------------------
# Pure-JAX reference (for correctness check only)
# ----------------------------------------------------------------------------
def reference_forward(x_nchw, params):
    hi = jax.lax.Precision.HIGHEST

    def conv(x, w, b):
        y = jax.lax.conv_general_dilated(
            x, w, window_strides=(1, 1), padding="SAME",
            dimension_numbers=("NHWC", "HWIO", "NHWC"), precision=hi)
        return y + b.reshape(1, 1, 1, -1)

    x = jnp.transpose(x_nchw, (0, 2, 3, 1))
    x = jnp.maximum(conv(x, params["conv1_w"], params["conv1_b"]), 0.0)
    x = jnp.maximum(x + conv(x, params["block1_w"], params["block1_b"]), 0.0)
    x = jnp.maximum(x + conv(x, params["block2_w"], params["block2_b"]), 0.0)
    B = x.shape[0]
    xf = jnp.transpose(x, (0, 3, 1, 2)).reshape(B, -1)     # NCHW flatten
    return jnp.dot(xf, params["fc_w"], precision=hi) + params["fc_b"]


# ----------------------------------------------------------------------------
# Deterministic parameter init (shapes from the PyTorch module __init__)
# ----------------------------------------------------------------------------
def init_params(key):
    C = 16
    H = W = 28
    k = jax.random.split(key, 8)

    def u(k_, shape, fan_in):
        bound = 1.0 / (fan_in ** 0.5)
        return jax.random.uniform(k_, shape, jnp.float32, -bound, bound)

    return {
        # conv weights stored (kH, kW, Cin, Cout)
        "conv1_w": u(k[0], (3, 3, 1, C), 1 * 9),
        "conv1_b": u(k[1], (1, C), 1 * 9),
        "block1_w": u(k[2], (3, 3, C, C), C * 9),
        "block1_b": u(k[3], (1, C), C * 9),
        "block2_w": u(k[4], (3, 3, C, C), C * 9),
        "block2_b": u(k[5], (1, C), C * 9),
        "fc_w": u(k[6], (C * H * W, 10), C * H * W),
        "fc_b": u(k[7], (1, 10), C * H * W),
    }


if __name__ == "__main__":
    key = jax.random.PRNGKey(0)
    kkey, xkey = jax.random.split(key)
    params = init_params(kkey)
    kparams = prepare_kernel_params(params)      # one-time weight re-layout

    # fc layer requires 16*28*28 features, so spatial must be 28x28, Cin=1
    x = jax.random.normal(xkey, (2, 1, 28, 28), jnp.float32)

    fwd = jax.jit(resnet_forward)                # batch_tile=1 -> grid=(B,)
    out = jax.block_until_ready(fwd(x, kparams))
    assert out.shape == (2, 10) and out.dtype == jnp.float32

    ref = jax.block_until_ready(reference_forward(x, params))
    if not bool(jnp.allclose(out, ref, rtol=2e-3, atol=2e-3)):
        err = float(jnp.max(jnp.abs(out - ref)))
        raise AssertionError(
            f"Pallas ResNet output mismatch vs JAX reference (max abs err {err})")

    print("KERNEL_OK")
</pallas_src>

<mosaic_0001>
module attributes {stable_mosaic.version = 11 : i64} {
  func.func @_resnet_fused_kernel(%arg0: i32, %arg1: memref<1x1x1152xf32, #tpu.memory_space<vmem>>, %arg2: memref<1x896xf32, #tpu.memory_space<vmem>>, %arg3: memref<3x3x16x1xf32, #tpu.memory_space<vmem>>, %arg4: memref<16x1xf32, #tpu.memory_space<vmem>>, %arg5: memref<16x144xf32, #tpu.memory_space<vmem>>, %arg6: memref<16x1xf32, #tpu.memory_space<vmem>>, %arg7: memref<16x144xf32, #tpu.memory_space<vmem>>, %arg8: memref<16x1xf32, #tpu.memory_space<vmem>>, %arg9: memref<10x16x896xf32, #tpu.memory_space<vmem>>, %arg10: memref<1x10xf32, #tpu.memory_space<vmem>>, %arg11: memref<1x1x10xf32, #tpu.memory_space<vmem>>, %arg12: memref<16x1152xf32, #tpu.memory_space<vmem>>, %arg13: memref<16x1152xf32, #tpu.memory_space<vmem>>, %arg14: memref<144x896xf32, #tpu.memory_space<vmem>>) attributes {dimension_semantics = [#tpu.dimension_semantics<parallel>], iteration_bounds = array<i64: 2>, scalar_prefetch = 0 : i64, scratch_operands = 3 : i64, tpu.core_type = #tpu.core_type<tc>, window_params = [{transform_indices = @transform_0, window_bounds = array<i64: 1, 1, 1152>}, {pipeline_mode = #tpu.pipeline_mode<synchronous>, transform_indices = @transform_1, window_bounds = array<i64: 1, 896>}, {pipeline_mode = #tpu.pipeline_mode<synchronous>, transform_indices = @transform_2, window_bounds = array<i64: 3, 3, 16, 1>}, {pipeline_mode = #tpu.pipeline_mode<synchronous>, transform_indices = @transform_3, window_bounds = array<i64: 16, 1>}, {pipeline_mode = #tpu.pipeline_mode<synchronous>, transform_indices = @transform_4, window_bounds = array<i64: 16, 144>}, {pipeline_mode = #tpu.pipeline_mode<synchronous>, transform_indices = @transform_5, window_bounds = array<i64: 16, 1>}, {pipeline_mode = #tpu.pipeline_mode<synchronous>, transform_indices = @transform_6, window_bounds = array<i64: 16, 144>}, {pipeline_mode = #tpu.pipeline_mode<synchronous>, transform_indices = @transform_7, window_bounds = array<i64: 16, 1>}, {pipeline_mode = #tpu.pipeline_mode<synchronous>, transform_indices = @transform_8, window_bounds = array<i64: 10, 16, 896>}, {pipeline_mode = #tpu.pipeline_mode<synchronous>, transform_indices = @transform_9, window_bounds = array<i64: 1, 10>}, {transform_indices = @transform_10, window_bounds = array<i64: 1, 1, 10>}]} {
    %c0 = arith.constant 0 : index
    %c0_0 = arith.constant 0 : index
    %0 = vector.load %arg2[%c0, %c0_0] : memref<1x896xf32, #tpu.memory_space<vmem>>, vector<1x896xf32>
    %cst = arith.constant 0.000000e+00 : f32
    %1 = vector.broadcast %cst : f32 to vector<16x128xf32>
    %cst_1 = arith.constant 0.000000e+00 : f32
    %2 = vector.broadcast %cst_1 : f32 to vector<16x128xf32>
    %c0_2 = arith.constant 0 : index
    %c0_3 = arith.constant 0 : index
    %3 = vector.load %arg12[%c0_2, %c0_3] : memref<16x1152xf32, #tpu.memory_space<vmem>>, vector<16x128xf32>
    tpu.vector_store %arg12[%c0_2, %c0_3], %1 {strides = array<i32>} : memref<16x1152xf32, #tpu.memory_space<vmem>>, vector<16x128xf32>,
    %c0_4 = arith.constant 0 : index
    %c1024 = arith.constant 1024 : index
    %4 = vector.load %arg12[%c0_4, %c1024] : memref<16x1152xf32, #tpu.memory_space<vmem>>, vector<16x128xf32>
    tpu.vector_store %arg12[%c0_4, %c1024], %2 {strides = array<i32>} : memref<16x1152xf32, #tpu.memory_space<vmem>>, vector<16x128xf32>,
    %c0_5 = arith.constant 0 : index
    %c0_6 = arith.constant 0 : index
    %5 = vector.load %arg13[%c0_5, %c0_6] : memref<16x1152xf32, #tpu.memory_space<vmem>>, vector<16x128xf32>
    tpu.vector_store %arg13[%c0_5, %c0_6], %1 {strides = array<i32>} : memref<16x1152xf32, #tpu.memory_space<vmem>>, vector<16x128xf32>,
    %c0_7 = arith.constant 0 : index
    %c1024_8 = arith.constant 1024 : index
    %6 = vector.load %arg13[%c0_7, %c1024_8] : memref<16x1152xf32, #tpu.memory_space<vmem>>, vector<16x128xf32>
    tpu.vector_store %arg13[%c0_7, %c1024_8], %2 {strides = array<i32>} : memref<16x1152xf32, #tpu.memory_space<vmem>>, vector<16x128xf32>,
    %cst_9 = arith.constant 0.000000e+00 : f32
    %7 = vector.broadcast %cst_9 : f32 to vector<16x896xf32>
    %c0_10 = arith.constant 0 : index
    %c0_11 = arith.constant 0 : index
    %c95 = arith.constant 95 : index
    %8 = vector.load %arg1[%c0_10, %c0_11, %c95] : memref<1x1x1152xf32, #tpu.memory_space<vmem>>, vector<1x1x896xf32>
    %9 = vector.shape_cast %8 : vector<1x1x896xf32> to vector<1x896xf32>
    %c0_12 = arith.constant 0 : index
    %c0_13 = arith.constant 0 : index
    %c0_14 = arith.constant 0 : index
    %c0_15 = arith.constant 0 : index
    %10 = vector.load %arg3[%c0_12, %c0_13, %c0_14, %c0_15] : memref<3x3x16x1xf32, #tpu.memory_space<vmem>>, vector<1x1x16x1xf32>
    %11 = vector.shape_cast %10 : vector<1x1x16x1xf32> to vector<16x1xf32>
    %12 = vector.broadcast %11 : vector<16x1xf32> to vector<16x896xf32>
    %13 = vector.broadcast %9 : vector<1x896xf32> to vector<16x896xf32>
    %14 = arith.mulf %12, %13 : vector<16x896xf32>
    %15 = arith.addf %7, %14 : vector<16x896xf32>
    %c0_16 = arith.constant 0 : index
    %c0_17 = arith.constant 0 : index
    %c96 = arith.constant 96 : index
    %16 = vector.load %arg1[%c0_16, %c0_17, %c96] : memref<1x1x1152xf32, #tpu.memory_space<vmem>>, vector<1x1x896xf32>
    %17 = vector.shape_cast %16 : vector<1x1x896xf32> to vector<1x896xf32>
    %c0_18 = arith.constant 0 : index
    %c1 = arith.constant 1 : index
    %c0_19 = arith.constant 0 : index
    %c0_20 = arith.constant 0 : index
    %18 = vector.load %arg3[%c0_18, %c1, %c0_19, %c0_20] : memref<3x3x16x1xf32, #tpu.memory_space<vmem>>, vector<1x1x16x1xf32>
    %19 = vector.shape_cast %18 : vector<1x1x16x1xf32> to vector<16x1xf32>
    %20 = vector.broadcast %19 : vector<16x1xf32> to vector<16x896xf32>
    %21 = vector.broadcast %17 : vector<1x896xf32> to vector<16x896xf32>
    %22 = arith.mulf %20, %21 : vector<16x896xf32>
    %23 = arith.addf %15, %22 : vector<16x896xf32>
    %c0_21 = arith.constant 0 : index
    %c0_22 = arith.constant 0 : index
    %c97 = arith.constant 97 : index
    %24 = vector.load %arg1[%c0_21, %c0_22, %c97] : memref<1x1x1152xf32, #tpu.memory_space<vmem>>, vector<1x1x896xf32>
    %25 = vector.shape_cast %24 : vector<1x1x896xf32> to vector<1x896xf32>
    %c0_23 = arith.constant 0 : index
    %c2 = arith.constant 2 : index
    %c0_24 = arith.constant 0 : index
    %c0_25 = arith.constant 0 : index
    %26 = vector.load %arg3[%c0_23, %c2, %c0_24, %c0_25] : memref<3x3x16x1xf32, #tpu.memory_space<vmem>>, vector<1x1x16x1xf32>
    %27 = vector.shape_cast %26 : vector<1x1x16x1xf32> to vector<16x1xf32>
    %28 = vector.broadcast %27 : vector<16x1xf32> to vector<16x896xf32>
    %29 = vector.broadcast %25 : vector<1x896xf32> to vector<16x896xf32>
    %30 = arith.mulf %28, %29 : vector<16x896xf32>
    %31 = arith.addf %23, %30 : vector<16x896xf32>
    %c0_26 = arith.constant 0 : index
    %c0_27 = arith.constant 0 : index
    %c127 = arith.constant 127 : index
    %32 = vector.load %arg1[%c0_26, %c0_27, %c127] : memref<1x1x1152xf32, #tpu.memory_space<vmem>>, vector<1x1x896xf32>
    %33 = vector.shape_cast %32 : vector<1x1x896xf32> to vector<1x896xf32>
    %c1_28 = arith.constant 1 : index
    %c0_29 = arith.constant 0 : index
    %c0_30 = arith.constant 0 : index
    %c0_31 = arith.constant 0 : index
    %34 = vector.load %arg3[%c1_28, %c0_29, %c0_30, %c0_31] : memref<3x3x16x1xf32, #tpu.memory_space<vmem>>, vector<1x1x16x1xf32>
    %35 = vector.shape_cast %34 : vector<1x1x16x1xf32> to vector<16x1xf32>
    %36 = vector.broadcast %35 : vector<16x1xf32> to vector<16x896xf32>
    %37 = vector.broadcast %33 : vector<1x896xf32> to vector<16x896xf32>
    %38 = arith.mulf %36, %37 : vector<16x896xf32>
    %39 = arith.addf %31, %38 : vector<16x896xf32>
    %c0_32 = arith.constant 0 : index
    %c0_33 = arith.constant 0 : index
    %c128 = arith.constant 128 : index
    %40 = vector.load %arg1[%c0_32, %c0_33, %c128] : memref<1x1x1152xf32, #tpu.memory_space<vmem>>, vector<1x1x896xf32>
    %41 = vector.shape_cast %40 : vector<1x1x896xf32> to vector<1x896xf32>
    %c1_34 = arith.constant 1 : index
    %c1_35 = arith.constant 1 : index
    %c0_36 = arith.constant 0 : index
    %c0_37 = arith.constant 0 : index
    %42 = vector.load %arg3[%c1_34, %c1_35, %c0_36, %c0_37] : memref<3x3x16x1xf32, #tpu.memory_space<vmem>>, vector<1x1x16x1xf32>
    %43 = vector.shape_cast %42 : vector<1x1x16x1xf32> to vector<16x1xf32>
    %44 = vector.broadcast %43 : vector<16x1xf32> to vector<16x896xf32>
    %45 = vector.broadcast %41 : vector<1x896xf32> to vector<16x896xf32>
    %46 = arith.mulf %44, %45 : vector<16x896xf32>
    %47 = arith.addf %39, %46 : vector<16x896xf32>
    %c0_38 = arith.constant 0 : index
    %c0_39 = arith.constant 0 : index
    %c129 = arith.constant 129 : index
    %48 = vector.load %arg1[%c0_38, %c0_39, %c129] : memref<1x1x1152xf32, #tpu.memory_space<vmem>>, vector<1x1x896xf32>
    %49 = vector.shape_cast %48 : vector<1x1x896xf32> to vector<1x896xf32>
    %c1_40 = arith.constant 1 : index
    %c2_41 = arith.constant 2 : index
    %c0_42 = arith.constant 0 : index
    %c0_43 = arith.constant 0 : index
    %50 = vector.load %arg3[%c1_40, %c2_41, %c0_42, %c0_43] : memref<3x3x16x1xf32, #tpu.memory_space<vmem>>, vector<1x1x16x1xf32>
    %51 = vector.shape_cast %50 : vector<1x1x16x1xf32> to vector<16x1xf32>
    %52 = vector.broadcast %51 : vector<16x1xf32> to vector<16x896xf32>
    %53 = vector.broadcast %49 : vector<1x896xf32> to vector<16x896xf32>
    %54 = arith.mulf %52, %53 : vector<16x896xf32>
    %55 = arith.addf %47, %54 : vector<16x896xf32>
    %c0_44 = arith.constant 0 : index
    %c0_45 = arith.constant 0 : index
    %c159 = arith.constant 159 : index
    %56 = vector.load %arg1[%c0_44, %c0_45, %c159] : memref<1x1x1152xf32, #tpu.memory_space<vmem>>, vector<1x1x896xf32>
    %57 = vector.shape_cast %56 : vector<1x1x896xf32> to vector<1x896xf32>
    %c2_46 = arith.constant 2 : index
    %c0_47 = arith.constant 0 : index
    %c0_48 = arith.constant 0 : index
    %c0_49 = arith.constant 0 : index
    %58 = vector.load %arg3[%c2_46, %c0_47, %c0_48, %c0_49] : memref<3x3x16x1xf32, #tpu.memory_space<vmem>>, vector<1x1x16x1xf32>
    %59 = vector.shape_cast %58 : vector<1x1x16x1xf32> to vector<16x1xf32>
    %60 = vector.broadcast %59 : vector<16x1xf32> to vector<16x896xf32>
    %61 = vector.broadcast %57 : vector<1x896xf32> to vector<16x896xf32>
    %62 = arith.mulf %60, %61 : vector<16x896xf32>
    %63 = arith.addf %55, %62 : vector<16x896xf32>
    %c0_50 = arith.constant 0 : index
    %c0_51 = arith.constant 0 : index
    %c160 = arith.constant 160 : index
    %64 = vector.load %arg1[%c0_50, %c0_51, %c160] : memref<1x1x1152xf32, #tpu.memory_space<vmem>>, vector<1x1x896xf32>
    %65 = vector.shape_cast %64 : vector<1x1x896xf32> to vector<1x896xf32>
    %c2_52 = arith.constant 2 : index
    %c1_53 = arith.constant 1 : index
    %c0_54 = arith.constant 0 : index
    %c0_55 = arith.constant 0 : index
    %66 = vector.load %arg3[%c2_52, %c1_53, %c0_54, %c0_55] : memref<3x3x16x1xf32, #tpu.memory_space<vmem>>, vector<1x1x16x1xf32>
    %67 = vector.shape_cast %66 : vector<1x1x16x1xf32> to vector<16x1xf32>
    %68 = vector.broadcast %67 : vector<16x1xf32> to vector<16x896xf32>
    %69 = vector.broadcast %65 : vector<1x896xf32> to vector<16x896xf32>
    %70 = arith.mulf %68, %69 : vector<16x896xf32>
    %71 = arith.addf %63, %70 : vector<16x896xf32>
    %c0_56 = arith.constant 0 : index
    %c0_57 = arith.constant 0 : index
    %c161 = arith.constant 161 : index
    %72 = vector.load %arg1[%c0_56, %c0_57, %c161] : memref<1x1x1152xf32, #tpu.memory_space<vmem>>, vector<1x1x896xf32>
    %73 = vector.shape_cast %72 : vector<1x1x896xf32> to vector<1x896xf32>
    %c2_58 = arith.constant 2 : index
    %c2_59 = arith.constant 2 : index
    %c0_60 = arith.constant 0 : index
    %c0_61 = arith.constant 0 : index
    %74 = vector.load %arg3[%c2_58, %c2_59, %c0_60, %c0_61] : memref<3x3x16x1xf32, #tpu.memory_space<vmem>>, vector<1x1x16x1xf32>
    %75 = vector.shape_cast %74 : vector<1x1x16x1xf32> to vector<16x1xf32>
    %76 = vector.broadcast %75 : vector<16x1xf32> to vector<16x896xf32>
    %77 = vector.broadcast %73 : vector<1x896xf32> to vector<16x896xf32>
    %78 = arith.mulf %76, %77 : vector<16x896xf32>
    %79 = arith.addf %71, %78 : vector<16x896xf32>
    %c0_62 = arith.constant 0 : index
    %c0_63 = arith.constant 0 : index
    %80 = vector.load %arg4[%c0_62, %c0_63] : memref<16x1xf32, #tpu.memory_space<vmem>>, vector<16x1xf32>
    %81 = vector.broadcast %80 : vector<16x1xf32> to vector<16x896xf32>
    %82 = arith.addf %79, %81 : vector<16x896xf32>
    %cst_64 = arith.constant 0.000000e+00 : f32
    %83 = vector.broadcast %cst_64 : f32 to vector<16x896xf32>
    %84 = arith.maximumf %82, %83 : vector<16x896xf32>
    %85 = vector.broadcast %0 : vector<1x896xf32> to vector<16x896xf32>
    %86 = arith.mulf %84, %85 : vector<16x896xf32>
    %c0_65 = arith.constant 0 : index
    %c128_66 = arith.constant 128 : index
    %87 = vector.load %arg12[%c0_65, %c128_66] : memref<16x1152xf32, #tpu.memory_space<vmem>>, vector<16x896xf32>
    tpu.vector_store %arg12[%c0_65, %c128_66], %86 {strides = array<i32>} : memref<16x1152xf32, #tpu.memory_space<vmem>>, vector<16x896xf32>,
    %c0_67 = arith.constant 0 : index
    %c95_68 = arith.constant 95 : index
    %88 = vector.load %arg12[%c0_67, %c95_68] : memref<16x1152xf32, #tpu.memory_space<vmem>>, vector<16x896xf32>
    %c0_69 = arith.constant 0 : index
    %c0_70 = arith.constant 0 : index
    %89 = vector.load %arg14[%c0_69, %c0_70] : memref<144x896xf32, #tpu.memory_space<vmem>>, vector<16x896xf32>
    tpu.vector_store %arg14[%c0_69, %c0_70], %88 {strides = array<i32>} : memref<144x896xf32, #tpu.memory_space<vmem>>, vector<16x896xf32>,
    %c0_71 = arith.constant 0 : index
    %c96_72 = arith.constant 96 : index
    %90 = vector.load %arg12[%c0_71, %c96_72] : memref<16x1152xf32, #tpu.memory_space<vmem>>, vector<16x896xf32>
    %c16 = arith.constant 16 : index
    %c0_73 = arith.constant 0 : index
    %91 = vector.load %arg14[%c16, %c0_73] : memref<144x896xf32, #tpu.memory_space<vmem>>, vector<16x896xf32>
    tpu.vector_store %arg14[%c16, %c0_73], %90 {strides = array<i32>} : memref<144x896xf32, #tpu.memory_space<vmem>>, vector<16x896xf32>,
    %c0_74 = arith.constant 0 : index
    %c97_75 = arith.constant 97 : index
    %92 = vector.load %arg12[%c0_74, %c97_75] : memref<16x1152xf32, #tpu.memory_space<vmem>>, vector<16x896xf32>
    %c32 = arith.constant 32 : index
    %c0_76 = arith.constant 0 : index
    %93 = vector.load %arg14[%c32, %c0_76] : memref<144x896xf32, #tpu.memory_space<vmem>>, vector<16x896xf32>
    tpu.vector_store %arg14[%c32, %c0_76], %92 {strides = array<i32>} : memref<144x896xf32, #tpu.memory_space<vmem>>, vector<16x896xf32>,
    %c0_77 = arith.constant 0 : index
    %c127_78 = arith.constant 127 : index
    %94 = vector.load %arg12[%c0_77, %c127_78] : memref<16x1152xf32, #tpu.memory_space<vmem>>, vector<16x896xf32>
    %c48 = arith.constant 48 : index
    %c0_79 = arith.constant 0 : index
    %95 = vector.load %arg14[%c48, %c0_79] : memref<144x896xf32, #tpu.memory_space<vmem>>, vector<16x896xf32>
    tpu.vector_store %arg14[%c48, %c0_79], %94 {strides = array<i32>} : memref<144x896xf32, #tpu.memory_space<vmem>>, vector<16x896xf32>,
    %c0_80 = arith.constant 0 : index
    %c128_81 = arith.constant 128 : index
    %96 = vector.load %arg12[%c0_80, %c128_81] : memref<16x1152xf32, #tpu.memory_space<vmem>>, vector<16x896xf32>
    %c64 = arith.constant 64 : index
    %c0_82 = arith.constant 0 : index
    %97 = vector.load %arg14[%c64, %c0_82] : memref<144x896xf32, #tpu.memory_space<vmem>>, vector<16x896xf32>
    tpu.vector_store %arg14[%c64, %c0_82], %96 {strides = array<i32>} : memref<144x896xf32, #tpu.memory_space<vmem>>, vector<16x896xf32>,
    %c0_83 = arith.constant 0 : index
    %c129_84 = arith.constant 129 : index
    %98 = vector.load %arg12[%c0_83, %c129_84] : memref<16x1152xf32, #tpu.memory_space<vmem>>, vector<16x896xf32>
    %c80 = arith.constant 80 : index
    %c0_85 = arith.constant 0 : index
    %99 = vector.load %arg14[%c80, %c0_85] : memref<144x896xf32, #tpu.memory_space<vmem>>, vector<16x896xf32>
    tpu.vector_store %arg14[%c80, %c0_85], %98 {strides = array<i32>} : memref<144x896xf32, #tpu.memory_space<vmem>>, vector<16x896xf32>,
    %c0_86 = arith.constant 0 : index
    %c159_87 = arith.constant 159 : index
    %100 = vector.load %arg12[%c0_86, %c159_87] : memref<16x1152xf32, #tpu.memory_space<vmem>>, vector<16x896xf32>
    %c96_88 = arith.constant 96 : index
    %c0_89 = arith.constant 0 : index
    %101 = vector.load %arg14[%c96_88, %c0_89] : memref<144x896xf32, #tpu.memory_space<vmem>>, vector<16x896xf32>
    tpu.vector_store %arg14[%c96_88, %c0_89], %100 {strides = array<i32>} : memref<144x896xf32, #tpu.memory_space<vmem>>, vector<16x896xf32>,
    %c0_90 = arith.constant 0 : index
    %c160_91 = arith.constant 160 : index
    %102 = vector.load %arg12[%c0_90, %c160_91] : memref<16x1152xf32, #tpu.memory_space<vmem>>, vector<16x896xf32>
    %c112 = arith.constant 112 : index
    %c0_92 = arith.constant 0 : index
    %103 = vector.load %arg14[%c112, %c0_92] : memref<144x896xf32, #tpu.memory_space<vmem>>, vector<16x896xf32>
    tpu.vector_store %arg14[%c112, %c0_92], %102 {strides = array<i32>} : memref<144x896xf32, #tpu.memory_space<vmem>>, vector<16x896xf32>,
    %c0_93 = arith.constant 0 : index
    %c161_94 = arith.constant 161 : index
    %104 = vector.load %arg12[%c0_93, %c161_94] : memref<16x1152xf32, #tpu.memory_space<vmem>>, vector<16x896xf32>
    %c128_95 = arith.constant 128 : index
    %c0_96 = arith.constant 0 : index
    %105 = vector.load %arg14[%c128_95, %c0_96] : memref<144x896xf32, #tpu.memory_space<vmem>>, vector<16x896xf32>
    tpu.vector_store %arg14[%c128_95, %c0_96], %104 {strides = array<i32>} : memref<144x896xf32, #tpu.memory_space<vmem>>, vector<16x896xf32>,
    %c0_97 = arith.constant 0 : index
    %c0_98 = arith.constant 0 : index
    %106 = vector.load %arg5[%c0_97, %c0_98] : memref<16x144xf32, #tpu.memory_space<vmem>>, vector<16x144xf32>
    %c0_99 = arith.constant 0 : index
    %c0_100 = arith.constant 0 : index
    %107 = vector.load %arg14[%c0_99, %c0_100] : memref<144x896xf32, #tpu.memory_space<vmem>>, vector<144x896xf32>
    %cst_101 = arith.constant dense<0.000000e+00> : vector<16x896xf32>
    %108 = tpu.matmul %106, %107, %cst_101 {dimension_numbers = #tpu.dot_dimension_numbers<[1], [0], [0], [1], [0, 0, 1, 1], [], []>} : vector<16x144xf32>, vector<144x896xf32>, vector<16x896xf32> -> vector<16x896xf32>
    %c0_102 = arith.constant 0 : index
    %c128_103 = arith.constant 128 : index
    %109 = vector.load %arg12[%c0_102, %c128_103] : memref<16x1152xf32, #tpu.memory_space<vmem>>, vector<16x896xf32>
    %c0_104 = arith.constant 0 : index
    %c0_105 = arith.constant 0 : index
    %110 = vector.load %arg6[%c0_104, %c0_105] : memref<16x1xf32, #tpu.memory_space<vmem>>, vector<16x1xf32>
    %111 = vector.broadcast %110 : vector<16x1xf32> to vector<16x896xf32>
    %112 = arith.addf %108, %111 : vector<16x896xf32>
    %113 = arith.addf %112, %109 : vector<16x896xf32>
    %cst_106 = arith.constant 0.000000e+00 : f32
    %114 = vector.broadcast %cst_106 : f32 to vector<16x896xf32>
    %115 = arith.maximumf %113, %114 : vector<16x896xf32>
    %116 = vector.broadcast %0 : vector<1x896xf32> to vector<16x896xf32>
    %117 = arith.mulf %115, %116 : vector<16x896xf32>
    %c0_107 = arith.constant 0 : index
    %c128_108 = arith.constant 128 : index
    %118 = vector.load %arg13[%c0_107, %c128_108] : memref<16x1152xf32, #tpu.memory_space<vmem>>, vector<16x896xf32>
    tpu.vector_store %arg13[%c0_107, %c128_108], %117 {strides = array<i32>} : memref<16x1152xf32, #tpu.memory_space<vmem>>, vector<16x896xf32>,
    %c0_109 = arith.constant 0 : index
    %c95_110 = arith.constant 95 : index
    %119 = vector.load %arg13[%c0_109, %c95_110] : memref<16x1152xf32, #tpu.memory_space<vmem>>, vector<16x896xf32>
    %c0_111 = arith.constant 0 : index
    %c0_112 = arith.constant 0 : index
    %120 = vector.load %arg14[%c0_111, %c0_112] : memref<144x896xf32, #tpu.memory_space<vmem>>, vector<16x896xf32>
    tpu.vector_store %arg14[%c0_111, %c0_112], %119 {strides = array<i32>} : memref<144x896xf32, #tpu.memory_space<vmem>>, vector<16x896xf32>,
    %c0_113 = arith.constant 0 : index
    %c96_114 = arith.constant 96 : index
    %121 = vector.load %arg13[%c0_113, %c96_114] : memref<16x1152xf32, #tpu.memory_space<vmem>>, vector<16x896xf32>
    %c16_115 = arith.constant 16 : index
    %c0_116 = arith.constant 0 : index
    %122 = vector.load %arg14[%c16_115, %c0_116] : memref<144x896xf32, #tpu.memory_space<vmem>>, vector<16x896xf32>
    tpu.vector_store %arg14[%c16_115, %c0_116], %121 {strides = array<i32>} : memref<144x896xf32, #tpu.memory_space<vmem>>, vector<16x896xf32>,
    %c0_117 = arith.constant 0 : index
    %c97_118 = arith.constant 97 : index
    %123 = vector.load %arg13[%c0_117, %c97_118] : memref<16x1152xf32, #tpu.memory_space<vmem>>, vector<16x896xf32>
    %c32_119 = arith.constant 32 : index
    %c0_120 = arith.constant 0 : index
    %124 = vector.load %arg14[%c32_119, %c0_120] : memref<144x896xf32, #tpu.memory_space<vmem>>, vector<16x896xf32>
    tpu.vector_store %arg14[%c32_119, %c0_120], %123 {strides = array<i32>} : memref<144x896xf32, #tpu.memory_space<vmem>>, vector<16x896xf32>,
    %c0_121 = arith.constant 0 : index
    %c127_122 = arith.constant 127 : index
    %125 = vector.load %arg13[%c0_121, %c127_122] : memref<16x1152xf32, #tpu.memory_space<vmem>>, vector<16x896xf32>
    %c48_123 = arith.constant 48 : index
    %c0_124 = arith.constant 0 : index
    %126 = vector.load %arg14[%c48_123, %c0_124] : memref<144x896xf32, #tpu.memory_space<vmem>>, vector<16x896xf32>
    tpu.vector_store %arg14[%c48_123, %c0_124], %125 {strides = array<i32>} : memref<144x896xf32, #tpu.memory_space<vmem>>, vector<16x896xf32>,
    %c0_125 = arith.constant 0 : index
    %c128_126 = arith.constant 128 : index
    %127 = vector.load %arg13[%c0_125, %c128_126] : memref<16x1152xf32, #tpu.memory_space<vmem>>, vector<16x896xf32>
    %c64_127 = arith.constant 64 : index
    %c0_128 = arith.constant 0 : index
    %128 = vector.load %arg14[%c64_127, %c0_128] : memref<144x896xf32, #tpu.memory_space<vmem>>, vector<16x896xf32>
    tpu.vector_store %arg14[%c64_127, %c0_128], %127 {strides = array<i32>} : memref<144x896xf32, #tpu.memory_space<vmem>>, vector<16x896xf32>,
    %c0_129 = arith.constant 0 : index
    %c129_130 = arith.constant 129 : index
    %129 = vector.load %arg13[%c0_129, %c129_130] : memref<16x1152xf32, #tpu.memory_space<vmem>>, vector<16x896xf32>
    %c80_131 = arith.constant 80 : index
    %c0_132 = arith.constant 0 : index
    %130 = vector.load %arg14[%c80_131, %c0_132] : memref<144x896xf32, #tpu.memory_space<vmem>>, vector<16x896xf32>
    tpu.vector_store %arg14[%c80_131, %c0_132], %129 {strides = array<i32>} : memref<144x896xf32, #tpu.memory_space<vmem>>, vector<16x896xf32>,
    %c0_133 = arith.constant 0 : index
    %c159_134 = arith.constant 159 : index
    %131 = vector.load %arg13[%c0_133, %c159_134] : memref<16x1152xf32, #tpu.memory_space<vmem>>, vector<16x896xf32>
    %c96_135 = arith.constant 96 : index
    %c0_136 = arith.constant 0 : index
    %132 = vector.load %arg14[%c96_135, %c0_136] : memref<144x896xf32, #tpu.memory_space<vmem>>, vector<16x896xf32>
    tpu.vector_store %arg14[%c96_135, %c0_136], %131 {strides = array<i32>} : memref<144x896xf32, #tpu.memory_space<vmem>>, vector<16x896xf32>,
    %c0_137 = arith.constant 0 : index
    %c160_138 = arith.constant 160 : index
    %133 = vector.load %arg13[%c0_137, %c160_138] : memref<16x1152xf32, #tpu.memory_space<vmem>>, vector<16x896xf32>
    %c112_139 = arith.constant 112 : index
    %c0_140 = arith.constant 0 : index
    %134 = vector.load %arg14[%c112_139, %c0_140] : memref<144x896xf32, #tpu.memory_space<vmem>>, vector<16x896xf32>
    tpu.vector_store %arg14[%c112_139, %c0_140], %133 {strides = array<i32>} : memref<144x896xf32, #tpu.memory_space<vmem>>, vector<16x896xf32>,
    %c0_141 = arith.constant 0 : index
    %c161_142 = arith.constant 161 : index
    %135 = vector.load %arg13[%c0_141, %c161_142] : memref<16x1152xf32, #tpu.memory_space<vmem>>, vector<16x896xf32>
    %c128_143 = arith.constant 128 : index
    %c0_144 = arith.constant 0 : index
    %136 = vector.load %arg14[%c128_143, %c0_144] : memref<144x896xf32, #tpu.memory_space<vmem>>, vector<16x896xf32>
    tpu.vector_store %arg14[%c128_143, %c0_144], %135 {strides = array<i32>} : memref<144x896xf32, #tpu.memory_space<vmem>>, vector<16x896xf32>,
    %c0_145 = arith.constant 0 : index
    %c0_146 = arith.constant 0 : index
    %137 = vector.load %arg7[%c0_145, %c0_146] : memref<16x144xf32, #tpu.memory_space<vmem>>, vector<16x144xf32>
    %c0_147 = arith.constant 0 : index
    %c0_148 = arith.constant 0 : index
    %138 = vector.load %arg14[%c0_147, %c0_148] : memref<144x896xf32, #tpu.memory_space<vmem>>, vector<144x896xf32>
    %cst_149 = arith.constant dense<0.000000e+00> : vector<16x896xf32>
    %139 = tpu.matmul %137, %138, %cst_149 {dimension_numbers = #tpu.dot_dimension_numbers<[1], [0], [0], [1], [0, 0, 1, 1], [], []>} : vector<16x144xf32>, vector<144x896xf32>, vector<16x896xf32> -> vector<16x896xf32>
    %c0_150 = arith.constant 0 : index
    %c128_151 = arith.constant 128 : index
    %140 = vector.load %arg13[%c0_150, %c128_151] : memref<16x1152xf32, #tpu.memory_space<vmem>>, vector<16x896xf32>
    %c0_152 = arith.constant 0 : index
    %c0_153 = arith.constant 0 : index
    %141 = vector.load %arg8[%c0_152, %c0_153] : memref<16x1xf32, #tpu.memory_space<vmem>>, vector<16x1xf32>
    %142 = vector.broadcast %141 : vector<16x1xf32> to vector<16x896xf32>
    %143 = arith.addf %139, %142 : vector<16x896xf32>
    %144 = arith.addf %143, %140 : vector<16x896xf32>
    %cst_154 = arith.constant 0.000000e+00 : f32
    %145 = vector.broadcast %cst_154 : f32 to vector<16x896xf32>
    %146 = arith.maximumf %144, %145 : vector<16x896xf32>
    %c0_155 = arith.constant 0 : index
    %c0_156 = arith.constant 0 : index
    %c0_157 = arith.constant 0 : index
    %147 = vector.load %arg9[%c0_155, %c0_156, %c0_157] : memref<10x16x896xf32, #tpu.memory_space<vmem>>, vector<1x16x896xf32>
    %148 = vector.shape_cast %147 : vector<1x16x896xf32> to vector<16x896xf32>
    %149 = arith.mulf %146, %148 : vector<16x896xf32>
    %cst_158 = arith.constant dense<0.000000e+00> : vector<16xf32>
    %150 = vector.multi_reduction <add>, %149, %cst_158 [1] : vector<16x896xf32> to vector<16xf32>
    %151 = vector.shape_cast %150 : vector<16xf32> to vector<16x1xf32>
    %cst_159 = arith.constant dense<0.000000e+00> : vector<1xf32>
    %152 = vector.multi_reduction <add>, %151, %cst_159 [0] : vector<16x1xf32> to vector<1xf32>
    %153 = vector.shape_cast %152 : vector<1xf32> to vector<1x1xf32>
    %c1_160 = arith.constant 1 : index
    %c0_161 = arith.constant 0 : index
    %c0_162 = arith.constant 0 : index
    %154 = vector.load %arg9[%c1_160, %c0_161, %c0_162] : memref<10x16x896xf32, #tpu.memory_space<vmem>>, vector<1x16x896xf32>
    %155 = vector.shape_cast %154 : vector<1x16x896xf32> to vector<16x896xf32>
    %156 = arith.mulf %146, %155 : vector<16x896xf32>
    %cst_163 = arith.constant dense<0.000000e+00> : vector<16xf32>
    %157 = vector.multi_reduction <add>, %156, %cst_163 [1] : vector<16x896xf32> to vector<16xf32>
    %158 = vector.shape_cast %157 : vector<16xf32> to vector<16x1xf32>
    %cst_164 = arith.constant dense<0.000000e+00> : vector<1xf32>
    %159 = vector.multi_reduction <add>, %158, %cst_164 [0] : vector<16x1xf32> to vector<1xf32>
    %160 = vector.shape_cast %159 : vector<1xf32> to vector<1x1xf32>
    %c2_165 = arith.constant 2 : index
    %c0_166 = arith.constant 0 : index
    %c0_167 = arith.constant 0 : index
    %161 = vector.load %arg9[%c2_165, %c0_166, %c0_167] : memref<10x16x896xf32, #tpu.memory_space<vmem>>, vector<1x16x896xf32>
    %162 = vector.shape_cast %161 : vector<1x16x896xf32> to vector<16x896xf32>
    %163 = arith.mulf %146, %162 : vector<16x896xf32>
    %cst_168 = arith.constant dense<0.000000e+00> : vector<16xf32>
    %164 = vector.multi_reduction <add>, %163, %cst_168 [1] : vector<16x896xf32> to vector<16xf32>
    %165 = vector.shape_cast %164 : vector<16xf32> to vector<16x1xf32>
    %cst_169 = arith.constant dense<0.000000e+00> : vector<1xf32>
    %166 = vector.multi_reduction <add>, %165, %cst_169 [0] : vector<16x1xf32> to vector<1xf32>
    %167 = vector.shape_cast %166 : vector<1xf32> to vector<1x1xf32>
    %c3 = arith.constant 3 : index
    %c0_170 = arith.constant 0 : index
    %c0_171 = arith.constant 0 : index
    %168 = vector.load %arg9[%c3, %c0_170, %c0_171] : memref<10x16x896xf32, #tpu.memory_space<vmem>>, vector<1x16x896xf32>
    %169 = vector.shape_cast %168 : vector<1x16x896xf32> to vector<16x896xf32>
    %170 = arith.mulf %146, %169 : vector<16x896xf32>
    %cst_172 = arith.constant dense<0.000000e+00> : vector<16xf32>
    %171 = vector.multi_reduction <add>, %170, %cst_172 [1] : vector<16x896xf32> to vector<16xf32>
    %172 = vector.shape_cast %171 : vector<16xf32> to vector<16x1xf32>
    %cst_173 = arith.constant dense<0.000000e+00> : vector<1xf32>
    %173 = vector.multi_reduction <add>, %172, %cst_173 [0] : vector<16x1xf32> to vector<1xf32>
    %174 = vector.shape_cast %173 : vector<1xf32> to vector<1x1xf32>
    %c4 = arith.constant 4 : index
    %c0_174 = arith.constant 0 : index
    %c0_175 = arith.constant 0 : index
    %175 = vector.load %arg9[%c4, %c0_174, %c0_175] : memref<10x16x896xf32, #tpu.memory_space<vmem>>, vector<1x16x896xf32>
    %176 = vector.shape_cast %175 : vector<1x16x896xf32> to vector<16x896xf32>
    %177 = arith.mulf %146, %176 : vector<16x896xf32>
    %cst_176 = arith.constant dense<0.000000e+00> : vector<16xf32>
    %178 = vector.multi_reduction <add>, %177, %cst_176 [1] : vector<16x896xf32> to vector<16xf32>
    %179 = vector.shape_cast %178 : vector<16xf32> to vector<16x1xf32>
    %cst_177 = arith.constant dense<0.000000e+00> : vector<1xf32>
    %180 = vector.multi_reduction <add>, %179, %cst_177 [0] : vector<16x1xf32> to vector<1xf32>
    %181 = vector.shape_cast %180 : vector<1xf32> to vector<1x1xf32>
    %c5 = arith.constant 5 : index
    %c0_178 = arith.constant 0 : index
    %c0_179 = arith.constant 0 : index
    %182 = vector.load %arg9[%c5, %c0_178, %c0_179] : memref<10x16x896xf32, #tpu.memory_space<vmem>>, vector<1x16x896xf32>
    %183 = vector.shape_cast %182 : vector<1x16x896xf32> to vector<16x896xf32>
    %184 = arith.mulf %146, %183 : vector<16x896xf32>
    %cst_180 = arith.constant dense<0.000000e+00> : vector<16xf32>
    %185 = vector.multi_reduction <add>, %184, %cst_180 [1] : vector<16x896xf32> to vector<16xf32>
    %186 = vector.shape_cast %185 : vector<16xf32> to vector<16x1xf32>
    %cst_181 = arith.constant dense<0.000000e+00> : vector<1xf32>
    %187 = vector.multi_reduction <add>, %186, %cst_181 [0] : vector<16x1xf32> to vector<1xf32>
    %188 = vector.shape_cast %187 : vector<1xf32> to vector<1x1xf32>
    %c6 = arith.constant 6 : index
    %c0_182 = arith.constant 0 : index
    %c0_183 = arith.constant 0 : index
    %189 = vector.load %arg9[%c6, %c0_182, %c0_183] : memref<10x16x896xf32, #tpu.memory_space<vmem>>, vector<1x16x896xf32>
    %190 = vector.shape_cast %189 : vector<1x16x896xf32> to vector<16x896xf32>
    %191 = arith.mulf %146, %190 : vector<16x896xf32>
    %cst_184 = arith.constant dense<0.000000e+00> : vector<16xf32>
    %192 = vector.multi_reduction <add>, %191, %cst_184 [1] : vector<16x896xf32> to vector<16xf32>
    %193 = vector.shape_cast %192 : vector<16xf32> to vector<16x1xf32>
    %cst_185 = arith.constant dense<0.000000e+00> : vector<1xf32>
    %194 = vector.multi_reduction <add>, %193, %cst_185 [0] : vector<16x1xf32> to vector<1xf32>
    %195 = vector.shape_cast %194 : vector<1xf32> to vector<1x1xf32>
    %c7 = arith.constant 7 : index
    %c0_186 = arith.constant 0 : index
    %c0_187 = arith.constant 0 : index
    %196 = vector.load %arg9[%c7, %c0_186, %c0_187] : memref<10x16x896xf32, #tpu.memory_space<vmem>>, vector<1x16x896xf32>
    %197 = vector.shape_cast %196 : vector<1x16x896xf32> to vector<16x896xf32>
    %198 = arith.mulf %146, %197 : vector<16x896xf32>
    %cst_188 = arith.constant dense<0.000000e+00> : vector<16xf32>
    %199 = vector.multi_reduction <add>, %198, %cst_188 [1] : vector<16x896xf32> to vector<16xf32>
    %200 = vector.shape_cast %199 : vector<16xf32> to vector<16x1xf32>
    %cst_189 = arith.constant dense<0.000000e+00> : vector<1xf32>
    %201 = vector.multi_reduction <add>, %200, %cst_189 [0] : vector<16x1xf32> to vector<1xf32>
    %202 = vector.shape_cast %201 : vector<1xf32> to vector<1x1xf32>
    %c8 = arith.constant 8 : index
    %c0_190 = arith.constant 0 : index
    %c0_191 = arith.constant 0 : index
    %203 = vector.load %arg9[%c8, %c0_190, %c0_191] : memref<10x16x896xf32, #tpu.memory_space<vmem>>, vector<1x16x896xf32>
    %204 = vector.shape_cast %203 : vector<1x16x896xf32> to vector<16x896xf32>
    %205 = arith.mulf %146, %204 : vector<16x896xf32>
    %cst_192 = arith.constant dense<0.000000e+00> : vector<16xf32>
    %206 = vector.multi_reduction <add>, %205, %cst_192 [1] : vector<16x896xf32> to vector<16xf32>
    %207 = vector.shape_cast %206 : vector<16xf32> to vector<16x1xf32>
    %cst_193 = arith.constant dense<0.000000e+00> : vector<1xf32>
    %208 = vector.multi_reduction <add>, %207, %cst_193 [0] : vector<16x1xf32> to vector<1xf32>
    %209 = vector.shape_cast %208 : vector<1xf32> to vector<1x1xf32>
    %c9 = arith.constant 9 : index
    %c0_194 = arith.constant 0 : index
    %c0_195 = arith.constant 0 : index
    %210 = vector.load %arg9[%c9, %c0_194, %c0_195] : memref<10x16x896xf32, #tpu.memory_space<vmem>>, vector<1x16x896xf32>
    %211 = vector.shape_cast %210 : vector<1x16x896xf32> to vector<16x896xf32>
    %212 = arith.mulf %146, %211 : vector<16x896xf32>
    %cst_196 = arith.constant dense<0.000000e+00> : vector<16xf32>
    %213 = vector.multi_reduction <add>, %212, %cst_196 [1] : vector<16x896xf32> to vector<16xf32>
    %214 = vector.shape_cast %213 : vector<16xf32> to vector<16x1xf32>
    %cst_197 = arith.constant dense<0.000000e+00> : vector<1xf32>
    %215 = vector.multi_reduction <add>, %214, %cst_197 [0] : vector<16x1xf32> to vector<1xf32>
    %216 = vector.shape_cast %215 : vector<1xf32> to vector<1x1xf32>
    %217 = tpu.concatenate %153, %160, %167, %174, %181, %188, %195, %202, %209, %216 in 1 : vector<1x1xf32>, vector<1x1xf32>, vector<1x1xf32>, vector<1x1xf32>, vector<1x1xf32>, vector<1x1xf32>, vector<1x1xf32>, vector<1x1xf32>, vector<1x1xf32>, vector<1x1xf32> -> vector<1x10xf32>
    %c0_198 = arith.constant 0 : index
    %c0_199 = arith.constant 0 : index
    %218 = vector.load %arg10[%c0_198, %c0_199] : memref<1x10xf32, #tpu.memory_space<vmem>>, vector<1x10xf32>
    %219 = arith.addf %217, %218 : vector<1x10xf32>
    %c0_200 = arith.constant 0 : index
    %c0_201 = arith.constant 0 : index
    %c0_202 = arith.constant 0 : index
    %220 = vector.load %arg11[%c0_200, %c0_201, %c0_202] : memref<1x1x10xf32, #tpu.memory_space<vmem>>, vector<1x1x10xf32>
    %221 = vector.shape_cast %220 : vector<1x1x10xf32> to vector<1x10xf32>
    %222 = vector.shape_cast %219 : vector<1x10xf32> to vector<1x1x10xf32>
    tpu.vector_store %arg11[%c0_200, %c0_201, %c0_202], %222 {strides = array<i32>} : memref<1x1x10xf32, #tpu.memory_space<vmem>>, vector<1x1x10xf32>,
    return
  }
  func.func @transform_0(%arg0: i32) -> (i32, i32, i32) {
    %c0_i32 = arith.constant 0 : i32
    %c0_i32_0 = arith.constant 0 : i32
    %c0_i32_1 = arith.constant 0 : i32
    return %arg0, %c0_i32, %c0_i32_0 : i32, i32, i32
  }
  func.func @transform_1(%arg0: i32) -> (i32, i32) {
    %c0_i32 = arith.constant 0 : i32
    %c0_i32_0 = arith.constant 0 : i32
    %c0_i32_1 = arith.constant 0 : i32
    return %c0_i32, %c0_i32_0 : i32, i32
  }
  func.func @transform_2(%arg0: i32) -> (i32, i32, i32, i32) {
    %c0_i32 = arith.constant 0 : i32
    %c0_i32_0 = arith.constant 0 : i32
    %c0_i32_1 = arith.constant 0 : i32
    %c0_i32_2 = arith.constant 0 : i32
    %c0_i32_3 = arith.constant 0 : i32
    return %c0_i32, %c0_i32_0, %c0_i32_1, %c0_i32_2 : i32, i32, i32, i32
  }
  func.func @transform_3(%arg0: i32) -> (i32, i32) {
    %c0_i32 = arith.constant 0 : i32
    %c0_i32_0 = arith.constant 0 : i32
    %c0_i32_1 = arith.constant 0 : i32
    return %c0_i32, %c0_i32_0 : i32, i32
  }
  func.func @transform_4(%arg0: i32) -> (i32, i32) {
    %c0_i32 = arith.constant 0 : i32
    %c0_i32_0 = arith.constant 0 : i32
    %c0_i32_1 = arith.constant 0 : i32
    return %c0_i32, %c0_i32_0 : i32, i32
  }
  func.func @transform_5(%arg0: i32) -> (i32, i32) {
    %c0_i32 = arith.constant 0 : i32
    %c0_i32_0 = arith.constant 0 : i32
    %c0_i32_1 = arith.constant 0 : i32
    return %c0_i32, %c0_i32_0 : i32, i32
  }
  func.func @transform_6(%arg0: i32) -> (i32, i32) {
    %c0_i32 = arith.constant 0 : i32
    %c0_i32_0 = arith.constant 0 : i32
    %c0_i32_1 = arith.constant 0 : i32
    return %c0_i32, %c0_i32_0 : i32, i32
  }
  func.func @transform_7(%arg0: i32) -> (i32, i32) {
    %c0_i32 = arith.constant 0 : i32
    %c0_i32_0 = arith.constant 0 : i32
    %c0_i32_1 = arith.constant 0 : i32
    return %c0_i32, %c0_i32_0 : i32, i32
  }
  func.func @transform_8(%arg0: i32) -> (i32, i32, i32) {
    %c0_i32 = arith.constant 0 : i32
    %c0_i32_0 = arith.constant 0 : i32
    %c0_i32_1 = arith.constant 0 : i32
    %c0_i32_2 = arith.constant 0 : i32
    return %c0_i32, %c0_i32_0, %c0_i32_1 : i32, i32, i32
  }
  func.func @transform_9(%arg0: i32) -> (i32, i32) {
    %c0_i32 = arith.constant 0 : i32
    %c0_i32_0 = arith.constant 0 : i32
    %c0_i32_1 = arith.constant 0 : i32
    return %c0_i32, %c0_i32_0 : i32, i32
  }
  func.func @transform_10(%arg0: i32) -> (i32, i32, i32) {
    %c0_i32 = arith.constant 0 : i32
    %c0_i32_0 = arith.constant 0 : i32
    %c0_i32_1 = arith.constant 0 : i32
    return %arg0, %c0_i32, %c0_i32_0 : i32, i32, i32
  }
}

</mosaic_0001>

<bundles_post_ra>
// kernel: resnet_forward.1
= control target key start
LH: loop header
LB: loop body
LE: loop exit
PB: predicated region body
PF: predicated region fallthrough
CT: control target
= control target key end

     0   :  { %15 = vsyncpa [#allocation6], 0  ;;  %s9402_s0 = inlined_call_operand.vmem [shape: f32[2,1,1152], index: 0, kind: input, shape index: {}]   ;;  %s9403_s1 = inlined_call_operand.vmem [shape: f32[1,896], index: 1, kind: input, shape index: {}]   ;;  %s9404_s2 = inlined_call_operand.vmem [shape: f32[3,3,16,1], index: 2, kind: input, shape index: {}]   ;;  %s9405_s3 = inlined_call_operand.vmem [shape: f32[16,1], index: 3, kind: input, shape index: {}]   ;;  %s9406_s4 = inlined_call_operand.vmem [shape: f32[16,144], index: 4, kind: input, shape index: {}]   ;;  %s9407_s5 = inlined_call_operand.vmem [shape: f32[16,1], index: 5, kind: input, shape index: {}]   ;;  %s9408_s6 = inlined_call_operand.vmem [shape: f32[16,144], index: 6, kind: input, shape index: {}]   ;;  %s9409_s7 = inlined_call_operand.vmem [shape: f32[16,1], index: 7, kind: input, shape index: {}]   ;;  %s9410_s8 = inlined_call_operand.hbm [shape: f32[10,16,896], index: 8, kind: input, shape index: {}]   ;;  %s9411_s9 = inlined_call_operand.vmem [shape: f32[1,10], index: 9, kind: input, shape index: {}]   ;;  %s9412_s10 = inlined_call_operand.hbm [shape: f32[2,1,10], index: 10, kind: output, shape index: {}]  }
   0x1   :  { %16 = vsyncpa [#allocation7], 0 }
   0x2   :  { %18 = vsyncpa [#allocation7 + $0x1], 0  ;;  %s6010_s13 = smov 0   ;;  %s6012_s14 = smov 0  }
   0x3   :  { %s6014_s15 = smov 0   ;;  %s6016_s16 = smov 0  }
   0x4 LB: > { %s6031_s17 = sadd.s32 4294967295, %s5935_s16   ;;  %s5081_s18 = sadd.s32 4294967294, %s5935_s16   ;;  %s5935_s16 = sphi %s6016_s16, %s10077_s16   ;;  %s5931_s15 = sphi %s6014_s15, %s10076_s15   ;;  %s5927_s14 = sphi %s6012_s14, %s10075_s14   ;;  %s5923_s13 = sphi %s6010_s13, %s10074_s13  }
   0x5   : > { %s6035_s19 = sadd.s32 1, %s5935_s16   ;;  %s246_s20 = sadd.s32 1, %s5931_s15 }
   0x6   : > { %s243_s21 = ssub.s32 %s5935_s16, %s6035_s19  ;;  %p256_p0 = scmp.ne.s32.totalorder %s5931_s15, %s5927_s14 }
   0x7   : > { %p244_p1 = scmp.eq.s32.totalorder %s243_s21, 0  ;;  %p257_p2 = scmp.eq.s32.totalorder %s6031_s17, 1 }
   0x8   : > { %p262_p3 = scmp.ne.s32.totalorder %s5927_s14, %s5923_s13  ;;  %p263_p4 = scmp.eq.s32.totalorder %s5081_s18, 1 }
   0x9   : > { %s6046_s22 = scalar_select %p244_p1, %s5931_s15, %s246_s20  }
   0xa   : > { %p6048_p5 = por %p257_p2, %p256_p0  ;;  %p6052_p6 = por %p263_p4, %p262_p3 }
   0xb   : > { %p5082_p7 = scmp.ge.s32.totalorder %s5935_s16, 1  ;;  %p270_p8 = scmp.lt.s32.totalorder %s5935_s16, 3 }
   0xc   : > { %p5148_p9 = scmp.eq.s32.totalorder %s6031_s17, 0  ;;  %s302_s27 = sshll.u32 %s9410_s8, 4  ;;  %s303_s27 = int_to_ptr.hbm [resolvable:$true] %s302_s27 }
   0xd   : > { %p271_p10 = pnand %p5082_p7, %p270_p8  ;;  %s5937_s28 = smov [#allocation5]  }
   0xe   : > { %s304_s29 = sshll.u32 %s5937_s28, 4  ;;  %s5938_s30 = smov 896   ;;  %s305_s29 = int_to_ptr.vmem [resolvable:$true] %s304_s29 }
   0xf   : > { %p5140_p11 = pneg %p271_p10  ;;  %s5939_s11 = smov 56  }
  0x10   : > { %330 = sbr.rel (%p271_p10) target bundleno = 2370 (0x942), region = 60 }
  0x11   : > { %p5141_p12 = pnand %p5148_p9, %p5140_p11 }
  0x13   : > { %5143 = dma.hbm_to_vmem [thread:$0]  (!%p5141_p12), %s303_s27, 17920, %s305_s29, [#allocation6], %s5938_s30, %s5938_s30, %s5939_s11  }
  0x15   : > { %5914 = dma.done.wait (%p5148_p9), [#allocation6], 17920  }
  0x16   : > { %5916 = vsyncadd (%p5148_p9), [#allocation6], 4294949376  ;;  %v5940_v0 = vmov 0   ;;  %v5087_v1 = vld [vmem:[%s9404_s2 + $0x10] sm:$0xff]  ;;  %v381_v2 = vld [vmem:[%s9404_s2] sm:$0xff]  ;;  %p367_p13 = scmp.lt.s32.totalorder %s6031_s17, 1 }
  0x17   : > { %5202 = vset.pattern.permute.xlu1 %v5940_v0  ;;  %5201 = vset.pattern.permute.xlu0 %v5940_v0  ;;  %v5089_v3 = vld [vmem:[%s9404_s2 + $0x20] sm:$0xff]  ;;  %v5088_v4 = vld [vmem:[%s9404_s2 + $0x18] sm:$0xff]  ;;  %v382_v5 = vld [vmem:[%s9404_s2 + $0x8] sm:$0xff]  ;;  %s5941_s11 = smov 127   ;;  %s5942_s12 = smov 126   ;;  %vm519_vm0 = vcmask 1039360  }
  0x18   : > { %5203 = vset.pattern.permute.xlu2 %v5940_v0  ;;  %447 = vperm.xlu1 %5202, %v5087_v1   ;;  %v5091_v6 = vld [vmem:[%s9404_s2 + $0x30] sm:$0xff]  ;;  %v5090_v7 = vld [vmem:[%s9404_s2 + $0x28] sm:$0xff]  ;;  %v5092_v8 = vld [vmem:[%s9404_s2 + $0x38] sm:$0xff]  ;;  %s368_s26 = scalar_select %p367_p13, %s6031_s17, 1  ;;  %vm643_vm1 = vcmask 1031168   ;;  %vm767_vm2 = vcmask 785408  }
  0x19   : > { %385 = vperm.xlu0 %5201, %v381_v2   ;;  %571 = vperm.xlu2 %5203, %v5089_v3   ;;  %s5943_s18 = smov 96   ;;  %s5945_s20 = smov 94   ;;  %vm899_vm3 = vcmask 777216   ;;  %vm1039_vm4 = vcmask 769024   ;;  %vm1163_vm5 = vcmask 523264   ;;  %vm1287_vm6 = vcmask 515072  }
  0x1a   : > { %s5133_s27 = smul.u32 9, %s368_s26  ;;  %s5946_s29 = smov 64   ;;  %vm1411_vm7 = vcmask 506880   ;;  %vm1609_vm8 = vcmask 269312   ;;  %vm1822_vm9 = vcmask 261120   ;;  %vm1929_vm10 = vcmask 252928  }
  0x1b   : > { %s5947_s25 = smov 63   ;;  %s5953_s21 = smov 1   ;;  %vm2036_vm11 = vcmask 7168   ;;  %vm2277_vm12 = vcmask 793600   ;;  %vm2688_vm13 = vcmask 130048   ;;  %vm4981_vm14 = vcmask 15360  }
  0x1c   : > { %s6097_s30 = scalar_lea.vmem %s9402_s0, %s5133_s27  ;;  %s5944_s27 = smov 95   ;;  %vm4983_vm15 = vcmask 23552  }
  0x1d   : > { %v380_v9 = vld [vmem:[%s6097_s30] sm:$0xff] }
  0x1e   : > { %v6100_v10 = vperm.slane %v380_v9, 3  ;;  %v6102_v11 = vperm.slane %v380_v9, 2  ;;  %v6104_v12 = vperm.slane %v380_v9, 0  ;;  %v6112_v17 = vperm.slane %v380_v9, 6 }
  0x1f   : > { %v6114_v18 = vperm.slane %v380_v9, 5  ;;  %v6116_v19 = vperm.slane %v380_v9, 1  ;;  %v6124_v24 = vperm.slane %v380_v9, 4  ;;  %v6132_v28 = vperm.slane %v380_v9, 7 }
  0x20   : > { %452 = vperm.xlu1 %5202, %v5088_v4  }
  0x21   : > { %390 = vperm.xlu0 %5201, %v382_v5   ;;  %695 = vperm.xlu2 %5203, %v5091_v6  }
  0x29   : > { %576 = vperm.xlu0 %5201, %v5090_v7  }
  0x31   : > { %700 = vperm.xlu0 %5201, %v5092_v8  }
  0x73   : > { %v572_v36 = vpop.permute.xlu2 %571 }
  0x74   : > { %v579_v37 = vmul.f32 %v572_v36, %v6104_v12  ;;  %v581_v38 = vmul.f32 %v572_v36, %v6102_v11  ;;  %v582_v41 = vmul.f32 %v572_v36, %v6100_v10  ;;  %v584_v42 = vmul.f32 %v572_v36, %v6114_v18 }
  0x75   : > { %v580_v43 = vmul.f32 %v572_v36, %v6116_v19  ;;  %v585_v45 = vmul.f32 %v572_v36, %v6112_v17  ;;  %v583_v47 = vmul.f32 %v572_v36, %v6124_v24  ;;  %v586_v50 = vmul.f32 %v572_v36, %v6132_v28 }
  0x7b   : > { %v696_v54 = vpop.permute.xlu2 %695 }
  0x7c   : > { %v705_v56 = vmul.f32 %v696_v54, %v6102_v11  ;;  %v703_v58 = vmul.f32 %v696_v54, %v6104_v12  ;;  %v708_v59 = vmul.f32 %v696_v54, %v6114_v18  ;;  %v704_v60 = vmul.f32 %v696_v54, %v6116_v19 }
  0x7d   : > { %v706_v63 = vmul.f32 %v696_v54, %v6100_v10  ;;  %v707_v1 = vmul.f32 %v696_v54, %v6124_v24  ;;  %v709_v3 = vmul.f32 %v696_v54, %v6112_v17  ;;  %v710_v5 = vmul.f32 %v696_v54, %v6132_v28 }
  0x8a   : > { %v448_v13 = vpop.permute.xlu1 %447 }
  0x8b   : > { %v458_v14 = vmul.f32 %v448_v13, %v6100_v10  ;;  %v457_v15 = vmul.f32 %v448_v13, %v6102_v11  ;;  %v455_v16 = vmul.f32 %v448_v13, %v6104_v12  ;;  %v461_v20 = vmul.f32 %v448_v13, %v6112_v17  ;;  %v6145_v35 = vpop.permute.xlu0 %385 }
  0x8c   : > { %v460_v21 = vmul.f32 %v448_v13, %v6114_v18  ;;  %v456_v22 = vmul.f32 %v448_v13, %v6116_v19  ;;  %v459_v27 = vmul.f32 %v448_v13, %v6124_v24  ;;  %v462_v31 = vmul.f32 %v448_v13, %v6132_v28 }
  0x8d   : > { %493 = vrot.lane.b32.xlu1 %v458_v14, %s5941_s11  ;;  %491 = vrot.lane.b32.xlu0 %v457_v15, %s5941_s11  ;;  %v5094_v15 = vld [vmem:[%s9404_s2 + $0x48] sm:$0xff] }
  0x8e   : > { %487 = vrot.lane.b32.xlu2 %v455_v16, %s5941_s11 }
  0x92   : > { %v453_v23 = vpop.permute.xlu1 %452 }
  0x93   : > { %v464_v25 = vmul.f32 %v453_v23, %v6116_v19  ;;  %v463_v26 = vmul.f32 %v453_v23, %v6104_v12  ;;  %v467_v29 = vmul.f32 %v453_v23, %v6124_v24  ;;  %v466_v30 = vmul.f32 %v453_v23, %v6100_v10  ;;  %v6154_v40 = vpop.permute.xlu0 %390 }
  0x94   : > { %v470_v32 = vmul.f32 %v453_v23, %v6132_v28  ;;  %v469_v33 = vmul.f32 %v453_v23, %v6112_v17  ;;  %v465_v34 = vmul.f32 %v453_v23, %v6102_v11  ;;  %v468_v39 = vmul.f32 %v453_v23, %v6114_v18 }
  0x95   : > { %499 = vrot.lane.b32.xlu1 %v461_v20, %s5941_s11  ;;  %497 = vrot.lane.b32.xlu0 %v460_v21, %s5941_s11 }
  0x96   : > { %489 = vrot.lane.b32.xlu2 %v456_v22, %s5941_s11 }
  0x9b   : > { %v577_v44 = vpop.permute.xlu0 %576 }
  0x9c   : > { %v587_v46 = vmul.f32 %v577_v44, %v6104_v12  ;;  %v588_v48 = vmul.f32 %v577_v44, %v6116_v19  ;;  %v590_v49 = vmul.f32 %v577_v44, %v6100_v10  ;;  %v591_v51 = vmul.f32 %v577_v44, %v6124_v24 }
  0x9d   : > { %505 = vrot.lane.b32.xlu1 %v464_v25, %s5941_s11  ;;  %503 = vrot.lane.b32.xlu0 %v463_v26, %s5941_s11  ;;  %v593_v52 = vmul.f32 %v577_v44, %v6112_v17  ;;  %v589_v53 = vmul.f32 %v577_v44, %v6102_v11  ;;  %v594_v55 = vmul.f32 %v577_v44, %v6132_v28  ;;  %v5093_v25 = vld [vmem:[%s9404_s2 + $0x40] sm:$0xff] }
  0x9e   : > { %495 = vrot.lane.b32.xlu2 %v459_v27, %s5941_s11  ;;  %v592_v57 = vmul.f32 %v577_v44, %v6114_v18 }
  0xa3   : > { %v701_v61 = vpop.permute.xlu0 %700 }
  0xa4   : > { %v711_v0 = vmul.f32 %v701_v61, %v6104_v12  ;;  %v714_v4 = vmul.f32 %v701_v61, %v6100_v10  ;;  %v712_v7 = vmul.f32 %v701_v61, %v6116_v19  ;;  %v717_v8 = vmul.f32 %v701_v61, %v6112_v17 }
  0xa5   : > { %511 = vrot.lane.b32.xlu1 %v467_v29, %s5941_s11  ;;  %509 = vrot.lane.b32.xlu0 %v466_v30, %s5941_s11  ;;  %v713_v9 = vmul.f32 %v701_v61, %v6102_v11  ;;  %v715_v16 = vmul.f32 %v701_v61, %v6124_v24  ;;  %v716_v20 = vmul.f32 %v701_v61, %v6114_v18 }
  0xa6   : > { %501 = vrot.lane.b32.xlu2 %v462_v31, %s5941_s11  ;;  %v718_v23 = vmul.f32 %v701_v61, %v6132_v28 }
  0xad   : > { %517 = vrot.lane.b32.xlu1 %v470_v32, %s5941_s11  ;;  %515 = vrot.lane.b32.xlu0 %v469_v33, %s5941_s11 }
  0xae   : > { %507 = vrot.lane.b32.xlu2 %v465_v34, %s5941_s11 }
  0xb5   : > { %611 = vrot.lane.b32.xlu1 %v579_v37, %s5942_s12  ;;  %615 = vrot.lane.b32.xlu0 %v581_v38, %s5942_s12 }
  0xb6   : > { %513 = vrot.lane.b32.xlu2 %v468_v39, %s5941_s11 }
  0xbd   : > { %617 = vrot.lane.b32.xlu1 %v582_v41, %s5942_s12  ;;  %621 = vrot.lane.b32.xlu0 %v584_v42, %s5942_s12 }
  0xbe   : > { %613 = vrot.lane.b32.xlu2 %v580_v43, %s5942_s12 }
  0xc5   : > { %623 = vrot.lane.b32.xlu1 %v585_v45, %s5942_s12  ;;  %627 = vrot.lane.b32.xlu0 %v587_v46, %s5942_s12 }
  0xc6   : > { %619 = vrot.lane.b32.xlu2 %v583_v47, %s5942_s12 }
  0xcd   : > { %629 = vrot.lane.b32.xlu1 %v588_v48, %s5942_s12  ;;  %633 = vrot.lane.b32.xlu0 %v590_v49, %s5942_s12 }
  0xce   : > { %625 = vrot.lane.b32.xlu2 %v586_v50, %s5942_s12 }
  0xd5   : > { %635 = vrot.lane.b32.xlu1 %v591_v51, %s5942_s12  ;;  %639 = vrot.lane.b32.xlu0 %v593_v52, %s5942_s12 }
  0xd6   : > { %631 = vrot.lane.b32.xlu2 %v589_v53, %s5942_s12 }
  0xdd   : > { %641 = vrot.lane.b32.xlu1 %v594_v55, %s5942_s12  ;;  %739 = vrot.lane.b32.xlu0 %v705_v56, %s5943_s18  ;;  %v6291_v56 = vld [vmem:[%s6097_s30 + $0x1] sm:$0xff]  ;;  %s5949_s30 = smov 33  }
  0xde   : > { %637 = vrot.lane.b32.xlu2 %v592_v57, %s5942_s12  ;;  %v6294_v57 = vperm.slane %v6291_v56, 2  ;;  %s5948_s12 = smov 62  }
  0xe5   : > { %735 = vrot.lane.b32.xlu1 %v703_v58, %s5943_s18  ;;  %745 = vrot.lane.b32.xlu0 %v708_v59, %s5943_s18  ;;  %v6297_v58 = vperm.slane %v6291_v56, 1  ;;  %v6300_v59 = vperm.slane %v6291_v56, 0 }
  0xe6   : > { %737 = vrot.lane.b32.xlu2 %v704_v60, %s5943_s18 }
  0xe8   : > { %v6192_v62 = vpop.permute.xlu2 %487 }
  0xed   : > { %741 = vrot.lane.b32.xlu1 %v706_v63, %s5943_s18  ;;  %751 = vrot.lane.b32.xlu0 %v711_v0, %s5943_s18 }
  0xee   : > { %743 = vrot.lane.b32.xlu2 %v707_v1, %s5943_s18 }
  0xf0   : > { %v6200_v2 = vpop.permute.xlu2 %489 }
  0xf5   : > { %747 = vrot.lane.b32.xlu1 %v709_v3, %s5943_s18  ;;  %757 = vrot.lane.b32.xlu0 %v714_v4, %s5943_s18  ;;  %v6313_v4 = vperm.slane %v6291_v56, 5 }
  0xf6   : > { %749 = vrot.lane.b32.xlu2 %v710_v5, %s5943_s18  ;;  %v6316_v5 = vperm.slane %v6291_v56, 4 }
  0xf8   : > { %v6208_v6 = vpop.permute.xlu2 %495 }
  0xfd   : > { %753 = vrot.lane.b32.xlu1 %v712_v7, %s5943_s18  ;;  %763 = vrot.lane.b32.xlu0 %v717_v8, %s5943_s18  ;;  %v6319_v7 = vperm.slane %v6291_v56, 3 }
  0xfe   : > { %755 = vrot.lane.b32.xlu2 %v713_v9, %s5943_s18 }
  0xff   : > { %v6216_v13 = vpop.permute.xlu0 %491  ;;  %v6256_v38 = vpop.permute.xlu1 %493 }
 0x100   : > { %v6218_v14 = vpop.permute.xlu2 %501 }
 0x105   : > { %759 = vrot.lane.b32.xlu1 %v715_v16, %s5943_s18  ;;  %825 = vperm.xlu0 %5201, %v5094_v15  }
 0x106   : > { %761 = vrot.lane.b32.xlu2 %v716_v20, %s5943_s18 }
 0x107   : > { %v6227_v21 = vpop.permute.xlu0 %497  ;;  %v6264_v43 = vpop.permute.xlu1 %499 }
 0x108   : > { %v6229_v22 = vpop.permute.xlu2 %507 }
 0x10d   : > { %765 = vrot.lane.b32.xlu1 %v718_v23, %s5943_s18  ;;  %v6332_v23 = vperm.slane %v6291_v56, 6 }
 0x10e   : > { %820 = vperm.xlu2 %5203, %v5093_v25  }
 0x10f   : > { %v6236_v26 = vpop.permute.xlu0 %503  ;;  %v6272_v47 = vpop.permute.xlu1 %505 }
 0x110   : > { %v6238_v27 = vpop.permute.xlu2 %513 }
 0x117   : > { %v6240_v29 = vpop.permute.xlu0 %509  ;;  %v6278_v50 = vpop.permute.xlu1 %511 }
 0x118   : > { %v6242_v30 = vpop.permute.xlu2 %613 }
 0x11f   : > { %v6244_v31 = vpop.permute.xlu0 %515  ;;  %v6284_v53 = vpop.permute.xlu1 %517 }
 0x120   : > { %v6246_v32 = vpop.permute.xlu2 %619 }
 0x127   : > { %v6248_v33 = vpop.permute.xlu0 %615  ;;  %v6304_v61 = vpop.permute.xlu1 %611 }
 0x128   : > { %v6250_v34 = vpop.permute.xlu2 %625 }
 0x12f   : > { %v6252_v36 = vpop.permute.xlu0 %621  ;;  %v6324_v15 = vpop.permute.xlu1 %617 }
 0x130   : > { %v6254_v37 = vpop.permute.xlu2 %631 }
 0x137   : > { %v6258_v39 = vpop.permute.xlu0 %627 }
 0x138   : > { %v6260_v41 = vpop.permute.xlu2 %637 }
 0x13f   : > { %v6262_v42 = vpop.permute.xlu0 %633 }
 0x140   : > { %v6266_v44 = vpop.permute.xlu2 %737 }
 0x147   : > { %v6268_v45 = vpop.permute.xlu0 %639 }
 0x148   : > { %v6270_v46 = vpop.permute.xlu2 %743 }
 0x149   : > { %9681 = vst [vmem:[#allocation11_spill] sm:$0xff] %v6270_v46 }
 0x14f   : > { %v6274_v48 = vpop.permute.xlu0 %739 }
 0x150   : > { %v6276_v49 = vpop.permute.xlu2 %749 }
 0x151   : > { %9682 = vst [vmem:[#allocation12_spill] sm:$0xff] %v6276_v49 }
 0x157   : > { %v6280_v51 = vpop.permute.xlu0 %745 }
 0x158   : > { %9683 = vst [vmem:[#allocation13_spill] sm:$0xff] %v6280_v51  ;;  %v6282_v52 = vpop.permute.xlu2 %755 }
 0x159   : > { %9684 = vst [vmem:[#allocation14_spill] sm:$0xff] %v6282_v52 }
 0x15f   : > { %v6286_v54 = vpop.permute.xlu0 %751 }
 0x160   : > { %9685 = vst [vmem:[#allocation15_spill] sm:$0xff] %v6286_v54  ;;  %v6288_v55 = vpop.permute.xlu2 %761 }
 0x161   : > { %9686 = vst [vmem:[#allocation16_spill] sm:$0xff] %v6288_v55  ;;  %v6338_v55 = vpop.permute.xlu1 %623 }
 0x167   : > { %v6302_v60 = vpop.permute.xlu0 %757 }
 0x168   : > { %9687 = vst [vmem:[#allocation17_spill] sm:$0xff] %v6302_v60  ;;  %v821_v63 = vpop.permute.xlu2 %820 }
 0x169   : > { %v845_v0 = vmul.f32 %v6294_v57, %v821_v63  ;;  %v844_v1 = vmul.f32 %v6297_v58, %v821_v63  ;;  %v843_v3 = vmul.f32 %v6300_v59, %v821_v63  ;;  %v848_v9 = vmul.f32 %v6313_v4, %v821_v63 }
 0x16a   : > { %v847_v16 = vmul.f32 %v6316_v5, %v821_v63  ;;  %v846_v20 = vmul.f32 %v6319_v7, %v821_v63 }
 0x16b   : > { %875 = vrot.lane.b32.xlu0 %v845_v0, %s5944_s27  ;;  %873 = vrot.lane.b32.xlu2 %v844_v1, %s5944_s27 }
 0x16c   : > { %871 = vrot.lane.b32.xlu1 %v843_v3, %s5944_s27  ;;  %v849_v3 = vmul.f32 %v6332_v23, %v821_v63  ;;  %v6348_v63 = vpop.permute.xlu1 %629 }
 0x16f   : > { %v6321_v8 = vpop.permute.xlu0 %763 }
 0x170   : > { %9688 = vst [vmem:[#allocation18_spill] sm:$0xff] %v6321_v8 }
 0x173   : > { %881 = vrot.lane.b32.xlu0 %v848_v9, %s5944_s27  ;;  %879 = vrot.lane.b32.xlu2 %v847_v16, %s5944_s27 }
 0x174   : > { %877 = vrot.lane.b32.xlu1 %v846_v20, %s5944_s27 }
 0x177   : > { %v826_v25 = vpop.permute.xlu0 %825 }
 0x178   : > { %v851_v0 = vmul.f32 %v6297_v58, %v826_v25  ;;  %v850_v1 = vmul.f32 %v6300_v59, %v826_v25  ;;  %v854_v9 = vmul.f32 %v6316_v5, %v826_v25  ;;  %v853_v16 = vmul.f32 %v6319_v7, %v826_v25 }
 0x179   : > { %v852_v20 = vmul.f32 %v6294_v57, %v826_v25 }
 0x17b   : > { %887 = vrot.lane.b32.xlu0 %v851_v0, %s5944_s27  ;;  %885 = vrot.lane.b32.xlu2 %v850_v1, %s5944_s27  ;;  %v5095_v0 = vld [vmem:[%s9404_s2 + $0x50] sm:$0xff]  ;;  %v856_v1 = vmul.f32 %v6332_v23, %v826_v25 }
 0x17c   : > { %883 = vrot.lane.b32.xlu1 %v849_v3, %s5944_s27  ;;  %v855_v3 = vmul.f32 %v6313_v4, %v826_v25 }
 0x183   : > { %893 = vrot.lane.b32.xlu0 %v854_v9, %s5944_s27  ;;  %891 = vrot.lane.b32.xlu2 %v853_v16, %s5944_s27  ;;  %v6357_v9 = vpop.permute.xlu1 %635  ;;  %v5096_v16 = vld [vmem:[%s9404_s2 + $0x58] sm:$0xff] }
 0x184   : > { %889 = vrot.lane.b32.xlu1 %v852_v20, %s5944_s27 }
 0x18b   : > { %950 = vperm.xlu0 %5201, %v5095_v0   ;;  %897 = vrot.lane.b32.xlu2 %v856_v1, %s5944_s27  ;;  %v6362_v20 = vpop.permute.xlu1 %641 }
 0x18c   : > { %895 = vrot.lane.b32.xlu1 %v855_v3, %s5944_s27 }
 0x193   : > { %v6364_v8 = vpop.permute.xlu1 %735 }
 0x194   : > { %955 = vperm.xlu1 %5202, %v5096_v16  }
 0x19b   : > { %v6366_v54 = vpop.permute.xlu1 %741 }
 0x19c   : > { %9689 = vst [vmem:[#allocation19_spill] sm:$0xff] %v6366_v54 }
 0x1a3   : > { %v6368_v52 = vpop.permute.xlu1 %747 }
 0x1a4   : > { %9690 = vst [vmem:[#allocation20_spill] sm:$0xff] %v6368_v52 }
 0x1ab   : > { %v6370_v25 = vpop.permute.xlu1 %753 }
 0x1ac   : > { %9691 = vst [vmem:[#allocation21_spill] sm:$0xff] %v6370_v25 }
 0x1b3   : > { %v6372_v0 = vpop.permute.xlu1 %759 }
 0x1b4   : > { %9692 = vst [vmem:[#allocation22_spill] sm:$0xff] %v6372_v0 }
 0x1bb   : > { %v6374_v1 = vpop.permute.xlu1 %765 }
 0x1bc   : > { %9693 = vst [vmem:[#allocation23_spill] sm:$0xff] %v6374_v1 }
 0x1dd   : > { %v6376_v3 = vpop.permute.xlu0 %875 }
 0x1de   : > { %9694 = vst [vmem:[#allocation24_spill] sm:$0xff] %v6376_v3  ;;  %v6378_v60 = vpop.permute.xlu1 %871 }
 0x1df   : > { %9695 = vst [vmem:[#allocation25_spill] sm:$0xff] %v6378_v60 }
 0x1e5   : > { %v6380_v49 = vpop.permute.xlu0 %881 }
 0x1e6   : > { %9696 = vst [vmem:[#allocation26_spill] sm:$0xff] %v6380_v49  ;;  %v6382_v16 = vpop.permute.xlu1 %877 }
 0x1e7   : > { %9697 = vst [vmem:[#allocation27_spill] sm:$0xff] %v6382_v16 }
 0x1ed   : > { %v6384_v46 = vpop.permute.xlu0 %887 }
 0x1ee   : > { %9698 = vst [vmem:[#allocation28_spill] sm:$0xff] %v6384_v46  ;;  %v6386_v51 = vpop.permute.xlu1 %883 }
 0x1ef   : > { %9699 = vst [vmem:[#allocation29_spill] sm:$0xff] %v6386_v51 }
 0x1f5   : > { %v6388_v54 = vpop.permute.xlu0 %893 }
 0x1f6   : > { %9700 = vst [vmem:[#allocation30_spill] sm:$0xff] %v6388_v54  ;;  %v6390_v52 = vpop.permute.xlu1 %889 }
 0x1f7   : > { %9701 = vst [vmem:[#allocation31_spill] sm:$0xff] %v6390_v52 }
 0x1fd   : > { %v951_v25 = vpop.permute.xlu0 %950 }
 0x1fe   : > { %v976_v0 = vmul.f32 %v951_v25, %v6297_v58  ;;  %v975_v1 = vmul.f32 %v951_v25, %v6300_v59  ;;  %v977_v3 = vmul.f32 %v951_v25, %v6294_v57  ;;  %v6398_v46 = vpop.permute.xlu1 %895  ;;  %v979_v54 = vmul.f32 %v951_v25, %v6316_v5 }
 0x1ff   : > { %9702 = vst [vmem:[#allocation32_spill] sm:$0xff] %v6398_v46  ;;  %v978_v52 = vmul.f32 %v951_v25, %v6319_v7  ;;  %v980_v51 = vmul.f32 %v951_v25, %v6313_v4  ;;  %v981_v46 = vmul.f32 %v951_v25, %v6332_v23 }
 0x200   : > { %1009 = vrot.lane.b32.xlu0 %v976_v0, %s5945_s20  ;;  %1007 = vrot.lane.b32.xlu2 %v975_v1, %s5945_s20  ;;  %v6407_v0 = vperm.slane %v6291_v56, 7 }
 0x201   : > { %1011 = vrot.lane.b32.xlu1 %v977_v3, %s5945_s20 }
 0x202   : > { %v982_v3 = vmul.f32 %v6407_v0, %v951_v25 }
 0x206   : > { %v956_v1 = vpop.permute.xlu1 %955 }
 0x207   : > { %v983_v16 = vmul.f32 %v956_v1, %v6300_v59  ;;  %v988_v56 = vmul.f32 %v956_v1, %v6313_v4  ;;  %v987_v25 = vmul.f32 %v956_v1, %v6316_v5 }
 0x208   : > { %1015 = vrot.lane.b32.xlu0 %v979_v54, %s5945_s20  ;;  %1013 = vrot.lane.b32.xlu2 %v978_v52, %s5945_s20  ;;  %v985_v52 = vmul.f32 %v956_v1, %v6294_v57  ;;  %v986_v54 = vmul.f32 %v956_v1, %v6319_v7 }
 0x209   : > { %1017 = vrot.lane.b32.xlu1 %v980_v51, %s5945_s20  ;;  %v984_v51 = vmul.f32 %v956_v1, %v6297_v58 }
 0x210   : > { %1021 = vrot.lane.b32.xlu0 %v982_v3, %s5945_s20  ;;  %1019 = vrot.lane.b32.xlu2 %v981_v46, %s5945_s20  ;;  %v989_v46 = vmul.f32 %v956_v1, %v6332_v23  ;;  %v990_v3 = vmul.f32 %v6407_v0, %v956_v1 }
 0x211   : > { %1023 = vrot.lane.b32.xlu1 %v983_v16, %s5945_s20  ;;  %v5097_v16 = vld [vmem:[%s9404_s2 + $0x60] sm:$0xff] }
 0x218   : > { %1027 = vrot.lane.b32.xlu0 %v985_v52, %s5945_s20  ;;  %1025 = vrot.lane.b32.xlu2 %v984_v51, %s5945_s20  ;;  %v5098_v52 = vld [vmem:[%s9404_s2 + $0x68] sm:$0xff] }
 0x219   : > { %1029 = vrot.lane.b32.xlu1 %v986_v54, %s5945_s20 }
 0x220   : > { %1033 = vrot.lane.b32.xlu0 %v988_v56, %s5945_s20  ;;  %1031 = vrot.lane.b32.xlu2 %v987_v25, %s5945_s20 }
 0x221   : > { %1035 = vrot.lane.b32.xlu1 %v989_v46, %s5945_s20 }
 0x228   : > { %1091 = vperm.xlu0 %5201, %v5097_v16   ;;  %1037 = vrot.lane.b32.xlu2 %v990_v3, %s5945_s20  ;;  %s5952_s20 = smov 31  }
 0x229   : > { %1096 = vperm.xlu1 %5202, %v5098_v52  }
 0x272   : > { %v6435_v51 = vpop.permute.xlu0 %1009 }
 0x273   : > { %9703 = vst [vmem:[#allocation33_spill] sm:$0xff] %v6435_v51  ;;  %v6437_v54 = vpop.permute.xlu1 %1011 }
 0x274   : > { %9704 = vst [vmem:[#allocation34_spill] sm:$0xff] %v6437_v54 }
 0x27a   : > { %v6439_v56 = vpop.permute.xlu0 %1015 }
 0x27b   : > { %9705 = vst [vmem:[#allocation35_spill] sm:$0xff] %v6439_v56  ;;  %v6441_v25 = vpop.permute.xlu1 %1017 }
 0x27c   : > { %9706 = vst [vmem:[#allocation36_spill] sm:$0xff] %v6441_v25 }
 0x282   : > { %v6443_v46 = vpop.permute.xlu0 %1021 }
 0x283   : > { %9707 = vst [vmem:[#allocation37_spill] sm:$0xff] %v6443_v46  ;;  %v6447_v1 = vpop.permute.xlu1 %1023 }
 0x284   : > { %9709 = vst [vmem:[#allocation39_spill] sm:$0xff] %v6447_v1 }
 0x28a   : > { %v6445_v49 = vpop.permute.xlu0 %1027 }
 0x28b   : > { %9708 = vst [vmem:[#allocation38_spill] sm:$0xff] %v6445_v49  ;;  %v6451_v16 = vpop.permute.xlu1 %1029 }
 0x28c   : > { %9711 = vst [vmem:[#allocation41_spill] sm:$0xff] %v6451_v16 }
 0x292   : > { %v6449_v60 = vpop.permute.xlu0 %1033 }
 0x293   : > { %9710 = vst [vmem:[#allocation40_spill] sm:$0xff] %v6449_v60  ;;  %v6459_v49 = vpop.permute.xlu1 %1035 }
 0x294   : > { %9712 = vst [vmem:[#allocation42_spill] sm:$0xff] %v6459_v49 }
 0x29a   : > { %v1092_v3 = vpop.permute.xlu0 %1091 }
 0x29b   : > { %v1100_v52 = vmul.f32 %v1092_v3, %v6297_v58  ;;  %v1099_v51 = vmul.f32 %v1092_v3, %v6300_v59  ;;  %v1101_v54 = vmul.f32 %v1092_v3, %v6294_v57  ;;  %v1103_v60 = vmul.f32 %v1092_v3, %v6316_v5  ;;  %v1097_v46 = vpop.permute.xlu1 %1096 }
 0x29c   : > { %v1102_v16 = vmul.f32 %v1092_v3, %v6319_v7  ;;  %v1104_v1 = vmul.f32 %v1092_v3, %v6313_v4  ;;  %v1109_v49 = vmul.f32 %v1097_v46, %v6294_v57 }
 0x29d   : > { %1133 = vrot.lane.b32.xlu0 %v1100_v52, %s5946_s29  ;;  %1131 = vrot.lane.b32.xlu2 %v1099_v51, %s5946_s29  ;;  %v1106_v52 = vmul.f32 %v1092_v3, %v6407_v0  ;;  %v1105_v51 = vmul.f32 %v1092_v3, %v6332_v23  ;;  %v1111_v3 = vmul.f32 %v1097_v46, %v6316_v5 }
 0x29e   : > { %1135 = vrot.lane.b32.xlu1 %v1101_v54, %s5946_s29  ;;  %v1107_v54 = vmul.f32 %v1097_v46, %v6300_v59 }
 0x2a5   : > { %1139 = vrot.lane.b32.xlu0 %v1103_v60, %s5946_s29  ;;  %1137 = vrot.lane.b32.xlu2 %v1102_v16, %s5946_s29  ;;  %v1108_v60 = vmul.f32 %v1097_v46, %v6297_v58  ;;  %v1110_v16 = vmul.f32 %v1097_v46, %v6319_v7 }
 0x2a6   : > { %1141 = vrot.lane.b32.xlu1 %v1104_v1, %s5946_s29  ;;  %v1112_v1 = vmul.f32 %v1097_v46, %v6313_v4 }
 0x2ad   : > { %1145 = vrot.lane.b32.xlu0 %v1106_v52, %s5946_s29  ;;  %1143 = vrot.lane.b32.xlu2 %v1105_v51, %s5946_s29  ;;  %v1113_v52 = vmul.f32 %v1097_v46, %v6332_v23  ;;  %v1114_v51 = vmul.f32 %v1097_v46, %v6407_v0 }
 0x2ae   : > { %1147 = vrot.lane.b32.xlu1 %v1107_v54, %s5946_s29  ;;  %v5100_v54 = vld [vmem:[%s9404_s2 + $0x78] sm:$0xff] }
 0x2b5   : > { %1151 = vrot.lane.b32.xlu0 %v1109_v49, %s5946_s29  ;;  %1149 = vrot.lane.b32.xlu2 %v1108_v60, %s5946_s29  ;;  %v5099_v49 = vld [vmem:[%s9404_s2 + $0x70] sm:$0xff] }
 0x2b6   : > { %1153 = vrot.lane.b32.xlu1 %v1110_v16, %s5946_s29 }
 0x2bd   : > { %1157 = vrot.lane.b32.xlu0 %v1112_v1, %s5946_s29  ;;  %1155 = vrot.lane.b32.xlu2 %v1111_v3, %s5946_s29 }
 0x2be   : > { %1159 = vrot.lane.b32.xlu1 %v1113_v52, %s5946_s29 }
 0x2c5   : > { %1215 = vperm.xlu0 %5201, %v5099_v49   ;;  %1161 = vrot.lane.b32.xlu2 %v1114_v51, %s5946_s29 }
 0x2c6   : > { %1220 = vperm.xlu1 %5202, %v5100_v54  }
 0x30f   : > { %v6493_v60 = vpop.permute.xlu0 %1133 }
 0x310   : > { %9713 = vst [vmem:[#allocation43_spill] sm:$0xff] %v6493_v60  ;;  %v6495_v16 = vpop.permute.xlu1 %1135 }
 0x311   : > { %9714 = vst [vmem:[#allocation44_spill] sm:$0xff] %v6495_v16 }
 0x317   : > { %v6497_v1 = vpop.permute.xlu0 %1139 }
 0x318   : > { %9715 = vst [vmem:[#allocation45_spill] sm:$0xff] %v6497_v1  ;;  %v6499_v3 = vpop.permute.xlu1 %1141 }
 0x319   : > { %9716 = vst [vmem:[#allocation46_spill] sm:$0xff] %v6499_v3 }
 0x31f   : > { %v6501_v52 = vpop.permute.xlu0 %1145 }
 0x320   : > { %9717 = vst [vmem:[#allocation47_spill] sm:$0xff] %v6501_v52  ;;  %v6505_v46 = vpop.permute.xlu1 %1147 }
 0x321   : > { %9719 = vst [vmem:[#allocation49_spill] sm:$0xff] %v6505_v46 }
 0x327   : > { %v6503_v25 = vpop.permute.xlu0 %1151 }
 0x328   : > { %9718 = vst [vmem:[#allocation48_spill] sm:$0xff] %v6503_v25  ;;  %v6509_v49 = vpop.permute.xlu1 %1153 }
 0x329   : > { %9721 = vst [vmem:[#allocation51_spill] sm:$0xff] %v6509_v49 }
 0x32f   : > { %v6507_v56 = vpop.permute.xlu0 %1157 }
 0x330   : > { %9720 = vst [vmem:[#allocation50_spill] sm:$0xff] %v6507_v56  ;;  %v6517_v25 = vpop.permute.xlu1 %1159 }
 0x331   : > { %9722 = vst [vmem:[#allocation52_spill] sm:$0xff] %v6517_v25 }
 0x337   : > { %v1216_v51 = vpop.permute.xlu0 %1215 }
 0x338   : > { %v1224_v54 = vmul.f32 %v1216_v51, %v6297_v58  ;;  %v1223_v60 = vmul.f32 %v1216_v51, %v6300_v59  ;;  %v1225_v16 = vmul.f32 %v1216_v51, %v6294_v57  ;;  %v1227_v56 = vmul.f32 %v1216_v51, %v6316_v5  ;;  %v1221_v52 = vpop.permute.xlu1 %1220 }
 0x339   : > { %v1226_v49 = vmul.f32 %v1216_v51, %v6319_v7  ;;  %v1228_v46 = vmul.f32 %v1216_v51, %v6313_v4  ;;  %v1233_v25 = vmul.f32 %v1221_v52, %v6294_v57 }
 0x33a   : > { %1257 = vrot.lane.b32.xlu0 %v1224_v54, %s5947_s25  ;;  %1255 = vrot.lane.b32.xlu2 %v1223_v60, %s5947_s25  ;;  %v1230_v54 = vmul.f32 %v1216_v51, %v6407_v0  ;;  %v1229_v60 = vmul.f32 %v1216_v51, %v6332_v23  ;;  %v1236_v51 = vmul.f32 %v1221_v52, %v6313_v4 }
 0x33b   : > { %1259 = vrot.lane.b32.xlu1 %v1225_v16, %s5947_s25  ;;  %v1231_v16 = vmul.f32 %v1221_v52, %v6300_v59 }
 0x342   : > { %1263 = vrot.lane.b32.xlu0 %v1227_v56, %s5947_s25  ;;  %1261 = vrot.lane.b32.xlu2 %v1226_v49, %s5947_s25  ;;  %v1232_v56 = vmul.f32 %v1221_v52, %v6297_v58  ;;  %v1234_v49 = vmul.f32 %v1221_v52, %v6319_v7 }
 0x343   : > { %1265 = vrot.lane.b32.xlu1 %v1228_v46, %s5947_s25  ;;  %v6537_v46 = vpop.permute.xlu2 %873 }
 0x344   : > { %9723 = vst [vmem:[#allocation53_spill] sm:$0xff] %v6537_v46 }
 0x34a   : > { %1269 = vrot.lane.b32.xlu0 %v1230_v54, %s5947_s25  ;;  %1267 = vrot.lane.b32.xlu2 %v1229_v60, %s5947_s25  ;;  %v1235_v54 = vmul.f32 %v1221_v52, %v6316_v5  ;;  %v1237_v60 = vmul.f32 %v1221_v52, %v6332_v23 }
 0x34b   : > { %1271 = vrot.lane.b32.xlu1 %v1231_v16, %s5947_s25  ;;  %v6548_v16 = vpop.permute.xlu2 %879 }
 0x34c   : > { %9724 = vst [vmem:[#allocation54_spill] sm:$0xff] %v6548_v16 }
 0x352   : > { %1275 = vrot.lane.b32.xlu0 %v1233_v25, %s5947_s25  ;;  %1273 = vrot.lane.b32.xlu2 %v1232_v56, %s5947_s25  ;;  %v5101_v25 = vld [vmem:[%s9404_s2 + $0x80] sm:$0xff]  ;;  %v1238_v56 = vmul.f32 %v1221_v52, %v6407_v0 }
 0x353   : > { %1277 = vrot.lane.b32.xlu1 %v1234_v49, %s5947_s25  ;;  %v5102_v49 = vld [vmem:[%s9404_s2 + $0x88] sm:$0xff] }
 0x35a   : > { %1281 = vrot.lane.b32.xlu0 %v1236_v51, %s5947_s25  ;;  %1279 = vrot.lane.b32.xlu2 %v1235_v54, %s5947_s25  ;;  %v6555_v51 = vpop.permute.xlu2 %885 }
 0x35b   : > { %1283 = vrot.lane.b32.xlu1 %v1237_v60, %s5947_s25  ;;  %9725 = vst [vmem:[#allocation55_spill] sm:$0xff] %v6555_v51 }
 0x362   : > { %1339 = vperm.xlu0 %5201, %v5101_v25   ;;  %1285 = vrot.lane.b32.xlu2 %v1238_v56, %s5947_s25  ;;  %v6557_v54 = vpop.permute.xlu2 %891  ;;  %s5954_s25 = smov 97  }
 0x363   : > { %1344 = vperm.xlu1 %5202, %v5102_v49   ;;  %9726 = vst [vmem:[#allocation56_spill] sm:$0xff] %v6557_v54 }
 0x36a   : > { %v6559_v60 = vpop.permute.xlu2 %897 }
 0x36b   : > { %9727 = vst [vmem:[#allocation57_spill] sm:$0xff] %v6559_v60 }
 0x372   : > { %v6561_v3 = vpop.permute.xlu2 %1007 }
 0x373   : > { %9728 = vst [vmem:[#allocation58_spill] sm:$0xff] %v6561_v3 }
 0x37a   : > { %v6563_v1 = vpop.permute.xlu2 %1013 }
 0x37b   : > { %9729 = vst [vmem:[#allocation59_spill] sm:$0xff] %v6563_v1 }
 0x382   : > { %v6565_v16 = vpop.permute.xlu2 %1019 }
 0x383   : > { %9730 = vst [vmem:[#allocation60_spill] sm:$0xff] %v6565_v16 }
 0x38a   : > { %v6567_v52 = vpop.permute.xlu2 %1025 }
 0x38b   : > { %9731 = vst [vmem:[#allocation61_spill] sm:$0xff] %v6567_v52 }
 0x392   : > { %v6571_v25 = vpop.permute.xlu2 %1031 }
 0x393   : > { %9733 = vst [vmem:[#allocation63_spill] sm:$0xff] %v6571_v25 }
 0x39a   : > { %v6577_v51 = vpop.permute.xlu2 %1037 }
 0x39b   : > { %9736 = vst [vmem:[#allocation66_spill] sm:$0xff] %v6577_v51 }
 0x3a2   : > { %v6583_v3 = vpop.permute.xlu2 %1131 }
 0x3aa   : > { %v6589_v52 = vpop.permute.xlu2 %1137 }
 0x3ab   : > { %9741 = vst [vmem:[#allocation71_spill] sm:$0xff] %v6589_v52 }
 0x3ac   : > { %v6569_v46 = vpop.permute.xlu0 %1257 }
 0x3ad   : > { %9732 = vst [vmem:[#allocation62_spill] sm:$0xff] %v6569_v46  ;;  %v6573_v56 = vpop.permute.xlu1 %1259 }
 0x3ae   : > { %9734 = vst [vmem:[#allocation64_spill] sm:$0xff] %v6573_v56 }
 0x3b2   : > { %v6595_v56 = vpop.permute.xlu2 %1143 }
 0x3b3   : > { %9744 = vst [vmem:[#allocation74_spill] sm:$0xff] %v6595_v56 }
 0x3b4   : > { %v6575_v49 = vpop.permute.xlu0 %1263 }
 0x3b5   : > { %9735 = vst [vmem:[#allocation65_spill] sm:$0xff] %v6575_v49  ;;  %v6579_v54 = vpop.permute.xlu1 %1265 }
 0x3b6   : > { %9737 = vst [vmem:[#allocation67_spill] sm:$0xff] %v6579_v54 }
 0x3bc   : > { %v6581_v60 = vpop.permute.xlu0 %1269 }
 0x3bd   : > { %9738 = vst [vmem:[#allocation68_spill] sm:$0xff] %v6581_v60  ;;  %v6587_v16 = vpop.permute.xlu1 %1271 }
 0x3be   : > { %9740 = vst [vmem:[#allocation70_spill] sm:$0xff] %v6587_v16  ;;  %v6607_v16 = vpop.permute.xlu2 %1149 }
 0x3bf   : > { %9746 = vst [vmem:[#allocation76_spill] sm:$0xff] %v6607_v16 }
 0x3c4   : > { %v6585_v1 = vpop.permute.xlu0 %1275 }
 0x3c5   : > { %9739 = vst [vmem:[#allocation69_spill] sm:$0xff] %v6585_v1  ;;  %v6593_v25 = vpop.permute.xlu1 %1277 }
 0x3c6   : > { %9743 = vst [vmem:[#allocation73_spill] sm:$0xff] %v6593_v25  ;;  %v6618_v16 = vpop.permute.xlu2 %1155 }
 0x3c7   : > { %9747 = vst [vmem:[#allocation77_spill] sm:$0xff] %v6618_v16 }
 0x3cc   : > { %v6591_v46 = vpop.permute.xlu0 %1281 }
 0x3cd   : > { %9742 = vst [vmem:[#allocation72_spill] sm:$0xff] %v6591_v46  ;;  %v6603_v1 = vpop.permute.xlu1 %1283 }
 0x3ce   : > { %9745 = vst [vmem:[#allocation75_spill] sm:$0xff] %v6603_v1 }
 0x3d4   : > { %v1340_v49 = vpop.permute.xlu0 %1339 }
 0x3d5   : > { %v1348_v51 = vmul.f32 %v1340_v49, %v6297_v58  ;;  %v1347_v54 = vmul.f32 %v1340_v49, %v6300_v59  ;;  %v1349_v60 = vmul.f32 %v1340_v49, %v6294_v57  ;;  %v1351_v46 = vmul.f32 %v1340_v49, %v6316_v5 }
 0x3d6   : > { %v1350_v25 = vmul.f32 %v1340_v49, %v6319_v7  ;;  %v1352_v56 = vmul.f32 %v1340_v49, %v6313_v4 }
 0x3d7   : > { %1381 = vrot.lane.b32.xlu0 %v1348_v51, %s5948_s12  ;;  %1379 = vrot.lane.b32.xlu2 %v1347_v54, %s5948_s12  ;;  %v1345_v51 = vpop.permute.xlu1 %1344  ;;  %v1354_v54 = vmul.f32 %v1340_v49, %v6407_v0 }
 0x3d8   : > { %1383 = vrot.lane.b32.xlu1 %v1349_v60, %s5948_s12  ;;  %v1353_v60 = vmul.f32 %v1340_v49, %v6332_v23  ;;  %v1355_v1 = vmul.f32 %v1345_v51, %v6300_v59  ;;  %v6627_v59 = vpop.permute.xlu2 %1161  ;;  %v1360_v49 = vmul.f32 %v1345_v51, %v6313_v4  ;;  %v1459_v4 = vld [vmem:[%s9405_s3 + $0x8] sm:$0xff] }
 0x3d9   : > { %9748 = vst [vmem:[#allocation78_spill] sm:$0xff] %v6627_v59  ;;  %v415_v59 = vmul.f32 %v6114_v18, %v6145_v35 }
 0x3df   : > { %1387 = vrot.lane.b32.xlu0 %v1351_v46, %s5948_s12  ;;  %1385 = vrot.lane.b32.xlu2 %v1350_v25, %s5948_s12  ;;  %v1357_v46 = vmul.f32 %v1345_v51, %v6294_v57  ;;  %v1356_v25 = vmul.f32 %v1345_v51, %v6297_v58  ;;  %v1458_v58 = vld [vmem:[%s9405_s3] sm:$0xff] }
 0x3e0   : > { %1389 = vrot.lane.b32.xlu1 %v1352_v56, %s5948_s12  ;;  %v1358_v56 = vmul.f32 %v1345_v51, %v6319_v7  ;;  %v6635_v57 = vpop.permute.xlu2 %1255  ;;  %v1362_v7 = vmul.f32 %v1345_v51, %v6407_v0 }
 0x3e7   : > { %1393 = vrot.lane.b32.xlu0 %v1354_v54, %s5948_s12  ;;  %1391 = vrot.lane.b32.xlu2 %v1353_v60, %s5948_s12  ;;  %v1359_v54 = vmul.f32 %v1345_v51, %v6316_v5  ;;  %v371_v5 = vld [vmem:[%s9403_s1] sm:$0xff] }
 0x3e8   : > { %1395 = vrot.lane.b32.xlu1 %v1355_v1, %s5948_s12  ;;  %v1361_v1 = vmul.f32 %v1345_v51, %v6332_v23  ;;  %v6648_v23 = vperm.slane %v371_v5, 1  ;;  %v6650_v60 = vperm.slane %v371_v5, 0  ;;  %v6662_v0 = vperm.slane %v371_v5, 4 }
 0x3e9   : > { %v6664_v51 = vperm.slane %v371_v5, 3 }
 0x3ea   : > { %9749 = vst [vmem:[#allocation79_spill] sm:$0xff] %v6648_v23 }
 0x3eb   : > { %9750 = vst [vmem:[#allocation80_spill] sm:$0xff] %v6650_v60 }
 0x3ec   : > { %9753 = vst [vmem:[#allocation83_spill] sm:$0xff] %v6662_v0 }
 0x3ed   : > { %9754 = vst [vmem:[#allocation84_spill] sm:$0xff] %v6664_v51 }
 0x3ef   : > { %1399 = vrot.lane.b32.xlu0 %v1357_v46, %s5948_s12  ;;  %1397 = vrot.lane.b32.xlu2 %v1356_v25, %s5948_s12  ;;  %v6652_v46 = vpop.permute.xlu2 %1261  ;;  %v6654_v25 = vperm.slane %v371_v5, 2 }
 0x3f0   : > { %1401 = vrot.lane.b32.xlu1 %v1358_v56, %s5948_s12  ;;  %9751 = vst [vmem:[#allocation81_spill] sm:$0xff] %v6652_v46  ;;  %v6666_v56 = vperm.slane %v371_v5, 5  ;;  %v420_v46 = vmul.f32 %v6102_v11, %v6154_v40 }
 0x3f1   : > { %9752 = vst [vmem:[#allocation82_spill] sm:$0xff] %v6654_v25 }
 0x3f2   : > { %9755 = vst [vmem:[#allocation85_spill] sm:$0xff] %v6666_v56 }
 0x3f7   : > { %1405 = vrot.lane.b32.xlu0 %v1360_v49, %s5948_s12  ;;  %1403 = vrot.lane.b32.xlu2 %v1359_v54, %s5948_s12  ;;  %v6668_v49 = vpop.permute.xlu2 %1267  ;;  %v6676_v54 = vperm.slane %v371_v5, 6  ;;  %v413_v5 = vmul.f32 %v6100_v10, %v6145_v35 }
 0x3f8   : > { %1407 = vrot.lane.b32.xlu1 %v1361_v1, %s5948_s12  ;;  %9756 = vst [vmem:[#allocation86_spill] sm:$0xff] %v6668_v49  ;;  %v418_v49 = vmul.f32 %v6104_v12, %v6154_v40 }
 0x3f9   : > { %9757 = vst [vmem:[#allocation87_spill] sm:$0xff] %v6676_v54 }
 0x3ff   : > { %1462 = vperm.xlu0 %5201, %v1458_v58   ;;  %1409 = vrot.lane.b32.xlu2 %v1362_v7, %s5948_s12  ;;  %v6680_v1 = vpop.permute.xlu2 %1273  ;;  %s5951_s12 = smov 32  }
 0x400   : > { %1467 = vperm.xlu1 %5202, %v1459_v4   ;;  %9758 = vst [vmem:[#allocation88_spill] sm:$0xff] %v6680_v1  ;;  %v520_v1 = vsel %vm519_vm0, %v6192_v62, %v6200_v2  ;;  %v522_v62 = vsel %vm519_vm0, %v6216_v13, %v6256_v38 }
 0x407   : > { %1519 = vrot.lane.b32.xlu0 %v6648_v23, %s5944_s27  ;;  %1517 = vrot.lane.b32.xlu2 %v6650_v60, %s5944_s27  ;;  %v6682_v58 = vpop.permute.xlu2 %1279  ;;  %v416_v60 = vmul.f32 %v6112_v17, %v6145_v35 }
 0x408   : > { %1521 = vrot.lane.b32.xlu1 %v6654_v25, %s5944_s27  ;;  %9759 = vst [vmem:[#allocation89_spill] sm:$0xff] %v6682_v58  ;;  %v417_v25 = vmul.f32 %v6132_v28, %v6145_v35  ;;  %v419_v58 = vmul.f32 %v6116_v19, %v6154_v40 }
 0x40f   : > { %1525 = vrot.lane.b32.xlu0 %v6662_v0, %s5944_s27  ;;  %1523 = vrot.lane.b32.xlu2 %v6664_v51, %s5944_s27  ;;  %v6684_v7 = vpop.permute.xlu2 %1285  ;;  %v410_v51 = vmul.f32 %v6104_v12, %v6145_v35  ;;  %v526_v12 = vsel %vm519_vm0, %v6264_v43, %v6218_v14 }
 0x410   : > { %1527 = vrot.lane.b32.xlu1 %v6666_v56, %s5944_s27  ;;  %9760 = vst [vmem:[#allocation90_spill] sm:$0xff] %v6684_v7  ;;  %v411_v56 = vmul.f32 %v6116_v19, %v6145_v35  ;;  %v414_v7 = vmul.f32 %v6124_v24, %v6145_v35  ;;  %v521_v19 = vsel %vm519_vm0, %v6200_v2, %v6216_v13 }
 0x411   : > { %v423_v2 = vmul.f32 %v6114_v18, %v6154_v40  ;;  %v550_v13 = vadd.f32 %v520_v1, %v410_v51  ;;  %v557_v18 = vadd.f32 %v6218_v14, %v417_v25  ;;  %v530_v51 = vsel %vm519_vm0, %v6240_v29, %v6278_v50 }
 0x417   : > { %1529 = vrot.lane.b32.xlu2 %v6676_v54, %s5944_s27  ;;  %v412_v54 = vmul.f32 %v6102_v11, %v6145_v35  ;;  %v524_v11 = vsel %vm519_vm0, %v6208_v6, %v6227_v21 }
 0x419   : > { %v552_v52 = vadd.f32 %v522_v62, %v412_v54 }
 0x431   : > { %v6686_v4 = vpop.permute.xlu2 %1379 }
 0x432   : > { %9761 = vst [vmem:[#allocation91_spill] sm:$0xff] %v6686_v4  ;;  %v551_v4 = vadd.f32 %v521_v19, %v411_v56 }
 0x439   : > { %v6688_v0 = vpop.permute.xlu2 %1385 }
 0x43a   : > { %9762 = vst [vmem:[#allocation92_spill] sm:$0xff] %v6688_v0  ;;  %v422_v0 = vmul.f32 %v6124_v24, %v6154_v40  ;;  %v425_v24 = vmul.f32 %v6132_v28, %v6154_v40  ;;  %v528_v28 = vsel %vm519_vm0, %v6272_v47, %v6229_v22 }
 0x43b   : > { %v559_v14 = vadd.f32 %v528_v28, %v419_v58 }
 0x441   : > { %v6700_v23 = vpop.permute.xlu2 %1391 }
 0x442   : > { %9763 = vst [vmem:[#allocation93_spill] sm:$0xff] %v6700_v23  ;;  %v523_v23 = vsel %vm519_vm0, %v6256_v38, %v6208_v6  ;;  %v531_v6 = vsel %vm519_vm0, %v6278_v50, %v6238_v27 }
 0x443   : > { %v553_v38 = vadd.f32 %v523_v23, %v413_v5  ;;  %v554_v23 = vadd.f32 %v524_v11, %v414_v7  ;;  %v562_v25 = vadd.f32 %v531_v6, %v422_v0  ;;  %v647_v0 = vsel %vm643_vm1, %v6324_v15, %v6246_v32 }
 0x444   : > { %v681_v7 = vadd.f32 %v6250_v34, %v557_v18 }
 0x449   : > { %v6710_v16 = vpop.permute.xlu0 %1381  ;;  %v6782_v50 = vpop.permute.xlu2 %1397 }
 0x44a   : > { %9764 = vst [vmem:[#allocation94_spill] sm:$0xff] %v6710_v16  ;;  %v6722_v35 = vpop.permute.xlu1 %1383  ;;  %v421_v16 = vmul.f32 %v6100_v10, %v6154_v40  ;;  %v525_v10 = vsel %vm519_vm0, %v6227_v21, %v6264_v43  ;;  %v529_v43 = vsel %vm519_vm0, %v6229_v22, %v6240_v29  ;;  %v645_v29 = vsel %vm643_vm1, %v6242_v30, %v6248_v33 }
 0x44b   : > { %9765 = vst [vmem:[#allocation95_spill] sm:$0xff] %v6722_v35  ;;  %v424_v35 = vmul.f32 %v6112_v17, %v6154_v40  ;;  %v556_v17 = vadd.f32 %v526_v12, %v416_v60  ;;  %v527_v40 = vsel %vm519_vm0, %v6236_v26, %v6272_v47  ;;  %v555_v21 = vadd.f32 %v525_v10, %v415_v59 }
 0x44c   : > { %v532_v60 = vsel %vm519_vm0, %v6238_v27, %v6244_v31  ;;  %v533_v26 = vsel %vm519_vm0, %v6244_v31, %v6284_v53  ;;  %v644_v47 = vsel %vm643_vm1, %v6304_v61, %v6242_v30  ;;  %v558_v22 = vadd.f32 %v527_v40, %v418_v49 }
 0x44d   : > { %v646_v27 = vsel %vm643_vm1, %v6248_v33, %v6324_v15  ;;  %v560_v31 = vadd.f32 %v529_v43, %v420_v46  ;;  %v561_v54 = vadd.f32 %v530_v51, %v421_v16  ;;  %v565_v61 = vadd.f32 %v6284_v53, %v425_v24  ;;  %v9770_v51 = vld [vmem:[#allocation20_spill] sm:$0xff] }
 0x44e   : > { %v563_v49 = vadd.f32 %v532_v60, %v423_v2  ;;  %v564_v1 = vadd.f32 %v533_v26, %v424_v35  ;;  %v674_v58 = vadd.f32 %v644_v47, %v550_v13  ;;  %v648_v30 = vsel %vm643_vm1, %v6246_v32, %v6252_v36  ;;  %v9767_v2 = vld [vmem:[#allocation11_spill] sm:$0xff]  ;;  %v9771_v60 = vld [vmem:[#allocation17_spill] sm:$0xff]  ;;  %v9772_v26 = vld [vmem:[#allocation14_spill] sm:$0xff] }
 0x44f   : > { %v675_v33 = vadd.f32 %v645_v29, %v551_v4  ;;  %v676_v5 = vadd.f32 %v646_v27, %v552_v52  ;;  %v649_v16 = vsel %vm643_vm1, %v6252_v36, %v6338_v55  ;;  %v677_v53 = vadd.f32 %v647_v0, %v553_v38  ;;  %v9777_v0 = vld [vmem:[#allocation22_spill] sm:$0xff] }
 0x450   : > { %v650_v15 = vsel %vm643_vm1, %v6338_v55, %v6250_v34  ;;  %v651_v46 = vsel %vm643_vm1, %v6258_v39, %v6348_v63  ;;  %v678_v35 = vadd.f32 %v648_v30, %v554_v23  ;;  %v652_v32 = vsel %vm643_vm1, %v6348_v63, %v6254_v37 }
 0x451   : > { %v6774_v59 = vpop.permute.xlu0 %1387  ;;  %v653_v52 = vsel %vm643_vm1, %v6254_v37, %v6262_v42  ;;  %v654_v36 = vsel %vm643_vm1, %v6262_v42, %v6357_v9  ;;  %v679_v4 = vadd.f32 %v649_v16, %v555_v21  ;;  %v655_v34 = vsel %vm643_vm1, %v6357_v9, %v6260_v41  ;;  %v6839_v23 = vpop.permute.xlu2 %1403 }
 0x452   : > { %v6784_v56 = vpop.permute.xlu1 %1389  ;;  %v656_v39 = vsel %vm643_vm1, %v6260_v41, %v6268_v45  ;;  %v657_v55 = vsel %vm643_vm1, %v6268_v45, %v6362_v20  ;;  %v680_v63 = vadd.f32 %v650_v15, %v556_v17  ;;  %v682_v19 = vadd.f32 %v651_v46, %v558_v22  ;;  %v9766_v41 = vld [vmem:[#allocation13_spill] sm:$0xff]  ;;  %v9768_v17 = vld [vmem:[#allocation12_spill] sm:$0xff]  ;;  %v9774_v22 = vld [vmem:[#allocation15_spill] sm:$0xff] }
 0x453   : > { %v769_v37 = vsel %vm767_vm2, %v6266_v44, %v6274_v48  ;;  %v768_v42 = vsel %vm767_vm2, %v6364_v8, %v6266_v44  ;;  %v683_v9 = vadd.f32 %v652_v32, %v559_v14  ;;  %v684_v12 = vadd.f32 %v653_v52, %v560_v31  ;;  %v9769_v8 = vld [vmem:[#allocation19_spill] sm:$0xff]  ;;  %v9775_v31 = vld [vmem:[#allocation18_spill] sm:$0xff]  ;;  %v9780_v32 = vld [vmem:[#allocation53_spill] sm:$0xff] }
 0x454   : > { %v685_v24 = vadd.f32 %v654_v36, %v561_v54  ;;  %v772_v13 = vsel %vm767_vm2, %v9767_v2, %v9766_v41  ;;  %v686_v38 = vadd.f32 %v655_v34, %v562_v25  ;;  %v687_v11 = vadd.f32 %v656_v39, %v563_v49  ;;  %v9776_v54 = vld [vmem:[#allocation16_spill] sm:$0xff] }
 0x455   : > { %v688_v10 = vadd.f32 %v657_v55, %v564_v1  ;;  %v689_v28 = vadd.f32 %v6362_v20, %v565_v61  ;;  %v799_v18 = vadd.f32 %v769_v37, %v675_v33  ;;  %v805_v40 = vadd.f32 %v9768_v17, %v681_v7  ;;  %v9778_v7 = vld [vmem:[#allocation23_spill] sm:$0xff] }
 0x456   : > { %v798_v44 = vadd.f32 %v768_v42, %v674_v58  ;;  %v770_v6 = vsel %vm767_vm2, %v6274_v48, %v9769_v8  ;;  %v802_v21 = vadd.f32 %v772_v13, %v678_v35  ;;  %v771_v43 = vsel %vm767_vm2, %v9769_v8, %v9767_v2  ;;  %v9773_v48 = vld [vmem:[#allocation21_spill] sm:$0xff]  ;;  %v9779_v35 = vld [vmem:[#allocation24_spill] sm:$0xff]  ;;  %v9782_v42 = vld [vmem:[#allocation55_spill] sm:$0xff] }
 0x457   : > { %v773_v14 = vsel %vm767_vm2, %v9766_v41, %v9770_v51  ;;  %v774_v20 = vsel %vm767_vm2, %v9770_v51, %v9768_v17  ;;  %v777_v47 = vsel %vm767_vm2, %v9772_v26, %v9771_v60  ;;  %v775_v25 = vsel %vm767_vm2, %v9774_v22, %v9773_v48  ;;  %v9784_v41 = vld [vmem:[#allocation54_spill] sm:$0xff] }
 0x458   : > { %v776_v29 = vsel %vm767_vm2, %v9773_v48, %v9772_v26  ;;  %v800_v27 = vadd.f32 %v770_v6, %v676_v5  ;;  %v780_v61 = vsel %vm767_vm2, %v9776_v54, %v9775_v31  ;;  %v778_v49 = vsel %vm767_vm2, %v9771_v60, %v9777_v0  ;;  %v9787_v6 = vld [vmem:[#allocation29_spill] sm:$0xff]  ;;  %v9789_v60 = vld [vmem:[#allocation30_spill] sm:$0xff]  ;;  %v9790_v26 = vld [vmem:[#allocation56_spill] sm:$0xff] }
 0x459   : > { %v6827_v62 = vpop.permute.xlu0 %1393  ;;  %v779_v1 = vsel %vm767_vm2, %v9777_v0, %v9776_v54  ;;  %v801_v58 = vadd.f32 %v771_v43, %v677_v53  ;;  %v803_v30 = vadd.f32 %v773_v14, %v679_v4  ;;  %v804_v33 = vadd.f32 %v774_v20, %v680_v63  ;;  %v9781_v53 = vld [vmem:[#allocation25_spill] sm:$0xff]  ;;  %v9791_v48 = vld [vmem:[#allocation31_spill] sm:$0xff] }
 0x45a   : > { %v6832_v45 = vpop.permute.xlu1 %1395  ;;  %v781_v16 = vsel %vm767_vm2, %v9775_v31, %v9778_v7  ;;  %v808_v5 = vadd.f32 %v777_v47, %v684_v12  ;;  %v806_v15 = vadd.f32 %v775_v25, %v682_v19  ;;  %v807_v46 = vadd.f32 %v776_v29, %v683_v9  ;;  %v9783_v12 = vld [vmem:[#allocation26_spill] sm:$0xff]  ;;  %v9788_v14 = vld [vmem:[#allocation57_spill] sm:$0xff]  ;;  %v6912_v25 = vpop.permute.xlu2 %1409 }
 0x45b   : > { %v901_v52 = vsel %vm899_vm3, %v9780_v32, %v9779_v35  ;;  %v811_v34 = vadd.f32 %v780_v61, %v687_v11  ;;  %v809_v39 = vadd.f32 %v778_v49, %v685_v24  ;;  %v810_v55 = vadd.f32 %v779_v1, %v686_v38  ;;  %v9785_v24 = vld [vmem:[#allocation27_spill] sm:$0xff]  ;;  %v9792_v61 = vld [vmem:[#allocation32_spill] sm:$0xff]  ;;  %v9793_v49 = vld [vmem:[#allocation33_spill] sm:$0xff] }
 0x45c   : > { %v900_v4 = vsel %vm899_vm3, %v9781_v53, %v9780_v32  ;;  %v6881_v37 = vadd.f32 %v781_v16, %v688_v10  ;;  %v813_v19 = vadd.f32 %v9778_v7, %v689_v28  ;;  %v6885_v9 = vadd.f32 %v9782_v42, %v806_v15  ;;  %v9786_v10 = vld [vmem:[#allocation28_spill] sm:$0xff]  ;;  %v9794_v1 = vld [vmem:[#allocation58_spill] sm:$0xff] }
 0x45d   : > { %v904_v2 = vsel %vm899_vm3, %v9784_v41, %v9783_v12  ;;  %v930_v13 = vadd.f32 %v901_v52, %v800_v27  ;;  %v902_v38 = vsel %vm899_vm3, %v9779_v35, %v9785_v24  ;;  %v903_v11 = vsel %vm899_vm3, %v9785_v24, %v9784_v41  ;;  %v9796_v35 = vld [vmem:[#allocation59_spill] sm:$0xff] }
 0x45e   : > { %v906_v28 = vsel %vm899_vm3, %v9782_v42, %v9786_v10  ;;  %v928_v17 = vadd.f32 %v9781_v53, %v798_v44  ;;  %v929_v8 = vadd.f32 %v900_v4, %v799_v18  ;;  %v905_v43 = vsel %vm899_vm3, %v9783_v12, %v9787_v6  ;;  %v9797_v53 = vld [vmem:[#allocation35_spill] sm:$0xff] }
 0x45f   : > { %v933_v51 = vadd.f32 %v904_v2, %v803_v30  ;;  %v6904_v20 = vadd.f32 %v9788_v14, %v813_v19  ;;  %v909_v47 = vsel %vm899_vm3, %v9790_v26, %v9789_v60  ;;  %v907_v22 = vsel %vm899_vm3, %v9786_v10, %v9791_v48  ;;  %v9798_v19 = vld [vmem:[#allocation36_spill] sm:$0xff]  ;;  %v9799_v41 = vld [vmem:[#allocation43_spill] sm:$0xff] }
 0x460   : > { %v931_v18 = vadd.f32 %v902_v38, %v801_v58  ;;  %v932_v44 = vadd.f32 %v903_v11, %v802_v21  ;;  %v6914_v29 = vadd.f32 %v906_v28, %v807_v46  ;;  %v908_v27 = vsel %vm899_vm3, %v9791_v48, %v9790_v26  ;;  %v9795_v58 = vld [vmem:[#allocation34_spill] sm:$0xff]  ;;  %v9801_v11 = vld [vmem:[#allocation44_spill] sm:$0xff]  ;;  %v9802_v28 = vld [vmem:[#allocation37_spill] sm:$0xff] }
 0x461   : > { %v6874_v36 = vpop.permute.xlu0 %1399  ;;  %v934_v31 = vadd.f32 %v905_v43, %v804_v33  ;;  %v935_v54 = vadd.f32 %v9787_v6, %v805_v40  ;;  %v910_v0 = vsel %vm899_vm3, %v9789_v60, %v9792_v61  ;;  %v1040_v30 = vsel %vm1039_vm4, %v9794_v1, %v9793_v49  ;;  %v9803_v6 = vld [vmem:[#allocation62_spill] sm:$0xff]  ;;  %v9804_v26 = vld [vmem:[#allocation71_spill] sm:$0xff]  ;;  %v9805_v48 = vld [vmem:[#allocation64_spill] sm:$0xff] }
 0x462   : > { %v6879_v63 = vpop.permute.xlu1 %1401  ;;  %v6926_v7 = vadd.f32 %v909_v47, %v810_v55  ;;  %v6928_v21 = vadd.f32 %v907_v22, %v808_v5  ;;  %v1041_v16 = vsel %vm1039_vm4, %v9793_v49, %v9795_v58  ;;  %v6935_v40 = vadd.f32 %v908_v27, %v809_v39  ;;  %v6973_v43 = vpop.permute.xlu2 %1517  ;;  %v9806_v27 = vld [vmem:[#allocation91_spill] sm:$0xff] }
 0x463   : > { %v6940_v15 = vsel %vm899_vm3, %v9792_v61, %v9788_v14  ;;  %v1070_v46 = vadd.f32 %v9794_v1, %v928_v17  ;;  %v1042_v5 = vsel %vm1039_vm4, %v9795_v58, %v9796_v35  ;;  %v6948_v52 = vadd.f32 %v910_v0, %v811_v34  ;;  %v9800_v34 = vld [vmem:[#allocation60_spill] sm:$0xff]  ;;  %v9807_v0 = vld [vmem:[#allocation94_spill] sm:$0xff]  ;;  %v9809_v58 = vld [vmem:[#allocation95_spill] sm:$0xff] }
 0x464   : > { %v1071_v55 = vadd.f32 %v1040_v30, %v929_v8  ;;  %v1043_v39 = vsel %vm1039_vm4, %v9796_v35, %v9797_v53  ;;  %v1072_v4 = vadd.f32 %v1041_v16, %v930_v13  ;;  %v1044_v42 = vsel %vm1039_vm4, %v9797_v53, %v9798_v19  ;;  %v9810_v35 = vld [vmem:[#allocation45_spill] sm:$0xff] }
 0x465   : > { %v1194_v12 = vadd.f32 %v6583_v3, %v1070_v46  ;;  %v1164_v2 = vsel %vm1163_vm5, %v6583_v3, %v9799_v41  ;;  %v1073_v24 = vadd.f32 %v1042_v5, %v931_v18  ;;  %v1045_v38 = vsel %vm1039_vm4, %v9798_v19, %v9800_v34 }
 0x466   : > { %v1165_v10 = vsel %vm1163_vm5, %v9799_v41, %v9801_v11  ;;  %v1074_v13 = vadd.f32 %v1043_v39, %v932_v44  ;;  %v1046_v17 = vsel %vm1039_vm4, %v9800_v34, %v9802_v28  ;;  %v1288_v3 = vsel %vm1287_vm6, %v6635_v57, %v9803_v6  ;;  %v9811_v39 = vld [vmem:[#allocation61_spill] sm:$0xff]  ;;  %v9813_v41 = vld [vmem:[#allocation92_spill] sm:$0xff] }
 0x467   : > { %v1318_v8 = vadd.f32 %v6635_v57, %v1194_v12  ;;  %v1075_v14 = vadd.f32 %v1044_v42, %v933_v51  ;;  %v1195_v60 = vadd.f32 %v1164_v2, %v1071_v55  ;;  %v1166_v47 = vsel %vm1163_vm5, %v9801_v11, %v9804_v26  ;;  %v9808_v51 = vld [vmem:[#allocation81_spill] sm:$0xff] }
 0x468   : > { %v1289_v22 = vsel %vm1287_vm6, %v9803_v6, %v9805_v48  ;;  %v1076_v18 = vadd.f32 %v1045_v38, %v934_v31  ;;  %v1196_v44 = vadd.f32 %v1165_v10, %v1072_v4  ;;  %v1412_v57 = vsel %vm1411_vm7, %v9806_v27, %v9807_v0  ;;  %v9812_v4 = vld [vmem:[#allocation39_spill] sm:$0xff]  ;;  %v9816_v6 = vld [vmem:[#allocation65_spill] sm:$0xff] }
 0x469   : > { %v6933_v33 = vpop.permute.xlu0 %1405  ;;  %v1442_v61 = vadd.f32 %v9806_v27, %v1318_v8  ;;  %v1077_v49 = vadd.f32 %v1046_v17, %v935_v54  ;;  %v1319_v1 = vadd.f32 %v1288_v3, %v1195_v60  ;;  %v1290_v30 = vsel %vm1287_vm6, %v9805_v48, %v9808_v51  ;;  %v9815_v17 = vld [vmem:[#allocation74_spill] sm:$0xff]  ;;  %v9817_v60 = vld [vmem:[#allocation67_spill] sm:$0xff] }
 0x46a   : > { %v6946_v32 = vpop.permute.xlu1 %1407  ;;  %v1413_v16 = vsel %vm1411_vm7, %v9807_v0, %v9809_v58  ;;  %v1197_v31 = vadd.f32 %v1166_v47, %v1073_v24  ;;  %v1167_v5 = vsel %vm1163_vm5, %v9804_v26, %v9810_v35  ;;  %v1320_v55 = vadd.f32 %v1289_v22, %v1196_v44  ;;  %v9814_v24 = vld [vmem:[#allocation46_spill] sm:$0xff] }
 0x46b   : > { %v1047_v19 = vsel %vm1039_vm4, %v9812_v4, %v9811_v39  ;;  %v1078_v42 = vadd.f32 %v9812_v4, %v6885_v9  ;;  %v1443_v12 = vadd.f32 %v1412_v57, %v1319_v1  ;;  %v1414_v2 = vsel %vm1411_vm7, %v9809_v58, %v9813_v41  ;;  %v9818_v27 = vld [vmem:[#allocation86_spill] sm:$0xff]  ;;  %v1524_v58 = vpop.permute.xlu2 %1523 }
 0x46c   : > { %v1168_v34 = vsel %vm1163_vm5, %v9810_v35, %v9814_v24  ;;  %v1321_v38 = vadd.f32 %v1290_v30, %v1197_v31  ;;  %v1444_v11 = vadd.f32 %v1413_v16, %v1320_v55  ;;  %v1198_v28 = vadd.f32 %v1167_v5, %v1074_v13  ;;  %v9819_v57 = vld [vmem:[#allocation38_spill] sm:$0xff] }
 0x46d   : > { %v1169_v8 = vsel %vm1163_vm5, %v9814_v24, %v9815_v17  ;;  %v1291_v9 = vsel %vm1287_vm6, %v9808_v51, %v9816_v6  ;;  %v1292_v26 = vsel %vm1287_vm6, %v9816_v6, %v9817_v60  ;;  %v1079_v13 = vadd.f32 %v1047_v19, %v6914_v29  ;;  %v9824_v6 = vld [vmem:[#allocation49_spill] sm:$0xff] }
 0x46e   : > { %v1445_v47 = vadd.f32 %v1414_v2, %v1321_v38  ;;  %v1199_v44 = vadd.f32 %v1168_v34, %v1075_v14  ;;  %v1415_v0 = vsel %vm1411_vm7, %v9813_v41, %v6774_v59  ;;  %v1048_v1 = vsel %vm1039_vm4, %v9811_v39, %v9819_v57  ;;  %v9820_v14 = vld [vmem:[#allocation47_spill] sm:$0xff]  ;;  %v9822_v34 = vld [vmem:[#allocation68_spill] sm:$0xff] }
 0x46f   : > { %v1200_v51 = vadd.f32 %v1169_v8, %v1076_v18  ;;  %v1322_v30 = vadd.f32 %v1291_v9, %v1198_v28  ;;  %v1170_v16 = vsel %vm1163_vm5, %v9815_v17, %v9820_v14  ;;  %v1416_v35 = vsel %vm1411_vm7, %v6774_v59, %v6784_v56  ;;  %v9823_v8 = vld [vmem:[#allocation76_spill] sm:$0xff] }
 0x470   : > { %v1323_v31 = vadd.f32 %v1292_v26, %v1199_v44  ;;  %v1294_v38 = vsel %vm1287_vm6, %v9818_v27, %v9822_v34  ;;  %v1201_v17 = vadd.f32 %v1170_v16, %v1077_v49  ;;  %v1202_v9 = vadd.f32 %v9824_v6, %v1078_v42  ;;  %v9828_v14 = vld [vmem:[#allocation48_spill] sm:$0xff] }
 0x471   : > { %v6991_v46 = vpop.permute.xlu0 %1462  ;;  %v1446_v18 = vadd.f32 %v1415_v0, %v1322_v30  ;;  %v1080_v42 = vadd.f32 %v1048_v1, %v6928_v21  ;;  %v9829_v21 = vld [vmem:[#allocation88_spill] sm:$0xff]  ;;  %vm4987_vm1 = vcmask 39936  }
 0x472   : > { %v6996_v53 = vpop.permute.xlu1 %1467  ;;  %v1470_v54 = vadd.f32 %v6991_v46, %v1442_v61  ;;  %v1471_v3 = vadd.f32 %v6991_v46, %v1443_v12  ;;  %v1472_v22 = vadd.f32 %v6991_v46, %v1444_v11  ;;  %v1293_v61 = vsel %vm1287_vm6, %v9817_v60, %v9818_v27  ;;  %v9821_v12 = vld [vmem:[#allocation93_spill] sm:$0xff] }
 0x473   : > { %v1473_v29 = vadd.f32 %v6991_v46, %v1445_v47  ;;  %v1417_v41 = vsel %vm1411_vm7, %v6784_v56, %v9821_v12  ;;  %v1447_v11 = vadd.f32 %v1416_v35, %v1323_v31  ;;  %v1171_v56 = vsel %vm1163_vm5, %v9824_v6, %v9823_v8  ;;  %v7092_v35 = vpop.permute.xlu2 %1529  ;;  %v9833_v6 = vld [vmem:[#allocation69_spill] sm:$0xff] }
 0x474   : > { %v1486_v10 = vmax.f32 %v1470_v54, 0.0  ;;  %v1487_v5 = vmax.f32 %v1471_v3, 0.0  ;;  %v1324_v54 = vadd.f32 %v1293_v61, %v1200_v51  ;;  %v1488_v4 = vmax.f32 %v1472_v22, 0.0  ;;  %v9825_v22 = vld [vmem:[#allocation41_spill] sm:$0xff]  ;;  %v9826_v61 = vld [vmem:[#allocation63_spill] sm:$0xff]  ;;  %v9827_v51 = vld [vmem:[#allocation70_spill] sm:$0xff] }
 0x475   : > { %v1474_v3 = vadd.f32 %v6991_v46, %v1446_v18  ;;  %v1418_v26 = vsel %vm1411_vm7, %v9821_v12, %v6827_v62  ;;  %v1475_v49 = vadd.f32 %v6991_v46, %v1447_v11  ;;  %v1049_v44 = vsel %vm1039_vm4, %v9819_v57, %v9825_v22 }
 0x476   : > { %v1545_v48 = vmul.f32 %v6973_v43, %v1486_v10  ;;  %v1489_v10 = vmax.f32 %v1473_v29, 0.0  ;;  %v1448_v60 = vadd.f32 %v1417_v41, %v1324_v54  ;;  %v1325_v27 = vadd.f32 %v1294_v38, %v1201_v17  ;;  %v9832_v17 = vld [vmem:[#allocation42_spill] sm:$0xff] }
 0x477   : > { %v1050_v62 = vsel %vm1039_vm4, %v9825_v22, %v9826_v61  ;;  %v1203_v0 = vadd.f32 %v1171_v56, %v1079_v13  ;;  %v1326_v30 = vadd.f32 %v9827_v51, %v1202_v9  ;;  %v1490_v1 = vmax.f32 %v1474_v3, 0.0  ;;  %v9834_v3 = vld [vmem:[#allocation77_spill] sm:$0xff] }
 0x478   : > { %1577 = vrot.lane.b32.xlu0 %v1545_v48, %s5949_s30  ;;  %v942_v48 = vadd.f32 %v6940_v15, %v6881_v37  ;;  %v1476_v29 = vadd.f32 %v6991_v46, %v1448_v60  ;;  %v1172_v37 = vsel %vm1163_vm5, %v9823_v8, %v9828_v14  ;;  %v1295_v15 = vsel %vm1287_vm6, %v9827_v51, %v9829_v21 }
 0x479   : > { %v1520_v55 = vpop.permute.xlu0 %1519  ;;  %v1449_v57 = vadd.f32 %v1418_v26, %v1325_v27  ;;  %v1419_v13 = vsel %vm1411_vm7, %v6832_v45, %v6782_v50  ;;  %v1450_v31 = vadd.f32 %v6832_v45, %v1326_v30  ;;  %v1327_v41 = vadd.f32 %v1295_v15, %v1203_v0  ;;  %v9835_v26 = vld [vmem:[#allocation73_spill] sm:$0xff]  ;;  %v9838_v15 = vld [vmem:[#allocation50_spill] sm:$0xff] }
 0x47a   : > { %v1522_v39 = vpop.permute.xlu1 %1521  ;;  %v7042_v19 = vsel %vm899_vm3, %v6973_v43, %v1520_v55  ;;  %v1492_v45 = vmax.f32 %v1476_v29, 0.0  ;;  %v1082_v38 = vadd.f32 %v1050_v62, %v6926_v7  ;;  %v1204_v9 = vadd.f32 %v1172_v37, %v1080_v42  ;;  %v9836_v0 = vld [vmem:[#allocation89_spill] sm:$0xff]  ;;  %v9837_v29 = vld [vmem:[#allocation66_spill] sm:$0xff] }
 0x47b   : > { %v7048_v2 = vsel %vm899_vm3, %v1522_v39, %v1524_v58  ;;  %v7051_v24 = vsel %vm899_vm3, %v1520_v55, %v1522_v39  ;;  %v1546_v59 = vmul.f32 %v7042_v19, %v1487_v5  ;;  %v1491_v55 = vmax.f32 %v1475_v49, 0.0 }
 0x47c   : > { %v1547_v28 = vmul.f32 %v7051_v24, %v1488_v4  ;;  %v1548_v47 = vmul.f32 %v7048_v2, %v1489_v10  ;;  %v1477_v18 = vadd.f32 %v6991_v46, %v1449_v57  ;;  %v1478_v34 = vadd.f32 %v6996_v53, %v1450_v31  ;;  %v9830_v46 = vld [vmem:[#allocation40_spill] sm:$0xff]  ;;  %v9831_v10 = vld [vmem:[#allocation51_spill] sm:$0xff] }
 0x47d   : > { %1579 = vrot.lane.b32.xlu1 %v1546_v59, %s5949_s30  ;;  %v1051_v11 = vsel %vm1039_vm4, %v9826_v61, %v9830_v46  ;;  %v1052_v8 = vsel %vm1039_vm4, %v9830_v46, %v9832_v17  ;;  %v1451_v56 = vadd.f32 %v1419_v13, %v1327_v41  ;;  %v1174_v60 = vsel %vm1163_vm5, %v9831_v10, %v9834_v3 }
 0x47e   : > { %1581 = vrot.lane.b32.xlu2 %v1547_v28, %s5949_s30  ;;  %v1173_v28 = vsel %vm1163_vm5, %v9828_v14, %v9831_v10  ;;  %v1493_v49 = vmax.f32 %v1477_v18, 0.0  ;;  %v1494_v61 = vmax.f32 %v1478_v34, 0.0  ;;  %v1083_v42 = vadd.f32 %v1051_v11, %v6948_v52  ;;  %v9843_v11 = vld [vmem:[#allocation90_spill] sm:$0xff] }
 0x47f   : > { %v1479_v27 = vadd.f32 %v6996_v53, %v1451_v56  ;;  %v1298_v51 = vsel %vm1287_vm6, %v9835_v26, %v9836_v0  ;;  %v1421_v30 = vsel %vm1411_vm7, %v6874_v36, %v6879_v63  ;;  %v1084_v14 = vadd.f32 %v1052_v8, %v942_v48 }
 0x480   : > { %1583 = vrot.lane.b32.xlu0 %v1548_v47, %s5949_s30  ;;  %v1297_v47 = vsel %vm1287_vm6, %v9833_v6, %v9835_v26  ;;  %v1206_v37 = vadd.f32 %v1174_v60, %v1082_v38  ;;  %v1175_v52 = vsel %vm1163_vm5, %v9834_v3, %v9838_v15  ;;  %v9842_v38 = vld [vmem:[#allocation75_spill] sm:$0xff]  ;;  %v1423_v8 = vsel %vm1411_vm7, %v6839_v23, %v6933_v33 }
 0x481   : > { %v1526_v16 = vpop.permute.xlu0 %1525  ;;  %v1495_v31 = vmax.f32 %v1479_v27, 0.0  ;;  %v1301_v10 = vsel %vm1287_vm6, %v9842_v38, %v9843_v11  ;;  %v1425_v56 = vsel %vm1411_vm7, %v6946_v32, %v6912_v25 }
 0x482   : > { %v1528_v5 = vpop.permute.xlu1 %1527  ;;  %v7095_v54 = vsel %vm899_vm3, %v1524_v58, %v1526_v16  ;;  %v1081_v58 = vadd.f32 %v1049_v44, %v6935_v40  ;;  %v1296_v40 = vsel %vm1287_vm6, %v9829_v21, %v9833_v6  ;;  %v1420_v44 = vsel %vm1411_vm7, %v6782_v50, %v6874_v36 }
 0x483   : > { %v7100_v39 = vsel %vm899_vm3, %v1528_v5, %v7092_v35  ;;  %v7103_v4 = vsel %vm899_vm3, %v1526_v16, %v1528_v5  ;;  %v1549_v12 = vmul.f32 %v7095_v54, %v1490_v1  ;;  %v1328_v62 = vadd.f32 %v1296_v40, %v1204_v9 }
 0x484   : > { %v1550_v59 = vmul.f32 %v7103_v4, %v1491_v55  ;;  %v1551_v7 = vmul.f32 %v7100_v39, %v1492_v45  ;;  %v1205_v22 = vadd.f32 %v1173_v28, %v1081_v58  ;;  %v1053_v50 = vsel %vm1039_vm4, %v9832_v17, %v9837_v29  ;;  %v9839_v55 = vld [vmem:[#allocation52_spill] sm:$0xff] }
 0x485   : > { %1585 = vrot.lane.b32.xlu1 %v1549_v12, %s5949_s30  ;;  %v1452_v57 = vadd.f32 %v1420_v44, %v1328_v62  ;;  %v1422_v1 = vsel %vm1411_vm7, %v6879_v63, %v6839_v23  ;;  %v1552_v16 = vmul.f32 %v7092_v35, %v1493_v49  ;;  %v1330_v13 = vadd.f32 %v1298_v51, %v1206_v37  ;;  %v9840_v12 = vld [vmem:[#allocation78_spill] sm:$0xff]  ;;  %v9841_v63 = vld [vmem:[#allocation72_spill] sm:$0xff] }
 0x486   : > { %1587 = vrot.lane.b32.xlu2 %v1550_v59, %s5949_s30  ;;  %v1329_v21 = vadd.f32 %v1297_v47, %v1205_v22  ;;  %v1553_v5 = vmul.f32 %v6973_v43, %v1494_v61  ;;  %v1085_v48 = vadd.f32 %v1053_v50, %v6904_v20  ;;  %v1176_v18 = vsel %vm1163_vm5, %v9838_v15, %v9839_v55 }
 0x487   : > { %v1177_v41 = vsel %vm1163_vm5, %v9839_v55, %v9840_v12  ;;  %v1480_v45 = vadd.f32 %v6996_v53, %v1452_v57  ;;  %v1299_v59 = vsel %vm1287_vm6, %v9836_v0, %v9841_v63  ;;  %v1454_v34 = vadd.f32 %v1422_v1, %v1330_v13 }
 0x488   : > { %1589 = vrot.lane.b32.xlu0 %v1551_v7, %s5949_s30  ;;  %v1453_v36 = vadd.f32 %v1421_v30, %v1329_v21  ;;  %v1554_v20 = vmul.f32 %v7042_v19, %v1495_v31  ;;  %v1207_v58 = vadd.f32 %v1175_v52, %v1083_v42  ;;  %v1300_v46 = vsel %vm1287_vm6, %v9841_v63, %v9842_v38 }
 0x489   : > { %v1208_v28 = vadd.f32 %v1176_v18, %v1084_v14  ;;  %v1209_v17 = vadd.f32 %v1177_v41, %v1085_v48  ;;  %v1482_v6 = vadd.f32 %v6996_v53, %v1454_v34  ;;  %v1424_v40 = vsel %vm1411_vm7, %v6933_v33, %v6946_v32 }
 0x48a   : > { %v1481_v43 = vadd.f32 %v6996_v53, %v1453_v36  ;;  %v1331_v19 = vadd.f32 %v1299_v59, %v1207_v58  ;;  %v1496_v7 = vmax.f32 %v1480_v45, 0.0  ;;  %v9498_v29 = vmov 0.0  }
 0x48b   : > { %v1332_v9 = vadd.f32 %v1300_v46, %v1208_v28  ;;  %v1333_v3 = vadd.f32 %v1301_v10, %v1209_v17  ;;  %v1498_v44 = vmax.f32 %v1482_v6, 0.0  ;;  %vm4993_vm4 = vcmask 64512  }
 0x48c   : > { %v1497_v60 = vmax.f32 %v1481_v43, 0.0  ;;  %v1455_v26 = vadd.f32 %v1423_v8, %v1331_v19  ;;  %v1555_v23 = vmul.f32 %v7051_v24, %v1496_v7  ;;  %vm4995_vm5 = vcmask 72704  }
 0x48d   : > { %1591 = vrot.lane.b32.xlu1 %v1552_v16, %s5949_s30  ;;  %v1456_v47 = vadd.f32 %v1424_v40, %v1332_v9  ;;  %v1457_v49 = vadd.f32 %v1425_v56, %v1333_v3  ;;  %v1557_v32 = vmul.f32 %v7095_v54, %v1498_v44  ;;  %vm4999_vm6 = vcmask 73728  }
 0x48e   : > { %1593 = vrot.lane.b32.xlu2 %v1553_v5, %s5949_s30  ;;  %v1556_v22 = vmul.f32 %v7048_v2, %v1497_v60  ;;  %v1483_v27 = vadd.f32 %v6996_v53, %v1455_v26 }
 0x48f   : > { %v1485_v33 = vadd.f32 %v6996_v53, %v1457_v49  ;;  %v1484_v25 = vadd.f32 %v6996_v53, %v1456_v47 }
 0x490   : > { %1595 = vrot.lane.b32.xlu0 %v1554_v20, %s5949_s30  ;;  %v1499_v24 = vmax.f32 %v1483_v27, 0.0 }
 0x491   : > { %v1501_v61 = vmax.f32 %v1485_v33, 0.0  ;;  %v1500_v42 = vmax.f32 %v1484_v25, 0.0 }
 0x492   : > { %v1558_v2 = vmul.f32 %v7103_v4, %v1499_v24 }
 0x493   : > { %v1559_v62 = vmul.f32 %v7100_v39, %v1500_v42  ;;  %v1560_v0 = vmul.f32 %v7092_v35, %v1501_v61 }
 0x495   : > { %1597 = vrot.lane.b32.xlu1 %v1555_v23, %s5949_s30 }
 0x496   : > { %1599 = vrot.lane.b32.xlu2 %v1556_v22, %s5949_s30 }
 0x498   : > { %1601 = vrot.lane.b32.xlu0 %v1557_v32, %s5949_s30 }
 0x49d   : > { %1603 = vrot.lane.b32.xlu1 %v1558_v2, %s5949_s30 }
 0x49e   : > { %1605 = vrot.lane.b32.xlu2 %v1559_v62, %s5949_s30 }
 0x4a0   : > { %1607 = vrot.lane.b32.xlu0 %v1560_v0, %s5949_s30 }
 0x4d8   : > { %v1582_v53 = vpop.permute.xlu2 %1581 }
 0x4e0   : > { %v1588_v50 = vpop.permute.xlu2 %1587 }
 0x4e8   : > { %v1594_v16 = vpop.permute.xlu2 %1593 }
 0x4ea   : > { %v1578_v54 = vpop.permute.xlu0 %1577 }
 0x4ef   : > { %v1580_v51 = vpop.permute.xlu1 %1579 }
 0x4f0   : > { %v7202_v30 = vsel %vm1609_vm8, %v1578_v54, %v1580_v51  ;;  %v7207_v14 = vsel %vm1609_vm8, %v1580_v51, %v1582_v53  ;;  %v1600_v12 = vpop.permute.xlu2 %1599 }
 0x4f1   : > { %v5204_v4 = vpack.i.bf16 %v7202_v30, %v9498_v29  ;;  %v5364_v8 = vpack.i.bf16 %v7207_v14, %v7202_v30 }
 0x4f2   : > { %v1584_v39 = vpop.permute.xlu0 %1583 }
 0x4f3   : > { %v7210_v35 = vsel %vm1609_vm8, %v1582_v53, %v1584_v39  ;;  %5205 = vrot.lane.b32.xlu1 %v5204_v4, %s5949_s30 }
 0x4f4   : > { %9844 = vst [vmem:[#allocation13_spill] sm:$0xff] %v7210_v35  ;;  %v7215_v37 = vpack.i.bf16 %v7210_v35, %v7207_v14 }
 0x4f6   : > { %5210 = vrot.lane.b32.xlu2 %v7215_v37, %s5949_s30 }
 0x4f7   : > { %v1586_v21 = vpop.permute.xlu1 %1585 }
 0x4f8   : > { %v7220_v15 = vsel %vm1609_vm8, %v1584_v39, %v1586_v21  ;;  %v7223_v52 = vsel %vm1609_vm8, %v1586_v21, %v1588_v50  ;;  %v1606_v46 = vpop.permute.xlu2 %1605 }
 0x4f9   : > { %9845 = vst [vmem:[#allocation11_spill] sm:$0xff] %v7223_v52  ;;  %v5214_v57 = vpack.i.bf16 %v7223_v52, %v7220_v15  ;;  %v5369_v19 = vpack.i.bf16 %v7220_v15, %v7210_v35 }
 0x4fa   : > { %v1590_v1 = vpop.permute.xlu0 %1589 }
 0x4fb   : > { %5215 = vrot.lane.b32.xlu0 %v5214_v57, %s5949_s30  ;;  %v7229_v36 = vsel %vm1609_vm8, %v1588_v50, %v1590_v1 }
 0x4fc   : > { %9846 = vst [vmem:[#allocation12_spill] sm:$0xff] %v7229_v36  ;;  %v5374_v40 = vpack.i.bf16 %v7229_v36, %v7223_v52 }
 0x4ff   : > { %v1592_v13 = vpop.permute.xlu1 %1591 }
 0x500   : > { %v7232_v31 = vsel %vm1609_vm8, %v1590_v1, %v1592_v13 }
 0x501   : > { %9847 = vst [vmem:[#allocation19_spill] sm:$0xff] %v7232_v31  ;;  %v5219_v5 = vpack.i.bf16 %v7232_v31, %v7229_v36  ;;  %v7313_v6 = vpack.i.bf16 0.0, %v7232_v31 }
 0x502   : > { %v1596_v48 = vpop.permute.xlu0 %1595 }
 0x503   : > { %v7237_v55 = vsel %vm1609_vm8, %v1594_v16, %v1596_v48  ;;  %5220 = vrot.lane.b32.xlu1 %v5219_v5, %s5949_s30 }
 0x504   : > { %9848 = vst [vmem:[#allocation20_spill] sm:$0xff] %v7237_v55  ;;  %v5224_v18 = vpack.i.bf16 %v7237_v55, %v9498_v29 }
 0x506   : > { %5225 = vrot.lane.b32.xlu2 %v5224_v18, %s5949_s30 }
 0x507   : > { %v1598_v41 = vpop.permute.xlu1 %1597 }
 0x508   : > { %v7244_v45 = vsel %vm1609_vm8, %v1596_v48, %v1598_v41  ;;  %v7247_v63 = vsel %vm1609_vm8, %v1598_v41, %v1600_v12 }
 0x509   : > { %v7251_v59 = vpack.i.bf16 %v7247_v63, %v7244_v45  ;;  %v5384_v9 = vpack.i.bf16 %v7244_v45, %v7237_v55  ;;  %v5459_v62 = vpack.i.bf16 %v7244_v45, %v7232_v31 }
 0x50a   : > { %v1602_v34 = vpop.permute.xlu0 %1601 }
 0x50b   : > { %5230 = vrot.lane.b32.xlu0 %v7251_v59, %s5949_s30  ;;  %v7256_v20 = vsel %vm1609_vm8, %v1600_v12, %v1602_v34 }
 0x50c   : > { %v5389_v3 = vpack.i.bf16 %v7256_v20, %v7247_v63  ;;  %v5484_v13 = vpack.i.bf16 %v7220_v15, %v7256_v20 }
 0x50f   : > { %v1604_v43 = vpop.permute.xlu1 %1603 }
 0x510   : > { %v7259_v58 = vsel %vm1609_vm8, %v1602_v34, %v1604_v43  ;;  %v7264_v10 = vsel %vm1609_vm8, %v1604_v43, %v1606_v46 }
 0x511   : > { %9849 = vst [vmem:[#allocation17_spill] sm:$0xff] %v7259_v58  ;;  %v5234_v38 = vpack.i.bf16 %v7259_v58, %v7256_v20  ;;  %v5394_v7 = vpack.i.bf16 %v7264_v10, %v7259_v58 }
 0x512   : > { %v1608_v11 = vpop.permute.xlu0 %1607  ;;  %9850 = vst [vmem:[#allocation14_spill] sm:$0xff] %v7264_v10 }
 0x513   : > { %v7267_v28 = vsel %vm1609_vm8, %v1606_v46, %v1608_v11  ;;  %5235 = vrot.lane.b32.xlu1 %v5234_v38, %s5949_s30  ;;  %5245 = vrot.lane.b32.xlu0 %v5204_v4, %s5951_s12  ;;  %v5489_v11 = vpack.i.bf16 %v7202_v30, %v7237_v55 }
 0x514   : > { %9851 = vst [vmem:[#allocation21_spill] sm:$0xff] %v7267_v28  ;;  %v7273_v17 = vpack.i.bf16 %v7267_v28, %v7264_v10  ;;  %v7337_v26 = vpack.i.bf16 0.0, %v7267_v28 }
 0x516   : > { %5240 = vrot.lane.b32.xlu2 %v7273_v17, %s5949_s30 }
 0x51b   : > { %5250 = vrot.lane.b32.xlu1 %v7215_v37, %s5951_s12  ;;  %5260 = vrot.lane.b32.xlu0 %v5219_v5, %s5951_s12 }
 0x51e   : > { %5255 = vrot.lane.b32.xlu2 %v5214_v57, %s5951_s12 }
 0x523   : > { %5265 = vrot.lane.b32.xlu1 %v5224_v18, %s5951_s12  ;;  %5275 = vrot.lane.b32.xlu0 %v5234_v38, %s5951_s12 }
 0x526   : > { %5270 = vrot.lane.b32.xlu2 %v7251_v59, %s5951_s12 }
 0x52b   : > { %5290 = vrot.lane.b32.xlu0 %v7215_v37, %s5952_s20  ;;  %5280 = vrot.lane.b32.xlu1 %v7273_v17, %s5951_s12 }
 0x52e   : > { %5285 = vrot.lane.b32.xlu2 %v5204_v4, %s5952_s20 }
 0x533   : > { %5305 = vrot.lane.b32.xlu0 %v5224_v18, %s5952_s20  ;;  %5295 = vrot.lane.b32.xlu1 %v5214_v57, %s5952_s20 }
 0x536   : > { %5300 = vrot.lane.b32.xlu2 %v5219_v5, %s5952_s20 }
 0x53b   : > { %5320 = vrot.lane.b32.xlu0 %v7273_v17, %s5952_s20  ;;  %5310 = vrot.lane.b32.xlu1 %v7251_v59, %s5952_s20 }
 0x53e   : > { %5315 = vrot.lane.b32.xlu2 %v5234_v38, %s5952_s20 }
 0x543   : > { %5335 = vrot.lane.b32.xlu0 %v5214_v57, %s5953_s21  ;;  %5325 = vrot.lane.b32.xlu1 %v5204_v4, %s5953_s21 }
 0x546   : > { %5330 = vrot.lane.b32.xlu2 %v7215_v37, %s5953_s21 }
 0x54b   : > { %5350 = vrot.lane.b32.xlu0 %v7251_v59, %s5953_s21  ;;  %5340 = vrot.lane.b32.xlu1 %v5219_v5, %s5953_s21  ;;  %v5479_v5 = vpack.i.bf16 %v7237_v55, %v7259_v58 }
 0x54e   : > { %5345 = vrot.lane.b32.xlu2 %v5224_v18, %s5953_s21 }
 0x550   : > { %v7323_v56 = vpop.permute.xlu2 %5210 }
 0x551   : > { %9852 = vst [vmem:[#allocation15_spill] sm:$0xff] %v7323_v56 }
 0x553   : > { %5365 = vrot.lane.b32.xlu0 %v5364_v8, %s5941_s11  ;;  %5355 = vrot.lane.b32.xlu1 %v5234_v38, %s5953_s21 }
 0x556   : > { %5360 = vrot.lane.b32.xlu2 %v7273_v17, %s5953_s21 }
 0x55b   : > { %5380 = vrot.lane.b32.xlu0 %v7313_v6, %s5941_s11  ;;  %5370 = vrot.lane.b32.xlu1 %v5369_v19, %s5941_s11 }
 0x55e   : > { %5375 = vrot.lane.b32.xlu2 %v5374_v40, %s5941_s11 }
 0x560   : > { %v7334_v60 = vpop.permute.xlu2 %5225 }
 0x563   : > { %5395 = vrot.lane.b32.xlu0 %v5394_v7, %s5941_s11  ;;  %5385 = vrot.lane.b32.xlu1 %v5384_v9, %s5941_s11 }
 0x565   : > { %v7347_v47 = vpop.permute.xlu1 %5205 }
 0x566   : > { %5390 = vrot.lane.b32.xlu2 %v5389_v3, %s5941_s11 }
 0x56b   : > { %5410 = vrot.lane.b32.xlu0 %v5369_v19, %s5954_s25  ;;  %5400 = vrot.lane.b32.xlu1 %v7337_v26, %s5941_s11 }
 0x56d   : > { %v7349_v49 = vpop.permute.xlu0 %5215 }
 0x56e   : > { %5405 = vrot.lane.b32.xlu2 %v5364_v8, %s5954_s25  ;;  %9854 = vst [vmem:[#allocation16_spill] sm:$0xff] %v7349_v49 }
 0x570   : > { %v7343_v23 = vpop.permute.xlu2 %5240 }
 0x571   : > { %9853 = vst [vmem:[#allocation18_spill] sm:$0xff] %v7343_v23 }
 0x573   : > { %5425 = vrot.lane.b32.xlu0 %v5384_v9, %s5954_s25  ;;  %5415 = vrot.lane.b32.xlu1 %v5374_v40, %s5954_s25 }
 0x575   : > { %v7358_v44 = vpop.permute.xlu1 %5220 }
 0x576   : > { %5420 = vrot.lane.b32.xlu2 %v7313_v6, %s5954_s25  ;;  %9856 = vst [vmem:[#allocation23_spill] sm:$0xff] %v7358_v44 }
 0x578   : > { %v7353_v22 = vpop.permute.xlu2 %5255 }
 0x579   : > { %9855 = vst [vmem:[#allocation22_spill] sm:$0xff] %v7353_v22  ;;  %v9504_v0 = vunpack.i.h.bf16 %v7353_v22  ;;  %v9503_v53 = vunpack.i.l.bf16 %v7353_v22 }
 0x57b   : > { %5440 = vrot.lane.b32.xlu0 %v7337_v26, %s5954_s25  ;;  %5430 = vrot.lane.b32.xlu1 %v5389_v3, %s5954_s25 }
 0x57d   : > { %v7360_v27 = vpop.permute.xlu0 %5230 }
 0x57e   : > { %5435 = vrot.lane.b32.xlu2 %v5394_v7, %s5954_s25  ;;  %v9507_v24 = vunpack.i.h.bf16 %v7360_v27 }
 0x580   : > { %v7363_v33 = vpop.permute.xlu2 %5270 }
 0x581   : > { %9857 = vst [vmem:[#allocation24_spill] sm:$0xff] %v7363_v33  ;;  %v9514_v12 = vunpack.i.h.bf16 %v7363_v33  ;;  %v9511_v41 = vunpack.i.l.bf16 %v7363_v33 }
 0x583   : > { %5455 = vrot.lane.b32.xlu0 %v5374_v40, %s5943_s18  ;;  %5445 = vrot.lane.b32.xlu1 %v5364_v8, %s5943_s18 }
 0x585   : > { %v7367_v25 = vpop.permute.xlu1 %5235  ;;  %v7369_v32 = vpop.permute.xlu0 %5245 }
 0x586   : > { %9858 = vst [vmem:[#allocation53_spill] sm:$0xff] %v7367_v25  ;;  %v9501_v61 = vunpack.i.l.bf16 %v7367_v25  ;;  %5450 = vrot.lane.b32.xlu2 %v5369_v19, %s5943_s18  ;;  %v9517_v4 = vunpack.i.h.bf16 %v7369_v32 }
 0x588   : > { %v7374_v42 = vpop.permute.xlu2 %5285  ;;  %v7381_v2 = vsel %vm1609_vm8, %v9507_v24, %v9501_v61 }
 0x589   : > { %9859 = vst [vmem:[#allocation25_spill] sm:$0xff] %v7381_v2  ;;  %v9520_v40 = vunpack.i.h.bf16 %v7374_v42  ;;  %v7723_v2 = vld [vmem:[%s9406_s4 + $0x8] sm:$0xff] }
 0x58b   : > { %5470 = vrot.lane.b32.xlu0 %v7215_v37, %s5944_s27  ;;  %5460 = vrot.lane.b32.xlu1 %v5459_v62, %s5943_s18 }
 0x58d   : > { %v7390_v54 = vpop.permute.xlu1 %5250  ;;  %v7392_v51 = vpop.permute.xlu0 %5260 }
 0x58e   : > { %9860 = vst [vmem:[#allocation55_spill] sm:$0xff] %v7390_v54  ;;  %v9510_v39 = vunpack.i.h.bf16 %v7390_v54  ;;  %v9509_v50 = vunpack.i.l.bf16 %v7390_v54  ;;  %v9500_v21 = vunpack.i.l.bf16 %v7392_v51  ;;  %5465 = vrot.lane.b32.xlu2 %v7251_v59, %s5944_s27 }
 0x58f   : > { %9861 = vst [vmem:[#allocation26_spill] sm:$0xff] %v7392_v51 }
 0x590   : > { %v7400_v37 = vpop.permute.xlu2 %5300  ;;  %v7407_v57 = vsel %vm1822_vm9, %v9517_v4, %v9509_v50  ;;  %v7414_v1 = vsel %vm1822_vm9, %v9510_v39, %v9503_v53  ;;  %v7421_v16 = vsel %vm1822_vm9, %v9504_v0, %v9500_v21 }
 0x591   : > { %9862 = vst [vmem:[#allocation54_spill] sm:$0xff] %v7400_v37  ;;  %v9512_v61 = vunpack.i.l.bf16 %v7400_v37 }
 0x592   : > { %9863 = vst [vmem:[#allocation27_spill] sm:$0xff] %v7407_v57 }
 0x593   : > { %9864 = vst [vmem:[#allocation28_spill] sm:$0xff] %v7414_v1  ;;  %5485 = vrot.lane.b32.xlu0 %v5484_v13, %s5944_s27  ;;  %5475 = vrot.lane.b32.xlu1 %v5389_v3, %s5943_s18 }
 0x594   : > { %9865 = vst [vmem:[#allocation29_spill] sm:$0xff] %v7421_v16 }
 0x595   : > { %v7429_v48 = vpop.permute.xlu1 %5265  ;;  %v7431_v18 = vpop.permute.xlu0 %5275 }
 0x596   : > { %9866 = vst [vmem:[#allocation57_spill] sm:$0xff] %v7431_v18  ;;  %v9519_v59 = vunpack.i.h.bf16 %v7429_v48  ;;  %v9505_v34 = vunpack.i.l.bf16 %v7431_v18  ;;  %5480 = vrot.lane.b32.xlu2 %v5479_v5, %s5943_s18  ;;  %v9506_v7 = vunpack.i.h.bf16 %v7431_v18 }
 0x598   : > { %v7438_v43 = vpop.permute.xlu2 %5315  ;;  %v7445_v38 = vsel %vm1822_vm9, %v9519_v59, %v9511_v41  ;;  %v7452_v46 = vsel %vm1822_vm9, %v9514_v12, %v9505_v34 }
 0x599   : > { %9867 = vst [vmem:[#allocation30_spill] sm:$0xff] %v7438_v43  ;;  %v9524_v24 = vunpack.i.h.bf16 %v7438_v43 }
 0x59a   : > { %9868 = vst [vmem:[#allocation56_spill] sm:$0xff] %v7452_v46 }
 0x59b   : > { %5500 = vrot.lane.b32.xlu0 %v9498_v29, %s5943_s18  ;;  %5490 = vrot.lane.b32.xlu1 %v5489_v11, %s5944_s27  ;;  %v5509_v11 = vpack.i.bf16 %v7229_v36, %v7264_v10 }
 0x59d   : > { %v7459_v8 = vpop.permute.xlu0 %5290  ;;  %v7461_v19 = vpop.permute.xlu1 %5280 }
 0x59e   : > { %9869 = vst [vmem:[#allocation31_spill] sm:$0xff] %v7459_v8  ;;  %v9515_v9 = vunpack.i.l.bf16 %v7459_v8  ;;  %v9502_v3 = vunpack.i.l.bf16 %v7461_v19  ;;  %5495 = vrot.lane.b32.xlu2 %v7273_v17, %s5943_s18  ;;  %v5504_v17 = vpack.i.bf16 %v7223_v52, %v7259_v58 }
 0x59f   : > { %9870 = vst [vmem:[#allocation32_spill] sm:$0xff] %v7461_v19 }
 0x5a0   : > { %v7469_v62 = vpop.permute.xlu2 %5330  ;;  %v7476_v13 = vsel %vm1929_vm10, %v9520_v40, %v9515_v9  ;;  %v7483_v5 = vsel %vm1822_vm9, %v9506_v7, %v9502_v3  ;;  %v9516_v3 = vunpack.i.h.bf16 %v7459_v8 }
 0x5a1   : > { %9871 = vst [vmem:[#allocation33_spill] sm:$0xff] %v7469_v62  ;;  %v9534_v59 = vunpack.i.l.bf16 %v7469_v62 }
 0x5a2   : > { %9872 = vst [vmem:[#allocation58_spill] sm:$0xff] %v7483_v5 }
 0x5a3   : > { %5515 = vrot.lane.b32.xlu0 %v7313_v6, %s5944_s27  ;;  %5505 = vrot.lane.b32.xlu1 %v5504_v17, %s5944_s27  ;;  %v2677_v17 = vld [vmem:[%s9407_s5 + $0x8] sm:$0xff] }
 0x5a5   : > { %v7492_v29 = vpop.permute.xlu0 %5305  ;;  %v7494_v21 = vpop.permute.xlu1 %5295 }
 0x5a6   : > { %9873 = vst [vmem:[#allocation34_spill] sm:$0xff] %v7494_v21  ;;  %v9513_v53 = vunpack.i.h.bf16 %v7494_v21  ;;  %v9508_v0 = vunpack.i.l.bf16 %v7494_v21  ;;  %5510 = vrot.lane.b32.xlu2 %v5509_v11, %s5944_s27  ;;  %v2676_v11 = vld [vmem:[%s9407_s5] sm:$0xff]  ;;  %v9525_v41 = vunpack.i.h.bf16 %v7492_v29 }
 0x5a8   : > { %v7501_v6 = vpop.permute.xlu2 %5345  ;;  %v7511_v34 = vsel %vm1929_vm10, %v9516_v3, %v9508_v0  ;;  %v7518_v7 = vsel %vm1929_vm10, %v9513_v53, %v9512_v61  ;;  %v9521_v0 = vunpack.i.l.bf16 %v7438_v43 }
 0x5a9   : > { %9874 = vst [vmem:[#allocation59_spill] sm:$0xff] %v7511_v34  ;;  %v9549_v19 = vunpack.i.h.bf16 %v7501_v6 }
 0x5aa   : > { %9875 = vst [vmem:[#allocation35_spill] sm:$0xff] %v7518_v7 }
 0x5ab   : > { %2685 = vperm.xlu0 %5201, %v2677_v17   ;;  %5520 = vrot.lane.b32.xlu1 %v7337_v26, %s5944_s27 }
 0x5ad   : > { %v7527_v50 = vpop.permute.xlu0 %5320  ;;  %v7529_v39 = vpop.permute.xlu1 %5310 }
 0x5ae   : > { %9876 = vst [vmem:[#allocation36_spill] sm:$0xff] %v7527_v50  ;;  %v9523_v61 = vunpack.i.l.bf16 %v7527_v50  ;;  %v9522_v17 = vunpack.i.h.bf16 %v7529_v39  ;;  %v9518_v26 = vunpack.i.l.bf16 %v7529_v39  ;;  %2680 = vperm.xlu2 %5203, %v2676_v11  }
 0x5af   : > { %9877 = vst [vmem:[#allocation43_spill] sm:$0xff] %v7529_v39 }
 0x5b0   : > { %v7535_v53 = vpop.permute.xlu2 %5360  ;;  %v7542_v12 = vsel %vm1929_vm10, %v9525_v41, %v9518_v26  ;;  %v7549_v9 = vsel %vm1929_vm10, %v9522_v17, %v9521_v0  ;;  %v7556_v11 = vsel %vm1929_vm10, %v9524_v24, %v9523_v61  ;;  %v9537_v26 = vunpack.i.h.bf16 %v7469_v62 }
 0x5b1   : > { %9878 = vst [vmem:[#allocation60_spill] sm:$0xff] %v7535_v53  ;;  %v9564_v31 = vunpack.i.l.bf16 %v7535_v53 }
 0x5b2   : > { %9879 = vst [vmem:[#allocation44_spill] sm:$0xff] %v7556_v11 }
 0x5b5   : > { %v7558_v3 = vpop.permute.xlu0 %5335  ;;  %v7560_v4 = vpop.permute.xlu1 %5325 }
 0x5b6   : > { %9880 = vst [vmem:[#allocation37_spill] sm:$0xff] %v7558_v3  ;;  %v9536_v40 = vunpack.i.l.bf16 %v7558_v3  ;;  %v9535_v0 = vunpack.i.h.bf16 %v7560_v4  ;;  %v9551_v22 = vunpack.i.h.bf16 %v7558_v3 }
 0x5b8   : > { %v7566_v17 = vpop.permute.xlu2 %5375  ;;  %v7573_v61 = vsel %vm2036_vm11, %v9535_v0, %v9534_v59  ;;  %v7580_v24 = vsel %vm2036_vm11, %v9537_v26, %v9536_v40 }
 0x5b9   : > { %9881 = vst [vmem:[#allocation62_spill] sm:$0xff] %v7566_v17  ;;  %v9572_v43 = vunpack.i.l.bf16 %v7566_v17 }
 0x5bd   : > { %v7582_v41 = vpop.permute.xlu0 %5350  ;;  %v7584_v51 = vpop.permute.xlu1 %5340 }
 0x5be   : > { %9882 = vst [vmem:[#allocation71_spill] sm:$0xff] %v7582_v41  ;;  %v9548_v37 = vunpack.i.l.bf16 %v7582_v41  ;;  %v9550_v59 = vunpack.i.l.bf16 %v7584_v51  ;;  %v9559_v21 = vunpack.i.h.bf16 %v7582_v41 }
 0x5bf   : > { %9883 = vst [vmem:[#allocation64_spill] sm:$0xff] %v7584_v51  ;;  %v9577_v51 = vunpack.i.h.bf16 %v7566_v17 }
 0x5c0   : > { %v7590_v0 = vpop.permute.xlu2 %5390  ;;  %v7597_v40 = vsel %vm2036_vm11, %v9549_v19, %v9548_v37  ;;  %v7604_v26 = vsel %vm2036_vm11, %v9551_v22, %v9550_v59 }
 0x5c1   : > { %9884 = vst [vmem:[#allocation91_spill] sm:$0xff] %v7604_v26 }
 0x5c5   : > { %v7606_v18 = vpop.permute.xlu0 %5365  ;;  %v7608_v50 = vpop.permute.xlu1 %5355 }
 0x5c6   : > { %9885 = vst [vmem:[#allocation94_spill] sm:$0xff] %v7608_v50  ;;  %v9565_v28 = vunpack.i.h.bf16 %v7608_v50  ;;  %v9558_v37 = vunpack.i.l.bf16 %v7608_v50  ;;  %v9571_v23 = vunpack.i.h.bf16 %v7606_v18 }
 0x5c8   : > { %v7614_v19 = vpop.permute.xlu2 %5405  ;;  %v7621_v59 = vsel %vm2036_vm11, %v9559_v21, %v9558_v37  ;;  %v7628_v22 = vsel %vm2036_vm11, %v9565_v28, %v9564_v31 }
 0x5c9   : > { %9886 = vst [vmem:[#allocation81_spill] sm:$0xff] %v7628_v22  ;;  %v5408_v49 = vunpack.i.h.bf16 %v7614_v19  ;;  %v5407_v62 = vunpack.i.l.bf16 %v7614_v19 }
 0x5cd   : > { %v7632_v16 = vpop.permute.xlu0 %5380  ;;  %v7634_v44 = vpop.permute.xlu1 %5370 }
 0x5ce   : > { %9887 = vst [vmem:[#allocation95_spill] sm:$0xff] %v7632_v16  ;;  %v9576_v37 = vunpack.i.l.bf16 %v7632_v16  ;;  %v9573_v21 = vunpack.i.h.bf16 %v7634_v44  ;;  %v9570_v53 = vunpack.i.l.bf16 %v7634_v44 }
 0x5d0   : > { %v7640_v3 = vpop.permute.xlu2 %5420  ;;  %v7647_v31 = vsel %vm519_vm0, %v9571_v23, %v9570_v53  ;;  %v7654_v28 = vsel %vm519_vm0, %v9573_v21, %v9572_v43  ;;  %v7661_v5 = vsel %vm519_vm0, %v9577_v51, %v9576_v37 }
 0x5d1   : > { %9888 = vst [vmem:[#allocation45_spill] sm:$0xff] %v7640_v3  ;;  %v9596_v16 = vunpack.i.l.bf16 %v7640_v3 }
 0x5d2   : > { %9889 = vst [vmem:[#allocation61_spill] sm:$0xff] %v7661_v5 }
 0x5d5   : > { %v7663_v25 = vpop.permute.xlu0 %5395  ;;  %v7665_v50 = vpop.permute.xlu1 %5385 }
 0x5d6   : > { %v9585_v43 = vunpack.i.h.bf16 %v7663_v25  ;;  %v5388_v56 = vunpack.i.h.bf16 %v7665_v50 }
 0x5d8   : > { %v7667_v53 = vpop.permute.xlu2 %5435 }
 0x5dd   : > { %v7669_v23 = vpop.permute.xlu0 %5410  ;;  %v7671_v7 = vpop.permute.xlu1 %5400 }
 0x5de   : > { %9890 = vst [vmem:[#allocation39_spill] sm:$0xff] %v7671_v7  ;;  %v9584_v21 = vunpack.i.l.bf16 %v7671_v7 }
 0x5e0   : > { %v7675_v52 = vpop.permute.xlu2 %5450  ;;  %v7682_v37 = vsel %vm519_vm0, %v9585_v43, %v9584_v21 }
 0x5e1   : > { %9891 = vst [vmem:[#allocation92_spill] sm:$0xff] %v7682_v37 }
 0x5e5   : > { %v7684_v51 = vpop.permute.xlu0 %5425  ;;  %v7686_v11 = vpop.permute.xlu1 %5415 }
 0x5e6   : > { %v9597_v58 = vunpack.i.h.bf16 %v7686_v11  ;;  %v5428_v39 = vunpack.i.h.bf16 %v7684_v51 }
 0x5e8   : > { %v7690_v26 = vpop.permute.xlu2 %5465  ;;  %v7697_v7 = vsel %vm2277_vm12, %v9597_v58, %v9596_v16 }
 0x5e9   : > { %9892 = vst [vmem:[#allocation46_spill] sm:$0xff] %v7697_v7  ;;  %v5468_v21 = vunpack.i.h.bf16 %v7690_v26  ;;  %v9602_v43 = vunpack.i.l.bf16 %v7690_v26  ;;  %v5427_v7 = vunpack.i.l.bf16 %v7684_v51  ;;  %v5387_v51 = vunpack.i.l.bf16 %v7665_v50 }
 0x5eb   : > { %v2498_v17 = vsel %vm899_vm3, %v9602_v43, %v5468_v21  ;;  %v2178_v50 = vsel %vm519_vm0, %v5387_v51, %v5388_v56  ;;  %v9893_v51 = vunpack.i.h.bf16 %v7606_v18 }
 0x5ec   : > { %2778 = vmatpush.msra.mxu3 %v2498_v17 }
 0x5ed   : > { %v7704_v22 = vpop.permute.xlu0 %5440  ;;  %v7706_v36 = vpop.permute.xlu1 %5430 }
 0x5ee   : > { %v9617_v34 = vunpack.i.l.bf16 %v7706_v36 }
 0x5f0   : > { %v7710_v10 = vpop.permute.xlu2 %5480 }
 0x5f1   : > { %v5483_v16 = vunpack.i.h.bf16 %v7710_v10 }
 0x5f5   : > { %v7708_v54 = vpop.permute.xlu0 %5455  ;;  %v5446_v3 = vpop.permute.xlu1 %5445 }
 0x5f6   : > { %v5448_v58 = vunpack.i.h.bf16 %v5446_v3  ;;  %v5447_v8 = vunpack.i.l.bf16 %v5446_v3 }
 0x5f8   : > { %v2384_v46 = vsel %vm767_vm2, %v5447_v8, %v5448_v58 }
 0x5fd   : > { %v7713_v33 = vpop.permute.xlu0 %5470  ;;  %v7715_v5 = vpop.permute.xlu1 %5460 }
 0x5fe   : > { %v5473_v43 = vunpack.i.h.bf16 %v7713_v33  ;;  %v9611_v17 = vunpack.i.l.bf16 %v7713_v33  ;;  %v5463_v37 = vunpack.i.h.bf16 %v7715_v5 }
 0x600   : > { %v2391_v1 = vsel %vm767_vm2, %v5483_v16, %v5463_v37  ;;  %v2491_v3 = vsel %vm899_vm3, %v9611_v17, %v5473_v43  ;;  %v2285_v16 = vsel %vm2277_vm12, %v5427_v7, %v5428_v39  ;;  %v2278_v17 = vsel %vm2277_vm12, %v5407_v62, %v5408_v49 }
 0x601   : > { %2695 = vmatpush.msra.mxu0 %v2391_v1  ;;  %2779 = vmatpush.msra.mxu3 %v2491_v3  ;;  %v5367_v3 = vunpack.i.l.bf16 %v7606_v18  ;;  %v9616_v62 = vunpack.i.l.bf16 %v7710_v10  ;;  %v5453_v18 = vunpack.i.h.bf16 %v7675_v52 }
 0x602   : > { %5105 = vmatmul.msk.f32.vlgmr.msra.gmra.mxu3 %vm2688_vm13, %v7723_v2 }
 0x603   : > { %2696 = vmatpush.msra.mxu0 %v2384_v46  ;;  %v9618_v46 = vunpack.i.l.bf16 %v7675_v52  ;;  %v2171_v57 = vsel %vm519_vm0, %v5367_v3, %v9893_v51  ;;  %v5433_v3 = vunpack.i.h.bf16 %v7706_v36 }
 0x605   : > { %v7739_v41 = vpop.permute.xlu0 %5485  ;;  %v7741_v1 = vpop.permute.xlu1 %5475  ;;  %2697 = vmatpush.msra.mxu0 %v2285_v16 }
 0x606   : > { %v9615_v19 = vunpack.i.l.bf16 %v7739_v41  ;;  %v9614_v8 = vunpack.i.l.bf16 %v7741_v1  ;;  %v5478_v7 = vunpack.i.h.bf16 %v7741_v1 }
 0x607   : > { %2698 = vmatpush.msra.mxu0 %v2278_v17  ;;  %v9619_v17 = vunpack.i.l.bf16 %v7708_v54 }
 0x608   : > { %v2392_v16 = vsel %vm767_vm2, %v5463_v37, %v9614_v8  ;;  %v2499_v35 = vsel %vm899_vm3, %v5468_v21, %v9615_v19  ;;  %v2385_v37 = vsel %vm767_vm2, %v5448_v58, %v9618_v46  ;;  %v5347_v8 = vunpack.i.l.bf16 %v7501_v6 }
 0x609   : > { %2699 = vmatpush.msra.mxu0 %v2178_v50  ;;  %2741 = vmatpush.msra.mxu2 %v2392_v16  ;;  %v5412_v21 = vunpack.i.l.bf16 %v7669_v23  ;;  %v9894_v50 = vunpack.i.h.bf16 %v7739_v41  ;;  %v2394_v58 = vsel %vm767_vm2, %v5478_v7, %v9616_v62  ;;  %v5397_v46 = vunpack.i.l.bf16 %v7663_v25 }
 0x60a   : > { %2824 = vmatpush.msrb.mxu3 %v2499_v35  ;;  %v7774_v35 = vld [vmem:[%s9406_s4 + $0x18] sm:$0xff] }
 0x60b   : > { %2700 = vmatpush.msra.mxu0 %v2171_v57  ;;  %2742 = vmatpush.msra.mxu2 %v2385_v37  ;;  %v2492_v16 = vsel %vm899_vm3, %v5473_v43, %v9894_v50  ;;  %v5327_v57 = vunpack.i.l.bf16 %v7560_v4  ;;  %v2286_v43 = vsel %vm2277_vm12, %v5428_v39, %v9617_v34  ;;  %v5437_v37 = vunpack.i.l.bf16 %v7667_v53 }
 0x60c   : > { %2825 = vmatpush.msrb.mxu3 %v2492_v16  ;;  %v2387_v16 = vsel %vm767_vm2, %v5453_v18, %v9619_v17  ;;  %v2279_v39 = vsel %vm2277_vm12, %v5408_v49, %v5412_v21  ;;  %v9895_v34 = vunpack.i.h.bf16 %v7501_v6  ;;  %v5413_v17 = vunpack.i.h.bf16 %v7669_v23 }
 0x60d   : > { %v5491_v51 = vpop.permute.xlu1 %5490  ;;  %2701 = vmatpush.msra.mxu0 %v7237_v55  ;;  %2743 = vmatpush.msra.mxu2 %v2286_v43  ;;  %v5307_v55 = vunpack.i.l.bf16 %v7492_v29  ;;  %v9897_v6 = vunpack.i.l.bf16 %v7686_v11 }
 0x60e   : > { %2833 = vmatpush.msra.mxu3 %v2394_v58  ;;  %v5492_v19 = vunpack.i.l.bf16 %v5491_v51  ;;  %v5392_v58 = vunpack.i.l.bf16 %v7590_v0  ;;  %v5493_v62 = vunpack.i.h.bf16 %v5491_v51  ;;  %v2044_v43 = vsel %vm2036_vm11, %v5347_v8, %v9895_v34 }
 0x60f   : > { %5106 = vmatmul.msk.f32.gmra.mxu3 %vm2688_vm13, %v7774_v35  ;;  %2702 = vmatpush.msra.mxu0 %v7202_v30  ;;  %v2288_v51 = vsel %vm2277_vm12, %v5433_v3, %v5437_v37  ;;  %v5393_v34 = vunpack.i.h.bf16 %v7590_v0  ;;  %v2281_v8 = vsel %vm2277_vm12, %v5413_v17, %v9897_v6  ;;  %v9900_v0 = vunpack.i.l.bf16 %v7741_v1  ;;  %v7858_v6 = vpop.permute.xlu2 %5495 }
 0x610   : > { %2834 = vmatpush.msra.mxu3 %v2387_v16  ;;  %2744 = vmatpush.msra.mxu2 %v2279_v39  ;;  %v9896_v16 = vunpack.i.l.bf16 %v7690_v26  ;;  %v2179_v49 = vsel %vm519_vm0, %v5388_v56, %v5392_v58  ;;  %v9898_v39 = vunpack.i.h.bf16 %v7560_v4 }
 0x611   : > { %2703 = vmatpush.msra.mxu0 %v2044_v43  ;;  %v9899_v43 = vunpack.i.l.bf16 %v7713_v33  ;;  %v2181_v4 = vsel %vm519_vm0, %v5393_v34, %v5397_v46  ;;  %v2180_v23 = vsel %vm519_vm0, %v5392_v58, %v5393_v34  ;;  %v7880_v58 = vld [vmem:[%s9406_s4] sm:$0xff] }
 0x612   : > { %v2497_v50 = vsel %vm899_vm3, %v5492_v19, %v9896_v16  ;;  %2835 = vmatpush.msra.mxu3 %v2288_v51  ;;  %2745 = vmatpush.msra.mxu2 %v2179_v49  ;;  %v2037_v26 = vsel %vm2036_vm11, %v5327_v57, %v9898_v39  ;;  %v5287_v19 = vunpack.i.l.bf16 %v7374_v42  ;;  %v5267_v57 = vunpack.i.l.bf16 %v7429_v48 }
 0x613   : > { %2732 = vmatpush.msra.mxu1 %v2497_v50  ;;  %2704 = vmatpush.msra.mxu0 %v2037_v26  ;;  %v2490_v56 = vsel %vm899_vm3, %v5493_v62, %v9899_v43  ;;  %v2393_v50 = vsel %vm767_vm2, %v9900_v0, %v5478_v7  ;;  %v9901_v51 = vunpack.i.h.bf16 %v7492_v29  ;;  %v5247_v7 = vunpack.i.l.bf16 %v7369_v32  ;;  %v9910_v26 = vld [vmem:[#allocation13_spill] sm:$0xff] }
 0x614   : > { %2836 = vmatpush.msra.mxu3 %v2281_v8  ;;  %2746 = vmatpush.msra.mxu2 %v7647_v31  ;;  %v9902_v31 = vunpack.i.l.bf16 %v7675_v52  ;;  %v9903_v62 = vunpack.i.h.bf16 %v7374_v42  ;;  %v9904_v29 = vunpack.i.l.bf16 %v7706_v36  ;;  %v5228_v52 = vunpack.i.h.bf16 %v7334_v60 }
 0x615   : > { %2733 = vmatpush.msra.mxu1 %v2490_v56  ;;  %v1937_v33 = vsel %vm1929_vm10, %v5307_v55, %v9901_v51  ;;  %v2280_v36 = vsel %vm2277_vm12, %v5412_v21, %v5413_v17  ;;  %v5207_v49 = vunpack.i.l.bf16 %v7347_v47  ;;  %v5497_v17 = vunpack.i.l.bf16 %v7858_v6 }
 0x616   : > { %2837 = vmatpush.msra.mxu3 %v2181_v4  ;;  %2705 = vmatpush.msra.mxu0 %v1937_v33  ;;  %v2386_v1 = vsel %vm767_vm2, %v9902_v31, %v5453_v18  ;;  %v1930_v16 = vsel %vm1929_vm10, %v5287_v19, %v9903_v62  ;;  %v2287_v55 = vsel %vm2277_vm12, %v9904_v29, %v5433_v3  ;;  %v5227_v18 = vunpack.i.l.bf16 %v7334_v60  ;;  %v9911_v19 = vld [vmem:[#allocation27_spill] sm:$0xff]  ;;  %v9917_v31 = vld [vmem:[#allocation33_spill] sm:$0xff]  ;;  %v9920_v29 = vld [vmem:[#allocation16_spill] sm:$0xff] }
 0x617   : > { %2787 = vmatpush.msrb.mxu1 %v2393_v50  ;;  %2747 = vmatpush.msra.mxu2 %v7244_v45  ;;  %v5208_v3 = vunpack.i.h.bf16 %v7347_v47  ;;  %v9906_v60 = vunpack.i.h.bf16 %v7369_v32  ;;  %v9907_v32 = vunpack.i.h.bf16 %v7634_v44  ;;  %v9908_v21 = vunpack.i.l.bf16 %v7634_v44  ;;  %v9915_v50 = vld [vmem:[#allocation15_spill] sm:$0xff] }
 0x618   : > { %2838 = vmatpush.msra.mxu3 %v7654_v28  ;;  %2706 = vmatpush.msra.mxu0 %v1930_v16  ;;  %v9905_v28 = vunpack.i.h.bf16 %v7429_v48  ;;  %v1723_v47 = vsel %vm1609_vm8, %v5227_v18, %v5228_v52  ;;  %v5462_v8 = vunpack.i.l.bf16 %v7715_v5  ;;  %v5458_v44 = vunpack.i.h.bf16 %v7708_v54  ;;  %v7929_v16 = vld [vmem:[%s9406_s4 + $0x10] sm:$0xff]  ;;  %v7932_v18 = vpop.permute.xlu1 %5505 }
 0x619   : > { %2788 = vmatpush.msrb.mxu1 %v2386_v1  ;;  %2748 = vmatpush.msra.mxu2 %v7207_v14  ;;  %v1823_v48 = vsel %vm1822_vm9, %v5247_v7, %v9906_v60  ;;  %v1716_v34 = vsel %vm1609_vm8, %v5207_v49, %v5208_v3  ;;  %v5442_v39 = vunpack.i.l.bf16 %v7704_v22  ;;  %v5212_v4 = vunpack.i.l.bf16 %v9915_v50  ;;  %v9923_v49 = vld [vmem:[#allocation43_spill] sm:$0xff] }
 0x61a   : > { %2839 = vmatpush.msra.mxu3 %v7256_v20  ;;  %v1830_v42 = vsel %vm1822_vm9, %v5267_v57, %v9905_v28  ;;  %5103 = vmatmul.msk.f32.vlgmr.msra.gmra.mxu1 %vm2688_vm13, %v7723_v2  ;;  %v9916_v57 = vld [vmem:[#allocation56_spill] sm:$0xff]  ;;  %v9918_v1 = vunpack.i.h.bf16 %v9917_v31  ;;  %v9919_v7 = vunpack.i.l.bf16 %v9917_v31  ;;  %v9924_v60 = vunpack.i.h.bf16 %v9923_v49 }
 0x61b   : > { %2789 = vmatpush.msrb.mxu1 %v2287_v55  ;;  %2707 = vmatpush.msra.mxu0 %v1830_v42  ;;  %v5217_v55 = vunpack.i.l.bf16 %v9920_v29  ;;  %v9921_v28 = vld [vmem:[#allocation28_spill] sm:$0xff]  ;;  %v9922_v42 = vld [vmem:[#allocation46_spill] sm:$0xff] }
 0x61c   : > { %2749 = vmatpush.msra.mxu2 %v7597_v40  ;;  %2840 = vmatpush.msra.mxu3 %v7220_v15  ;;  %v5498_v40 = vunpack.i.h.bf16 %v7858_v6  ;;  %v2039_v62 = vsel %vm2036_vm11, %v9919_v7, %v9918_v1 }
 0x61d   : > { %2790 = vmatpush.msrb.mxu1 %v2280_v36  ;;  %2708 = vmatpush.msra.mxu0 %v1823_v48  ;;  %v5213_v36 = vunpack.i.h.bf16 %v9915_v50  ;;  %v9925_v48 = vunpack.i.l.bf16 %v9923_v49  ;;  %v9953_v50 = vld [vmem:[#allocation91_spill] sm:$0xff] }
 0x61e   : > { %2750 = vmatpush.msra.mxu2 %v7573_v61  ;;  %5107 = vmatmul.msk.f32.vlgmr.msrb.gmra.mxu3 %vm2688_vm13, %v7723_v2  ;;  %v2173_v61 = vsel %vm519_vm0, %v9908_v21, %v9907_v32  ;;  %v9926_v32 = vld [vmem:[#allocation25_spill] sm:$0xff] }
 0x61f   : > { %2791 = vmatpush.msrb.mxu1 %v2180_v23  ;;  %2841 = vmatpush.msra.mxu3 %v7621_v59  ;;  %v5232_v59 = vunpack.i.l.bf16 %v7360_v27  ;;  %v1939_v23 = vsel %vm1929_vm10, %v9925_v48, %v9924_v60  ;;  %v5443_v48 = vunpack.i.h.bf16 %v7704_v22  ;;  %v9955_v22 = vld [vmem:[#allocation17_spill] sm:$0xff] }
 0x620   : > { %2709 = vmatpush.msra.mxu0 %v1723_v47  ;;  %2751 = vmatpush.msra.mxu2 %v7542_v12  ;;  %v2396_v12 = vsel %vm767_vm2, %v5497_v17, %v5498_v40  ;;  %v5507_v47 = vunpack.i.l.bf16 %v7932_v18 }
 0x621   : > { %2792 = vmatpush.msrb.mxu1 %v2173_v61  ;;  %2842 = vmatpush.msra.mxu3 %v7580_v24  ;;  %v9909_v24 = vld [vmem:[#allocation59_spill] sm:$0xff]  ;;  %v1724_v33 = vsel %vm1609_vm8, %v5228_v52, %v5232_v59  ;;  %v1717_v52 = vsel %vm1609_vm8, %v5208_v3, %v5212_v4  ;;  %v9927_v3 = vunpack.i.l.bf16 %v7710_v10  ;;  %v5501_v61 = vpop.permute.xlu0 %5500  ;;  %v2291_v5 = vsel %vm2277_vm12, %v5442_v39, %v5443_v48  ;;  %v9968_v48 = vld [vmem:[#allocation37_spill] sm:$0xff] }
 0x622   : > { %2710 = vmatpush.msra.mxu0 %v1716_v34  ;;  %2752 = vmatpush.msra.mxu2 %v7476_v13  ;;  %v5438_v13 = vunpack.i.h.bf16 %v7667_v53  ;;  %v9928_v34 = vld [vmem:[#allocation92_spill] sm:$0xff]  ;;  %v9943_v53 = vunpack.i.h.bf16 %v7686_v11 }
 0x623   : > { %2711 = vmatmul.f32.vlgmr.msra.gmra.mxu0 %v7880_v58  ;;  %2793 = vmatpush.msrb.mxu1 %v7247_v63  ;;  %v2395_v21 = vsel %vm767_vm2, %v9927_v3, %v5497_v17  ;;  %v9932_v17 = vunpack.i.l.bf16 %v7708_v54  ;;  %v9946_v3 = vunpack.i.h.bf16 %v7360_v27  ;;  %v1718_v27 = vsel %vm1609_vm8, %v5212_v4, %v5213_v36  ;;  %v9954_v4 = vld [vmem:[#allocation39_spill] sm:$0xff] }
 0x624   : > { %2843 = vmatpush.msra.mxu3 %v7549_v9  ;;  %2925 = vmatpush.msrb.mxu0 %v2396_v12  ;;  %v2389_v9 = vsel %vm767_vm2, %v5458_v44, %v5462_v8  ;;  %v2290_v51 = vsel %vm2277_vm12, %v5438_v13, %v5442_v39  ;;  %v1719_v12 = vsel %vm1609_vm8, %v5213_v36, %v5217_v55  ;;  %v5403_v36 = vunpack.i.h.bf16 %v9954_v4 }
 0x625   : > { %2753 = vmatpush.msra.mxu2 %v7445_v38  ;;  %2794 = vmatpush.msrb.mxu1 %v9910_v26  ;;  %v9912_v38 = vld [vmem:[#allocation71_spill] sm:$0xff]  ;;  %v2289_v54 = vsel %vm2277_vm12, %v5437_v37, %v5438_v13  ;;  %v9944_v37 = vunpack.i.l.bf16 %v7686_v11  ;;  %v1725_v11 = vsel %vm1609_vm8, %v5232_v59, %v9946_v3 }
 0x626   : > { %2844 = vmatpush.msra.mxu3 %v9909_v24  ;;  %2926 = vmatpush.msrb.mxu0 %v2389_v9  ;;  %v9913_v43 = vunpack.i.h.bf16 %v9912_v38  ;;  %v9914_v56 = vunpack.i.l.bf16 %v9912_v38  ;;  %v5508_v24 = vunpack.i.h.bf16 %v7932_v18  ;;  %v9929_v9 = vld [vmem:[#allocation31_spill] sm:$0xff]  ;;  %v9939_v18 = vunpack.i.h.bf16 %v7739_v41 }
 0x627   : > { %2754 = vmatpush.msra.mxu2 %v9911_v19  ;;  %5108 = vmatmul.msk.f32.gmra.mxu3 %vm2688_vm13, %v7774_v35  ;;  %v9930_v19 = vunpack.i.h.bf16 %v9929_v9  ;;  %v9931_v38 = vunpack.i.l.bf16 %v9929_v9  ;;  %v2282_v13 = vsel %vm2277_vm12, %v9944_v37, %v9943_v53  ;;  %v9949_v9 = vld [vmem:[#allocation81_spill] sm:$0xff]  ;;  %v9966_v53 = vld [vmem:[#allocation58_spill] sm:$0xff] }
 0x628   : > { %v2046_v0 = vsel %vm2036_vm11, %v9914_v56, %v9913_v43  ;;  %2845 = vmatpush.msra.mxu3 %v9916_v57  ;;  %2927 = vmatpush.msrb.mxu0 %v2290_v51  ;;  %v2388_v43 = vsel %vm767_vm2, %v9932_v17, %v5458_v44  ;;  %v5502_v56 = vunpack.i.l.bf16 %v5501_v61  ;;  %v9934_v57 = vunpack.i.l.bf16 %v7739_v41  ;;  %v9945_v41 = vld [vmem:[#allocation12_spill] sm:$0xff] }
 0x629   : > { %2795 = vmatpush.msrb.mxu1 %v2046_v0  ;;  %2755 = vmatpush.msra.mxu2 %v1724_v33  ;;  %v1932_v10 = vsel %vm1929_vm10, %v9931_v38, %v9930_v19  ;;  %v9933_v0 = vld [vmem:[#allocation61_spill] sm:$0xff]  ;;  %v9935_v33 = vld [vmem:[#allocation24_spill] sm:$0xff]  ;;  %v5503_v44 = vunpack.i.h.bf16 %v5501_v61 }
 0x62a   : > { %2846 = vmatpush.msra.mxu3 %v9921_v28  ;;  %2928 = vmatpush.msrb.mxu0 %v9922_v42  ;;  %v2500_v51 = vsel %vm899_vm3, %v9934_v57, %v5507_v47  ;;  %v9936_v31 = vunpack.i.h.bf16 %v9935_v33  ;;  %v9937_v1 = vunpack.i.l.bf16 %v9935_v33  ;;  %v2493_v28 = vsel %vm899_vm3, %v9939_v18, %v5508_v24  ;;  %v9957_v57 = vld [vmem:[#allocation95_spill] sm:$0xff]  ;;  %v9958_v33 = vld [vmem:[#allocation44_spill] sm:$0xff]  ;;  %v9962_v18 = vld [vmem:[#allocation94_spill] sm:$0xff] }
 0x62b   : > { %2796 = vmatpush.msrb.mxu1 %v2039_v62  ;;  %2756 = vmatpush.msra.mxu2 %v1717_v52  ;;  %v9938_v62 = vld [vmem:[#allocation14_spill] sm:$0xff]  ;;  %v9940_v52 = vld [vmem:[#allocation55_spill] sm:$0xff]  ;;  %v2390_v6 = vsel %vm767_vm2, %v5462_v8, %v5503_v44  ;;  %v9967_v37 = vunpack.i.l.bf16 %v9957_v57 }
 0x62c   : > { %2714 = vmatmul.f32.gmra.mxu0 %v7929_v16  ;;  %2757 = vmatmul.f32.vlgmr.msra.gmra.mxu2 %v7880_v58  ;;  %v1832_v7 = vsel %vm1822_vm9, %v9937_v1, %v9936_v31  ;;  %v9941_v42 = vunpack.i.h.bf16 %v9940_v52  ;;  %v9942_v49 = vunpack.i.l.bf16 %v9940_v52  ;;  %v9959_v1 = vld [vmem:[#allocation11_spill] sm:$0xff]  ;;  %v9964_v52 = vunpack.i.l.bf16 %v9962_v18 }
 0x62d   : > { %2797 = vmatpush.msrb.mxu1 %v1939_v23  ;;  %2847 = vmatpush.msra.mxu3 %v9926_v32  ;;  %v2397_v23 = vsel %vm767_vm2, %v5498_v40, %v5502_v56  ;;  %v5511_v32 = vpop.permute.xlu2 %5510  ;;  %v9948_v40 = vld [vmem:[#allocation45_spill] sm:$0xff] }
 0x62e   : > { %2879 = vmatpush.msrb.mxu2 %v2395_v21  ;;  %2929 = vmatpush.msrb.mxu0 %v9928_v34  ;;  %v1825_v60 = vsel %vm1822_vm9, %v9942_v49, %v9941_v42  ;;  %v9947_v21 = vunpack.i.h.bf16 %v7663_v25  ;;  %v8010_v34 = vpop.permute.xlu1 %5520  ;;  %v9950_v25 = vld [vmem:[#allocation62_spill] sm:$0xff]  ;;  %v5512_v38 = vunpack.i.l.bf16 %v5511_v32  ;;  %v5513_v17 = vunpack.i.h.bf16 %v5511_v32  ;;  %v9965_v42 = vld [vmem:[#allocation53_spill] sm:$0xff] }
 0x62f   : > { %5104 = vmatmul.msk.f32.gmra.mxu1 %vm2688_vm13, %v7774_v35  ;;  %2848 = vmatpush.msra.mxu3 %v1719_v12  ;;  %v5423_v12 = vunpack.i.h.bf16 %v9948_v40  ;;  %v9951_v59 = vunpack.i.h.bf16 %v9950_v25  ;;  %v5522_v8 = vunpack.i.l.bf16 %v8010_v34  ;;  %v9956_v39 = vunpack.i.l.bf16 %v9948_v40  ;;  %v9973_v40 = vld [vmem:[#allocation60_spill] sm:$0xff] }
 0x630   : > { %2798 = vmatpush.msrb.mxu1 %v1932_v10  ;;  %2880 = vmatpush.msrb.mxu2 %v2388_v43  ;;  %v2182_v61 = vsel %vm519_vm0, %v5397_v46, %v9947_v21  ;;  %v9952_v46 = vunpack.i.l.bf16 %v9950_v25  ;;  %v8025_v10 = vpop.permute.xlu0 %5515  ;;  %v2501_v43 = vsel %vm899_vm3, %v5507_v47, %v5512_v38  ;;  %v2494_v31 = vsel %vm899_vm3, %v5508_v24, %v5513_v17 }
 0x631   : > { %2930 = vmatpush.msrb.mxu0 %v9933_v0  ;;  %2849 = vmatmul.f32.vlgmr.msra.gmra.mxu3 %v7880_v58  ;;  %v5517_v56 = vunpack.i.l.bf16 %v8025_v10  ;;  %v2284_v0 = vsel %vm2277_vm12, %v9956_v39, %v5423_v12  ;;  %v2502_v47 = vsel %vm899_vm3, %v5512_v38, %v5522_v8  ;;  %v5238_v49 = vunpack.i.h.bf16 %v9965_v42  ;;  %v9978_v38 = vld [vmem:[#allocation21_spill] sm:$0xff] }
 0x632   : > { %2870 = vmatpush.msrb.mxu3 %v2500_v51  ;;  %2799 = vmatpush.msrb.mxu1 %v1832_v7  ;;  %v2175_v19 = vsel %vm519_vm0, %v9952_v46, %v9951_v59  ;;  %v5383_v51 = vunpack.i.h.bf16 %v9957_v57  ;;  %v9960_v7 = vld [vmem:[#allocation35_spill] sm:$0xff]  ;;  %v9970_v32 = vunpack.i.l.bf16 %v9968_v48  ;;  %v5363_v12 = vunpack.i.h.bf16 %v9973_v40 }
 0x633   : > { %2881 = vmatpush.msrb.mxu2 %v2289_v54  ;;  %2931 = vmatpush.msrb.mxu0 %v9938_v62  ;;  %v9961_v54 = vunpack.i.l.bf16 %v9954_v4 }
 0x634   : > { %2871 = vmatpush.msrb.mxu3 %v2493_v28  ;;  %2800 = vmatpush.msrb.mxu1 %v1825_v60  ;;  %v9963_v28 = vunpack.i.h.bf16 %v9962_v18  ;;  %v2495_v60 = vsel %vm899_vm3, %v5513_v17, %v5517_v56 }
 0x635   : > { %2882 = vmatpush.msrb.mxu2 %v2282_v13  ;;  %2932 = vmatpush.msrb.mxu0 %v9945_v41  ;;  %v2184_v44 = vsel %vm519_vm0, %v9961_v54, %v5403_v36  ;;  %v2177_v13 = vsel %vm519_vm0, %v9967_v37, %v5383_v51  ;;  %v9980_v36 = vld [vmem:[#allocation34_spill] sm:$0xff]  ;;  %v9984_v51 = vld [vmem:[#allocation36_spill] sm:$0xff] }
 0x636   : > { %2971 = vmatpush.msra.mxu3 %v2397_v23  ;;  %2760 = vmatmul.f32.gmra.mxu2 %v7929_v16  ;;  %v2048_v24 = vsel %vm2036_vm11, %v9964_v52, %v9963_v28  ;;  %v9969_v23 = vunpack.i.h.bf16 %v9968_v48  ;;  %v9981_v17 = vunpack.i.h.bf16 %v9980_v36  ;;  %v9989_v28 = vld [vmem:[#allocation54_spill] sm:$0xff] }
 0x637   : > { %2801 = vmatpush.msrb.mxu1 %v1725_v11  ;;  %2883 = vmatpush.msrb.mxu2 %v2182_v61  ;;  %v9971_v11 = vld [vmem:[#allocation18_spill] sm:$0xff]  ;;  %v9972_v61 = vld [vmem:[#allocation23_spill] sm:$0xff]  ;;  %v5303_v52 = vunpack.i.h.bf16 %v9989_v28 }
 0x638   : > { %2933 = vmatpush.msrb.mxu0 %v9949_v9  ;;  %2972 = vmatpush.msra.mxu3 %v2390_v6  ;;  %v2041_v3 = vsel %vm2036_vm11, %v9970_v32, %v9969_v23  ;;  %v5242_v21 = vunpack.i.l.bf16 %v9971_v11  ;;  %v5222_v6 = vunpack.i.l.bf16 %v9972_v61  ;;  %v9974_v9 = vld [vmem:[#allocation29_spill] sm:$0xff]  ;;  %v9994_v23 = vld [vmem:[#allocation32_spill] sm:$0xff] }
 0x639   : > { %2802 = vmatpush.msrb.mxu1 %v1718_v27  ;;  %2884 = vmatpush.msrb.mxu2 %v2175_v19  ;;  %v9975_v27 = vld [vmem:[#allocation30_spill] sm:$0xff]  ;;  %v5218_v19 = vunpack.i.h.bf16 %v9920_v29  ;;  %v5283_v32 = vunpack.i.h.bf16 %v9994_v23 }
 0x63a   : > { %2934 = vmatpush.msrb.mxu0 %v9953_v50  ;;  %2973 = vmatpush.msra.mxu3 %v2291_v5  ;;  %v9976_v25 = vunpack.i.h.bf16 %v9975_v27  ;;  %v9977_v59 = vunpack.i.l.bf16 %v9975_v27  ;;  %v1728_v5 = vsel %vm1609_vm8, %v5238_v49, %v5242_v21  ;;  %v9979_v50 = vld [vmem:[#allocation64_spill] sm:$0xff] }
 0x63b   : > { %2803 = vmatmul.f32.vlgmr.msrb.gmra.mxu1 %v7880_v58  ;;  %2852 = vmatmul.f32.gmra.mxu3 %v7929_v16  ;;  %v5343_v4 = vunpack.i.h.bf16 %v9979_v50  ;;  %v1721_v57 = vsel %vm1609_vm8, %v5218_v19, %v5222_v6 }
 0x63c   : > { %2916 = vmatpush.msra.mxu1 %v2501_v43  ;;  %2885 = vmatpush.msrb.mxu2 %v9955_v22  ;;  %v1941_v46 = vsel %vm1929_vm10, %v9977_v59, %v9976_v25  ;;  %v9982_v43 = vunpack.i.l.bf16 %v9980_v36  ;;  %v9997_v25 = vld [vmem:[#allocation26_spill] sm:$0xff] }
 0x63d   : > { %2935 = vmatpush.msrb.mxu0 %v9958_v33  ;;  %2974 = vmatpush.msra.mxu3 %v2284_v0  ;;  %v9983_v0 = vld [vmem:[#allocation19_spill] sm:$0xff]  ;;  %v5323_v33 = vunpack.i.h.bf16 %v9984_v51  ;;  %v5263_v59 = vunpack.i.h.bf16 %v9997_v25  ;;  %v10000_v29 = vunpack.i.l.bf16 %v9997_v25  ;;  %v10007_v25 = vld [vmem:[#allocation82_spill] sm:$0xff] }
 0x63e   : > { %2917 = vmatpush.msra.mxu1 %v2494_v31  ;;  %2886 = vmatpush.msrb.mxu2 %v9959_v1  ;;  %v1934_v39 = vsel %vm1929_vm10, %v9982_v43, %v9981_v17  ;;  %v9985_v31 = vunpack.i.l.bf16 %v9973_v40  ;;  %v5223_v43 = vunpack.i.h.bf16 %v9972_v61 }
 0x63f   : > { %2936 = vmatpush.msrb.mxu0 %v9960_v7  ;;  %2975 = vmatpush.msra.mxu3 %v2184_v44  ;;  %v9986_v7 = vld [vmem:[#allocation57_spill] sm:$0xff] }
 0x640   : > { %2962 = vmatpush.msrb.mxu1 %v2502_v47  ;;  %2887 = vmatpush.msrb.mxu2 %v2048_v24  ;;  %v2050_v47 = vsel %vm2036_vm11, %v9985_v31, %v5363_v12  ;;  %v9987_v54 = vunpack.i.h.bf16 %v9986_v7  ;;  %v9988_v44 = vunpack.i.l.bf16 %v9986_v7  ;;  %v9990_v24 = vunpack.i.l.bf16 %v9979_v50 }
 0x641   : > { %2937 = vmatpush.msrb.mxu0 %v9966_v53  ;;  %2976 = vmatpush.msra.mxu3 %v2177_v13  ;;  %v9991_v53 = vld [vmem:[#allocation22_spill] sm:$0xff]  ;;  %v5523_v12 = vunpack.i.h.bf16 %v8010_v34  ;;  %v5518_v50 = vunpack.i.h.bf16 %v8025_v10  ;;  %v1722_v34 = vsel %vm1609_vm8, %v5222_v6, %v5223_v43 }
 0x642   : > { %2963 = vmatpush.msrb.mxu1 %v2495_v60  ;;  %2888 = vmatpush.msrb.mxu2 %v2041_v3  ;;  %v1834_v18 = vsel %vm1822_vm9, %v9988_v44, %v9987_v54  ;;  %v2043_v60 = vsel %vm2036_vm11, %v9990_v24, %v5343_v4  ;;  %v9992_v37 = vunpack.i.h.bf16 %v9991_v53  ;;  %v9993_v13 = vunpack.i.l.bf16 %v9991_v53  ;;  %v8181_v44 = vpop.permute.xlu0 %2685 }
 0x643   : > { %2938 = vmatpush.msrb.mxu0 %v9974_v9  ;;  %2806 = vmatmul.f32.gmra.mxu1 %v7929_v16  ;;  %v9995_v3 = vunpack.i.l.bf16 %v9984_v51  ;;  %v9996_v9 = vunpack.i.l.bf16 %v9965_v42  ;;  %v1720_v4 = vsel %vm1609_vm8, %v5217_v55, %v5218_v19  ;;  %v5243_v42 = vunpack.i.h.bf16 %v9971_v11 }
 0x644   : > { %2977 = vmatpush.msra.mxu3 %v9978_v38  ;;  %2889 = vmatpush.msrb.mxu2 %v1941_v46  ;;  %v1827_v48 = vsel %vm1822_vm9, %v9993_v13, %v9992_v37  ;;  %v9998_v46 = vunpack.i.l.bf16 %v9989_v28  ;;  %v2503_v17 = vsel %vm899_vm3, %v5522_v8, %v5523_v12  ;;  %v1829_v55 = vsel %vm1822_vm9, %v10000_v29, %v5263_v59  ;;  %v8163_v8 = vpop.permute.xlu2 %2680 }
 0x645   : > { %5109 = vmatmul.msk.f32.vlgmr.msrb.gmra.mxu3 %vm2688_vm13, %v7723_v2  ;;  %2939 = vmatpush.msrb.mxu0 %v1728_v5  ;;  %v1943_v40 = vsel %vm1929_vm10, %v9995_v3, %v5323_v33  ;;  %v1727_v27 = vsel %vm1609_vm8, %v9996_v9, %v5238_v49  ;;  %v9999_v49 = vunpack.i.l.bf16 %v9994_v23  ;;  %v2496_v11 = vsel %vm899_vm3, %v5517_v56, %v5518_v50  ;;  %v10004_v3 = vld [vmem:[#allocation20_spill] sm:$0xff]  ;;  %v10005_v9 = vld [vmem:[#allocation79_spill] sm:$0xff] }
 0x646   : > { %2978 = vmatpush.msra.mxu3 %v9983_v0  ;;  %2890 = vmatpush.msrb.mxu2 %v1934_v39  ;;  %v1936_v5 = vsel %vm1929_vm10, %v9998_v46, %v5303_v52  ;;  %v1729_v19 = vsel %vm1609_vm8, %v5242_v21, %v5243_v42  ;;  %v10003_v51 = vmov 0.0  }
 0x647   : > { %2940 = vmatpush.msrb.mxu0 %v1721_v57  ;;  %v1836_v36 = vsel %vm1822_vm9, %v9999_v49, %v5283_v32  ;;  %v10001_v57 = vld [vmem:[#allocation80_spill] sm:$0xff] }
 0x648   : > { %2979 = vmatpush.msra.mxu3 %v2050_v47  ;;  %2941 = vmatmul.f32.vlgmr.msrb.gmra.mxu0 %v7880_v58 }
 0x649   : > { %2891 = vmatpush.msrb.mxu2 %v1834_v18 }
 0x64a   : > { %2980 = vmatpush.msra.mxu3 %v2043_v60 }
 0x64b   : > { %2892 = vmatpush.msrb.mxu2 %v1827_v48  ;;  %5111 = vmatmul.msk.f32.vlgmr.msra.gmra.mxu1 %vm2688_vm13, %v7723_v2 }
 0x64c   : > { %2981 = vmatpush.msra.mxu3 %v1943_v40 }
 0x64d   : > { %5110 = vmatmul.msk.f32.gmra.mxu3 %vm2688_vm13, %v7774_v35  ;;  %2893 = vmatpush.msrb.mxu2 %v1727_v27 }
 0x64e   : > { %2982 = vmatpush.msra.mxu3 %v1936_v5 }
 0x64f   : > { %2894 = vmatpush.msrb.mxu2 %v1720_v4 }
 0x650   : > { %2983 = vmatpush.msra.mxu3 %v1836_v36  ;;  %2895 = vmatmul.f32.vlgmr.msrb.gmra.mxu2 %v7880_v58 }
 0x651   : > { %2944 = vmatmul.f32.gmra.mxu0 %v7929_v16  ;;  %3008 = vmatpush.msra.mxu2 %v2503_v17 }
 0x652   : > { %2984 = vmatpush.msra.mxu3 %v1829_v55 }
 0x653   : > { %3009 = vmatpush.msra.mxu2 %v2496_v11  ;;  %5112 = vmatmul.msk.f32.gmra.mxu1 %vm2688_vm13, %v7774_v35 }
 0x654   : > { %2985 = vmatpush.msra.mxu3 %v1729_v19 }
 0x656   : > { %2986 = vmatpush.msra.mxu3 %v1722_v34 }
 0x657   : > { %2987 = vmatmul.f32.vlgmr.msra.gmra.mxu3 %v7880_v58 }
 0x658   : > { %2898 = vmatmul.f32.gmra.mxu2 %v7929_v16 }
 0x65b   : > { %5113 = vmatmul.msk.f32.vlgmr.msrb.gmra.mxu1 %vm2688_vm13, %v7723_v2 }
 0x65f   : > { %2990 = vmatmul.f32.gmra.mxu3 %v7929_v16 }
 0x660   : > { %5115 = vmatmul.msk.f32.vlgmr.msra.gmra.mxu2 %vm2688_vm13, %v7723_v2 }
 0x663   : > { %5114 = vmatmul.msk.f32.gmra.mxu1 %vm2688_vm13, %v7774_v35 }
 0x668   : > { %5116 = vmatmul.msk.f32.gmra.mxu2 %vm2688_vm13, %v7774_v35 }
 0x685   : > { %v2781_v10 = vpop.f32.mrf.mxu3 }
 0x692   : > { %v2784_v16 = vpop.f32.mrf.mxu3 }
 0x697   : > { %v2735_v21 = vpop.f32.mrf.mxu1 }
 0x6a0   : > { %v2712_v58 = vpop.f32.mrf.mxu0 }
 0x6a1   : > { %v2713_v56 = vadd.f32 %v2712_v58, %v8163_v8  ;;  %v2827_v31 = vpop.f32.mrf.mxu3 }
 0x6a3   : > { %v2736_v61 = vadd.f32 %v2735_v21, %v2713_v56 }
 0x6a5   : > { %v3017_v6 = vadd.f32 %v2736_v61, %v7202_v30 }
 0x6a7   : > { %v3031_v39 = vmax.f32 %v3017_v6, 0.0 }
 0x6a9   : > { %v8168_v2 = vmul.f32 %v3031_v39, %v10001_v57  ;;  %v2715_v7 = vpop.f32.mrf.mxu0 }
 0x6aa   : > { %v2716_v18 = vadd.f32 %v2715_v7, %v8181_v44  ;;  %v2830_v60 = vpop.f32.mrf.mxu3 }
 0x6ab   : > { %10002 = vst [vmem:[#allocation74_spill] sm:$0xff] %v8168_v2  ;;  %v8172_v33 = vpack.i.bf16 %v8168_v2, %v10003_v51 }
 0x6ac   : > { %v2738_v35 = vpop.f32.mrf.mxu1 }
 0x6ad   : > { %5535 = vrot.lane.b32.xlu2 %v8172_v33, %s5952_s20  ;;  %5530 = vrot.lane.b32.xlu0 %v8172_v33, %s5951_s12  ;;  %v2739_v37 = vadd.f32 %v2738_v35, %v2716_v18 }
 0x6ae   : > { %5525 = vrot.lane.b32.xlu1 %v8172_v33, %s5949_s30 }
 0x6af   : > { %v2758_v30 = vpop.f32.mrf.mxu2  ;;  %v3024_v40 = vadd.f32 %v2739_v37, %v10004_v3  ;;  %v10011_v37 = vld [vmem:[#allocation84_spill] sm:$0xff] }
 0x6b0   : > { %v2759_v47 = vadd.f32 %v2758_v30, %v8163_v8 }
 0x6b1   : > { %v3038_v50 = vmax.f32 %v3024_v40, 0.0 }
 0x6b2   : > { %v2782_v54 = vadd.f32 %v2781_v10, %v2759_v47 }
 0x6b3   : > { %v8202_v49 = vmul.f32 %v3038_v50, %v10001_v57 }
 0x6b4   : > { %v3018_v52 = vadd.f32 %v2782_v54, %v7207_v14 }
 0x6b5   : > { %10008 = vst [vmem:[#allocation67_spill] sm:$0xff] %v8202_v49  ;;  %v8212_v55 = vpack.i.bf16 %v8202_v49, %v10003_v51 }
 0x6b6   : > { %v3032_v13 = vmax.f32 %v3018_v52, 0.0 }
 0x6b8   : > { %v2804_v28 = vpop.f32.mrf.mxu1  ;;  %v8189_v27 = vmul.f32 %v3032_v13, %v10005_v9 }
 0x6b9   : > { %v2805_v24 = vadd.f32 %v2804_v28, %v8163_v8  ;;  %v2761_v32 = vpop.f32.mrf.mxu2 }
 0x6ba   : > { %10006 = vst [vmem:[#allocation65_spill] sm:$0xff] %v8189_v27  ;;  %v2762_v46 = vadd.f32 %v2761_v32, %v8181_v44  ;;  %v8208_v43 = vpack.i.bf16 %v8189_v27, %v8168_v2 }
 0x6bb   : > { %v2828_v53 = vadd.f32 %v2827_v31, %v2805_v24 }
 0x6bc   : > { %v2785_v42 = vadd.f32 %v2784_v16, %v2762_v46 }
 0x6bd   : > { %v3019_v48 = vadd.f32 %v2828_v53, %v9910_v26  ;;  %v2850_v26 = vpop.f32.mrf.mxu3 }
 0x6be   : > { %v3025_v17 = vadd.f32 %v2785_v42, %v7244_v45  ;;  %v2851_v61 = vadd.f32 %v2850_v26, %v8163_v8 }
 0x6bf   : > { %v3033_v23 = vmax.f32 %v3019_v48, 0.0 }
 0x6c0   : > { %v2807_v12 = vpop.f32.mrf.mxu1  ;;  %v3039_v11 = vmax.f32 %v3025_v17, 0.0 }
 0x6c1   : > { %v8192_v59 = vmul.f32 %v3033_v23, %v10007_v25  ;;  %v2808_v14 = vadd.f32 %v2807_v12, %v8181_v44 }
 0x6c3   : > { %v5549_v5 = vpack.i.bf16 %v8192_v59, %v8189_v27  ;;  %v2831_v4 = vadd.f32 %v2830_v60, %v2808_v14 }
 0x6c5   : > { %5550 = vrot.lane.b32.xlu0 %v5549_v5, %s5952_s20  ;;  %5545 = vrot.lane.b32.xlu1 %v5549_v5, %s5951_s12  ;;  %v3026_v36 = vadd.f32 %v2831_v4, %v7247_v63  ;;  %v2853_v19 = vpop.f32.mrf.mxu3  ;;  %v8224_v63 = vmul.f32 %v3039_v11, %v10005_v9 }
 0x6c6   : > { %5540 = vrot.lane.b32.xlu2 %v5549_v5, %s5949_s30  ;;  %v2854_v18 = vadd.f32 %v2853_v19, %v8181_v44 }
 0x6c7   : > { %v3040_v29 = vmax.f32 %v3026_v36, 0.0  ;;  %10009 = vst [vmem:[#allocation86_spill] sm:$0xff] %v8224_v63  ;;  %v8241_v57 = vpack.i.bf16 %v8224_v63, %v8202_v49 }
 0x6c8   : > { %v2919_v21 = vpop.f32.mrf.mxu1 }
 0x6c9   : > { %v8221_v45 = vmul.f32 %v3040_v29, %v10007_v25  ;;  %v10012_v29 = vld [vmem:[#allocation87_spill] sm:$0xff] }
 0x6cb   : > { %v5589_v10 = vpack.i.bf16 %v8221_v45, %v8224_v63  ;;  %v8237_v16 = vpack.i.bf16 %v8192_v59, %v8221_v45 }
 0x6cd   : > { %5560 = vrot.lane.b32.xlu0 %v8208_v43, %s5954_s25  ;;  %5555 = vrot.lane.b32.xlu1 %v8208_v43, %s5943_s18  ;;  %v2873_v56 = vpop.f32.mrf.mxu3 }
 0x6ce   : > { %5565 = vrot.lane.b32.xlu2 %v8212_v55, %s5949_s30  ;;  %v2874_v35 = vadd.f32 %v2873_v56, %v2851_v61 }
 0x6d0   : > { %v3020_v47 = vadd.f32 %v2874_v35, %v7220_v15  ;;  %v2922_v54 = vpop.f32.mrf.mxu1 }
 0x6d2   : > { %v3034_v24 = vmax.f32 %v3020_v47, 0.0 }
 0x6d3   : > { %v2896_v34 = vpop.f32.mrf.mxu2 }
 0x6d4   : > { %v2897_v58 = vadd.f32 %v2896_v34, %v8163_v8  ;;  %v8262_v13 = vmul.f32 %v3034_v24, %v10011_v37 }
 0x6d5   : > { %5575 = vrot.lane.b32.xlu0 %v8212_v55, %s5952_s20  ;;  %5570 = vrot.lane.b32.xlu1 %v8212_v55, %s5951_s12  ;;  %v2876_v7 = vpop.f32.mrf.mxu3 }
 0x6d6   : > { %5590 = vrot.lane.b32.xlu2 %v5589_v10, %s5951_s12  ;;  %v2920_v6 = vadd.f32 %v2919_v21, %v2897_v58  ;;  %v2877_v60 = vadd.f32 %v2876_v7, %v2854_v18  ;;  %v5704_v7 = vpack.i.bf16 %v8189_v27, %v8224_v63 }
 0x6d8   : > { %v3021_v30 = vadd.f32 %v2920_v6, %v9959_v1  ;;  %v10010_v1 = vld [vmem:[#allocation83_spill] sm:$0xff]  ;;  %v3027_v48 = vadd.f32 %v2877_v60, %v7256_v20  ;;  %v2965_v14 = vpop.f32.mrf.mxu1 }
 0x6da   : > { %v3035_v28 = vmax.f32 %v3021_v30, 0.0  ;;  %v3041_v3 = vmax.f32 %v3027_v48, 0.0 }
 0x6db   : > { %v2899_v39 = vpop.f32.mrf.mxu2 }
 0x6dc   : > { %v2900_v31 = vadd.f32 %v2899_v39, %v8181_v44  ;;  %v8258_v53 = vmul.f32 %v3035_v28, %v10010_v1  ;;  %v8274_v25 = vmul.f32 %v3041_v3, %v10011_v37 }
 0x6dd   : > { %5585 = vrot.lane.b32.xlu0 %v5589_v10, %s5949_s30  ;;  %5580 = vrot.lane.b32.xlu1 %v8237_v16, %s5943_s18  ;;  %v2988_v40 = vpop.f32.mrf.mxu3 }
 0x6de   : > { %5605 = vrot.lane.b32.xlu2 %v8241_v57, %s5954_s25  ;;  %v2923_v52 = vadd.f32 %v2922_v54, %v2900_v31  ;;  %v5614_v32 = vpack.i.bf16 %v8258_v53, %v8262_v13  ;;  %v2989_v20 = vadd.f32 %v2988_v40, %v8163_v8 }
 0x6e0   : > { %v3028_v15 = vadd.f32 %v2923_v52, %v9955_v22  ;;  %v2942_v22 = vpop.f32.mrf.mxu0  ;;  %v2968_v58 = vpop.f32.mrf.mxu1 }
 0x6e1   : > { %v2943_v46 = vadd.f32 %v2942_v22, %v8163_v8 }
 0x6e2   : > { %v3042_v23 = vmax.f32 %v3028_v15, 0.0 }
 0x6e3   : > { %v3011_v9 = vpop.f32.mrf.mxu2  ;;  %v2966_v26 = vadd.f32 %v2965_v14, %v2943_v46 }
 0x6e4   : > { %v8271_v12 = vmul.f32 %v3042_v23, %v10010_v1  ;;  %v3012_v5 = vadd.f32 %v3011_v9, %v2989_v20 }
 0x6e5   : > { %5600 = vrot.lane.b32.xlu0 %v8241_v57, %s5943_s18  ;;  %5595 = vrot.lane.b32.xlu1 %v5589_v10, %s5952_s20  ;;  %v3022_v42 = vadd.f32 %v2966_v26, %v9945_v41  ;;  %v2991_v8 = vpop.f32.mrf.mxu3  ;;  %v10013_v10 = vld [vmem:[#allocation85_spill] sm:$0xff] }
 0x6e6   : > { %5610 = vrot.lane.b32.xlu2 %v8241_v57, %s5941_s11  ;;  %v5634_v50 = vpack.i.bf16 %v8271_v12, %v8274_v25  ;;  %v3023_v4 = vadd.f32 %v3012_v5, %v9983_v0  ;;  %v2992_v41 = vadd.f32 %v2991_v8, %v8181_v44 }
 0x6e7   : > { %v3036_v17 = vmax.f32 %v3022_v42, 0.0 }
 0x6e8   : > { %v3037_v36 = vmax.f32 %v3023_v4, 0.0  ;;  %v2945_v19 = vpop.f32.mrf.mxu0 }
 0x6e9   : > { %v8295_v0 = vmul.f32 %v3036_v17, %v10013_v10  ;;  %v2946_v56 = vadd.f32 %v2945_v19, %v8181_v44  ;;  %v5669_v44 = vpack.i.bf16 %v8262_v13, %v8274_v25 }
 0x6ea   : > { %v8292_v11 = vmul.f32 %v3037_v36, %v10012_v29 }
 0x6eb   : > { %v3014_v34 = vpop.f32.mrf.mxu2  ;;  %v2969_v6 = vadd.f32 %v2968_v58, %v2946_v56 }
 0x6ec   : > { %v3015_v21 = vadd.f32 %v3014_v34, %v2992_v41  ;;  %v5664_v61 = vpack.i.bf16 %v8292_v11, %v8295_v0 }
 0x6ed   : > { %5615 = vrot.lane.b32.xlu0 %v5614_v32, %s5949_s30  ;;  %5625 = vrot.lane.b32.xlu1 %v5614_v32, %s5952_s20  ;;  %v3029_v35 = vadd.f32 %v2969_v6, %v9938_v62 }
 0x6ee   : > { %5620 = vrot.lane.b32.xlu2 %v5614_v32, %s5951_s12  ;;  %v3030_v39 = vadd.f32 %v3015_v21, %v9978_v38 }
 0x6ef   : > { %v3043_v31 = vmax.f32 %v3029_v35, 0.0 }
 0x6f0   : > { %v3044_v30 = vmax.f32 %v3030_v39, 0.0 }
 0x6f2   : > { %v8314_v47 = vmul.f32 %v3044_v30, %v10012_v29 }
 0x6f5   : > { %5635 = vrot.lane.b32.xlu0 %v5634_v50, %s5951_s12  ;;  %5630 = vrot.lane.b32.xlu1 %v5634_v50, %s5949_s30 }
 0x6f6   : > { %5650 = vrot.lane.b32.xlu2 %v8237_v16, %s5941_s11 }
 0x6fd   : > { %5640 = vrot.lane.b32.xlu0 %v8208_v43, %s5941_s11  ;;  %5645 = vrot.lane.b32.xlu1 %v8237_v16, %s5954_s25 }
 0x6fe   : > { %5655 = vrot.lane.b32.xlu2 %v5634_v50, %s5952_s20 }
 0x705   : > { %5665 = vrot.lane.b32.xlu0 %v5664_v61, %s5951_s12  ;;  %5660 = vrot.lane.b32.xlu1 %v5664_v61, %s5949_s30 }
 0x706   : > { %5680 = vrot.lane.b32.xlu2 %v8172_v33, %s5953_s21  ;;  %v8317_v33 = vmul.f32 %v3043_v31, %v10013_v10 }
 0x707   : > { %v8324_v38 = vpop.permute.xlu2 %5535 }
 0x708   : > { %v5699_v62 = vpack.i.bf16 %v8314_v47, %v8317_v33  ;;  %v8355_v1 = vpack.i.bf16 %v8295_v0, %v8317_v33  ;;  %v9644_v23 = vunpack.i.h.bf16 %v8324_v38 }
 0x70d   : > { %5670 = vrot.lane.b32.xlu0 %v5669_v44, %s5943_s18  ;;  %5675 = vrot.lane.b32.xlu1 %v8212_v55, %s5953_s21  ;;  %v5714_v55 = vpack.i.bf16 %v8258_v53, %v8271_v12 }
 0x70e   : > { %5690 = vrot.lane.b32.xlu2 %v5664_v61, %s5952_s20 }
 0x715   : > { %5685 = vrot.lane.b32.xlu0 %v5669_v44, %s5954_s25  ;;  %5700 = vrot.lane.b32.xlu1 %v5699_v62, %s5951_s12 }
 0x716   : > { %5695 = vrot.lane.b32.xlu2 %v5699_v62, %s5949_s30 }
 0x71d   : > { %5715 = vrot.lane.b32.xlu0 %v5714_v55, %s5943_s18  ;;  %5705 = vrot.lane.b32.xlu1 %v5704_v7, %s5953_s21 }
 0x71e   : > { %5710 = vrot.lane.b32.xlu2 %v5669_v44, %s5941_s11 }
 0x720   : > { %v8333_v54 = vpop.permute.xlu2 %5540  ;;  %v8335_v18 = vpop.permute.xlu1 %5525 }
 0x721   : > { %v9622_v28 = vunpack.i.l.bf16 %v8333_v54  ;;  %v9636_v52 = vunpack.i.h.bf16 %v8335_v18 }
 0x723   : > { %v8344_v24 = vsel %vm1609_vm8, %v9636_v52, %v9622_v28 }
 0x725   : > { %5730 = vrot.lane.b32.xlu0 %v8208_v43, %s5944_s27  ;;  %5720 = vrot.lane.b32.xlu1 %v8241_v57, %s5944_s27  ;;  %v8362_v43 = vpop.permute.xlu0 %5530  ;;  %v8368_v57 = vpack.i.bf16 %v8292_v11, %v8314_v47 }
 0x726   : > { %5725 = vrot.lane.b32.xlu2 %v5714_v55, %s5954_s25  ;;  %v9640_v32 = vunpack.i.h.bf16 %v8362_v43 }
 0x728   : > { %v8351_v60 = vpop.permute.xlu2 %5565 }
 0x729   : > { %v9639_v10 = vunpack.i.h.bf16 %v8351_v60 }
 0x72d   : > { %5745 = vrot.lane.b32.xlu0 %v8355_v1, %s5943_s18  ;;  %5735 = vrot.lane.b32.xlu1 %v8237_v16, %s5953_s21 }
 0x72e   : > { %5740 = vrot.lane.b32.xlu2 %v5714_v55, %s5941_s11 }
 0x730   : > { %v8364_v15 = vpop.permute.xlu2 %5590 }
 0x731   : > { %v9627_v26 = vunpack.i.l.bf16 %v8364_v15 }
 0x735   : > { %5760 = vrot.lane.b32.xlu0 %v8368_v57, %s5943_s18  ;;  %5750 = vrot.lane.b32.xlu1 %v8355_v1, %s5954_s25 }
 0x736   : > { %5755 = vrot.lane.b32.xlu2 %v8237_v16, %s5944_s27 }
 0x737   : > { %v8376_v37 = vpop.permute.xlu0 %5550  ;;  %v8378_v48 = vpop.permute.xlu1 %5545 }
 0x738   : > { %v9628_v3 = vunpack.i.l.bf16 %v8376_v37  ;;  %v9624_v40 = vunpack.i.l.bf16 %v8378_v48  ;;  %v8384_v22 = vpop.permute.xlu2 %5605  ;;  %v9626_v36 = vunpack.i.h.bf16 %v8378_v48 }
 0x73a   : > { %v8391_v16 = vsel %vm1929_vm10, %v9644_v23, %v9628_v3  ;;  %v8398_v9 = vsel %vm1822_vm9, %v9640_v32, %v9624_v40 }
 0x73d   : > { %5775 = vrot.lane.b32.xlu0 %v8368_v57, %s5954_s25  ;;  %5765 = vrot.lane.b32.xlu1 %v5669_v44, %s5953_s21 }
 0x73e   : > { %5770 = vrot.lane.b32.xlu2 %v8355_v1, %s5941_s11 }
 0x73f   : > { %v8405_v20 = vpop.permute.xlu0 %5560  ;;  %v5556_v14 = vpop.permute.xlu1 %5555 }
 0x740   : > { %v8407_v46 = vpop.permute.xlu2 %5610  ;;  %v5558_v31 = vunpack.i.h.bf16 %v5556_v14  ;;  %v5557_v62 = vunpack.i.l.bf16 %v5556_v14  ;;  %v5563_v40 = vunpack.i.h.bf16 %v8405_v20 }
 0x745   : > { %5790 = vrot.lane.b32.xlu0 %v10003_v51, %s5943_s18  ;;  %5780 = vrot.lane.b32.xlu1 %v5669_v44, %s5944_s27  ;;  %s365_s18 = sand.u32 1, %s5927_s14  }
 0x746   : > { %5785 = vrot.lane.b32.xlu2 %v8368_v57, %s5941_s11 }
 0x747   : > { %v8414_v5 = vpop.permute.xlu0 %5575  ;;  %v8416_v50 = vpop.permute.xlu1 %5570 }
 0x748   : > { %v9641_v4 = vunpack.i.h.bf16 %v8416_v50  ;;  %v8420_v42 = vpop.permute.xlu2 %5620 }
 0x749   : > { %v9621_v17 = vunpack.i.l.bf16 %v8420_v42 }
 0x74a   : > { %v8429_v8 = vsel %vm1822_vm9, %v9641_v4, %v9627_v26  ;;  %v4093_v26 = vld [vmem:[%s9409_s7] sm:$0xff] }
 0x74b   : > { %v8436_v29 = vsel %vm1822_vm9, %v9626_v36, %v9621_v17  ;;  %v9630_v36 = vunpack.i.h.bf16 %v8376_v37 }
 0x74d   : > { %5805 = vrot.lane.b32.xlu0 %v5714_v55, %s5944_s27  ;;  %5795 = vrot.lane.b32.xlu1 %v5714_v55, %s5953_s21 }
 0x74e   : > { %5800 = vrot.lane.b32.xlu2 %v10003_v51, %s5954_s25  ;;  %s366_s25 = scalar_lea.vmem [#allocation8], %s365_s18 }
 0x74f   : > { %v8442_v19 = vpop.permute.xlu0 %5585  ;;  %v8444_v34 = vpop.permute.xlu1 %5580  ;;  %s5012_s26 = sshll.u32 %s366_s25, 4  ;;  %s5013_s26 = int_to_ptr.vmem [resolvable:$true] %s5012_s26 }
 0x750   : > { %v9623_v41 = vunpack.i.l.bf16 %v8442_v19  ;;  %v8448_v58 = vpop.permute.xlu2 %5650  ;;  %v9635_v6 = vunpack.i.l.bf16 %v8444_v34  ;;  %v9634_v55 = vunpack.i.h.bf16 %v8444_v34 }
 0x751   : > { %v9650_v23 = vunpack.i.l.bf16 %v8448_v58 }
 0x752   : > { %v8455_v56 = vsel %vm1609_vm8, %v9639_v10, %v9623_v41  ;;  %v5608_v41 = vunpack.i.h.bf16 %v8384_v22 }
 0x755   : > { %3345 = vrot.lane.b32.xlu0 %v8317_v33, %s5952_s20  ;;  %5810 = vrot.lane.b32.xlu1 %v8355_v1, %s5953_s21 }
 0x756   : > { %5815 = vrot.lane.b32.xlu2 %v10003_v51, %s5941_s11 }
 0x757   : > { %v5601_v21 = vpop.permute.xlu0 %5600  ;;  %v8463_v61 = vpop.permute.xlu1 %5595 }
 0x758   : > { %v5603_v39 = vunpack.i.h.bf16 %v5601_v21  ;;  %v5602_v35 = vunpack.i.l.bf16 %v5601_v21  ;;  %v9633_v30 = vunpack.i.h.bf16 %v8463_v61  ;;  %v8467_v44 = vpop.permute.xlu2 %5655  ;;  %v5607_v21 = vunpack.i.l.bf16 %v8384_v22 }
 0x759   : > { %v9625_v7 = vunpack.i.l.bf16 %v8467_v44  ;;  %v3801_v22 = vsel %vm767_vm2, %v5557_v62, %v5558_v31  ;;  %v9632_v62 = vunpack.i.h.bf16 %v8333_v54 }
 0x75a   : > { %v3808_v17 = vsel %vm767_vm2, %v5602_v35, %v5603_v39  ;;  %v3809_v28 = vsel %vm767_vm2, %v5603_v39, %v9635_v6  ;;  %v5562_v35 = vunpack.i.l.bf16 %v8405_v20  ;;  %v5612_v39 = vunpack.i.l.bf16 %v8407_v46 }
 0x75b   : > { %4111 = vmatpush.msra.mxu1 %v3808_v17  ;;  %4157 = vmatpush.msrb.mxu2 %v3809_v28  ;;  %v8482_v14 = vsel %vm1929_vm10, %v9633_v30, %v9625_v7  ;;  %v3802_v28 = vsel %vm767_vm2, %v5558_v31, %v9634_v55  ;;  %v5613_v17 = vunpack.i.h.bf16 %v8407_v46 }
 0x75c   : > { %v3695_v46 = vsel %vm2277_vm12, %v5562_v35, %v5563_v40 }
 0x75d   : > { %3347 = vrot.lane.b32.xlu0 %v8314_v47, %s5952_s20  ;;  %5820 = vrot.lane.b32.xlu1 %v8355_v1, %s5944_s27  ;;  %v3702_v1 = vsel %vm2277_vm12, %v5607_v21, %v5608_v41  ;;  %v3596_v35 = vsel %vm519_vm0, %v5612_v39, %v5613_v17  ;;  %s5889_s20 = scalar_lea.hbm %s9412_s10, 2 }
 0x75e   : > { %4112 = vmatpush.msra.mxu1 %v3801_v22  ;;  %4158 = vmatpush.msrb.mxu2 %v3802_v28 }
 0x75f   : > { %5825 = vrot.lane.b32.xlu2 %v8368_v57, %s5953_s21  ;;  %v8498_v20 = vpop.permute.xlu0 %5615  ;;  %v8500_v7 = vpop.permute.xlu1 %5625 }
 0x760   : > { %v9631_v31 = vunpack.i.l.bf16 %v8498_v20  ;;  %v9629_v22 = vunpack.i.l.bf16 %v8500_v7  ;;  %v8507_v28 = vpop.permute.xlu2 %5680  ;;  %4113 = vmatpush.msra.mxu1 %v3702_v1 }
 0x762   : > { %4114 = vmatpush.msra.mxu1 %v3695_v46  ;;  %v8518_v21 = vsel %vm1929_vm10, %v9630_v36, %v9629_v22  ;;  %v8525_v1 = vsel %vm1609_vm8, %v9632_v62, %v9631_v31  ;;  %v9638_v22 = vunpack.i.h.bf16 %v8364_v15  ;;  %v9643_v36 = vunpack.i.h.bf16 %v8442_v19  ;;  %v4094_v62 = vld [vmem:[%s9409_s7 + $0x8] sm:$0xff] }
 0x764   : > { %4115 = vmatpush.msra.mxu1 %v3596_v35 }
 0x765   : > { %4097 = vperm.xlu0 %5201, %v4093_v26   ;;  %5830 = vrot.lane.b32.xlu1 %v8368_v57, %s5944_s27  ;;  %v9646_v26 = vunpack.i.h.bf16 %v8500_v7 }
 0x767   : > { %v8530_v46 = vpop.permute.xlu0 %5635  ;;  %v8532_v3 = vpop.permute.xlu1 %5630  ;;  %5835 = vrot.lane.b32.xlu2 %v10003_v51, %s5944_s27  ;;  %s5010_s27 = scalar_lea.hbm %s9412_s10, %s6031_s17  ;;  %s5002_s17 = scalar_lea.sflag [#allocation7], %s365_s18 }
 0x768   : > { %v9637_v31 = vunpack.i.l.bf16 %v8530_v46  ;;  %v9642_v39 = vunpack.i.l.bf16 %v8532_v3  ;;  %v8540_v35 = vpop.permute.xlu2 %5690  ;;  %s5014_s28 = sshll.u32 %s5010_s27, 4  ;;  %s5015_s28 = int_to_ptr.hbm [resolvable:$true] %s5014_s28 }
 0x769   : > { %10014 = vst [vmem:[#allocation38_spill] sm:$0xff] %v8540_v35  ;;  %v9645_v57 = vunpack.i.l.bf16 %v8540_v35  ;;  %s5883_s29 = sshra.s32 %s5015_s28, 4  ;;  %s5884_s29 = int_to_ptr.hbm [resolvable:$true] %s5883_s29 }
 0x76a   : > { %v8552_v51 = vsel %vm1822_vm9, %v9638_v22, %v9637_v31  ;;  %v8559_v30 = vsel %vm1609_vm8, %v9643_v36, %v9642_v39  ;;  %v9649_v39 = vunpack.i.h.bf16 %v8532_v3  ;;  %s5885_s11 = scalar_lea.hbm %s5884_s29, 1  ;;  %p5890_p3 = scmp.lt.s32.totalorder %s5884_s29, %s9412_s10 }
 0x76b   : > { %v8566_v55 = vsel %vm1929_vm10, %v9646_v26, %v9645_v57  ;;  %p5886_p0 = scmp.ne.s32.totalorder %s5884_s29, %s5885_s11  ;;  %p5891_p4 = scmp.lt.s32.totalorder %s5889_s20, %s5885_s11 }
 0x76d   : > { %4102 = vperm.xlu1 %5202, %v4094_v62   ;;  %p5887_p1 = pnand %p5886_p0, %p6048_p5  ;;  %p5892_p7 = por %p5891_p4, %p5890_p3 }
 0x76f   : > { %v5641_v6 = vpop.permute.xlu0 %5640  ;;  %v8568_v52 = vpop.permute.xlu1 %5645  ;;  %p5888_p2 = pneg %p5887_p1 }
 0x770   : > { %v5643_v31 = vunpack.i.h.bf16 %v5641_v6  ;;  %v5642_v22 = vunpack.i.l.bf16 %v5641_v6  ;;  %v9652_v10 = vunpack.i.h.bf16 %v8568_v52  ;;  %v9647_v32 = vunpack.i.l.bf16 %v8568_v52  ;;  %v8572_v4 = vpop.permute.xlu2 %5695 }
 0x771   : > { %10015 = vst [vmem:[#allocation47_spill] sm:$0xff] %v8572_v4  ;;  %v9648_v36 = vunpack.i.l.bf16 %v8572_v4  ;;  %p5893_p8 = pnand %p5892_p7, %p5888_p2 }
 0x772   : > { %v3589_v57 = vsel %vm519_vm0, %v5642_v22, %v5643_v31  ;;  %v3703_v62 = vsel %vm2277_vm12, %v5608_v41, %v9647_v32  ;;  %v3696_v26 = vsel %vm2277_vm12, %v5563_v40, %v9652_v10  ;;  %v9651_v22 = vunpack.i.h.bf16 %v8448_v58 }
 0x773   : > { %4116 = vmatpush.msra.mxu1 %v3589_v57  ;;  %4159 = vmatpush.msrb.mxu2 %v3703_v62  ;;  %v8586_v6 = vsel %vm1609_vm8, %v9649_v39, %v9648_v36  ;;  %v3597_v41 = vsel %vm519_vm0, %v5613_v17, %v9650_v23  ;;  %v9654_v57 = vunpack.i.h.bf16 %v8420_v42  ;;  %v9658_v40 = vunpack.i.h.bf16 %v8498_v20 }
 0x774   : > { %v3590_v17 = vsel %vm519_vm0, %v5643_v31, %v9651_v22  ;;  %v5683_v22 = vunpack.i.h.bf16 %v8507_v28  ;;  %v5682_v10 = vunpack.i.l.bf16 %v8507_v28 }
 0x775   : > { %4117 = vmatpush.msra.mxu1 %v8202_v49  ;;  %4160 = vmatpush.msrb.mxu2 %v3696_v26 }
 0x777   : > { %v8597_v62 = vpop.permute.xlu0 %5665  ;;  %v8599_v32 = vpop.permute.xlu1 %5660  ;;  %4118 = vmatpush.msra.mxu1 %v8168_v2  ;;  %4161 = vmatpush.msrb.mxu2 %v3597_v41  ;;  %v5578_v2 = vunpack.i.h.bf16 %v8414_v5 }
 0x778   : > { %10016 = vst [vmem:[#allocation93_spill] sm:$0xff] %v8597_v62  ;;  %v9653_v36 = vunpack.i.l.bf16 %v8597_v62  ;;  %v9657_v26 = vunpack.i.l.bf16 %v8599_v32  ;;  %v8605_v39 = vpop.permute.xlu2 %5710  ;;  %v5532_v62 = vunpack.i.l.bf16 %v8362_v43 }
 0x779   : > { %10017 = vst [vmem:[#allocation68_spill] sm:$0xff] %v8599_v32  ;;  %4162 = vmatpush.msrb.mxu2 %v3590_v17  ;;  %v5572_v32 = vunpack.i.l.bf16 %v8416_v50 }
 0x77a   : > { %v8615_v23 = vsel %vm1822_vm9, %v9654_v57, %v9653_v36  ;;  %v8622_v41 = vsel %vm1609_vm8, %v9658_v40, %v9657_v26  ;;  %v5577_v26 = vunpack.i.l.bf16 %v8414_v5 }
 0x77b   : > { %10018 = vst [vmem:[#allocation76_spill] sm:$0xff] %v8622_v41  ;;  %4163 = vmatpush.msrb.mxu2 %v8224_v63  ;;  %v5537_v63 = vunpack.i.l.bf16 %v8324_v38 }
 0x77c   : > { %v3356_v28 = vsel %vm1929_vm10, %v5577_v26, %v5578_v2  ;;  %v10020_v26 = vunpack.i.h.bf16 %v8416_v50 }
 0x77d   : > { %4164 = vmatpush.msrb.mxu2 %v8189_v27  ;;  %v3455_v27 = vsel %vm2036_vm11, %v5682_v10, %v5683_v22  ;;  %v9670_v10 = vunpack.i.h.bf16 %v8530_v46 }
 0x77e   : > { %v3250_v41 = vsel %vm1822_vm9, %v5572_v32, %v10020_v26  ;;  %v8676_v26 = vld [vmem:[%s9408_s6] sm:$0xff] }
 0x77f   : > { %v8626_v31 = vpop.permute.xlu0 %5670  ;;  %v5676_v17 = vpop.permute.xlu1 %5675 }
 0x780   : > { %v5678_v36 = vunpack.i.h.bf16 %v5676_v17  ;;  %v5677_v57 = vunpack.i.l.bf16 %v5676_v17  ;;  %v8630_v49 = vpop.permute.xlu2 %5725 }
 0x782   : > { %v3462_v40 = vsel %vm2036_vm11, %v5677_v57, %v5678_v36  ;;  %v10019_v57 = vunpack.i.h.bf16 %v8324_v38 }
 0x783   : > { %4119 = vmatpush.msra.mxu1 %v3462_v40 }
 0x784   : > { %v3349_v40 = vsel %vm1929_vm10, %v5537_v63, %v10019_v57  ;;  %v5527_v63 = vunpack.i.l.bf16 %v8335_v18 }
 0x785   : > { %4120 = vmatpush.msra.mxu1 %v3455_v27  ;;  %v5567_v27 = vunpack.i.l.bf16 %v8351_v60 }
 0x787   : > { %v8639_v4 = vpop.permute.xlu0 %5685  ;;  %v8641_v17 = vpop.permute.xlu1 %5700  ;;  %4121 = vmatpush.msra.mxu1 %v3356_v28  ;;  %v10021_v28 = vunpack.i.h.bf16 %v8362_v43 }
 0x788   : > { %v9669_v5 = vunpack.i.l.bf16 %v8641_v17  ;;  %v8650_v35 = vpop.permute.xlu2 %5740 }
 0x789   : > { %4122 = vmatpush.msra.mxu1 %v3349_v40  ;;  %v3243_v57 = vsel %vm1822_vm9, %v5532_v62, %v10021_v28  ;;  %v10022_v40 = vunpack.i.h.bf16 %v8351_v60  ;;  %v10023_v62 = vunpack.i.h.bf16 %v8335_v18 }
 0x78a   : > { %v8660_v38 = vsel %vm1822_vm9, %v9670_v10, %v9669_v5 }
 0x78b   : > { %4123 = vmatpush.msra.mxu1 %v3250_v41  ;;  %v3144_v50 = vsel %vm1609_vm8, %v5567_v27, %v10022_v40  ;;  %v3137_v60 = vsel %vm1609_vm8, %v5527_v63, %v10023_v62  ;;  %v9672_v27 = vunpack.i.l.bf16 %v8463_v61 }
 0x78d   : > { %4124 = vmatpush.msra.mxu1 %v3243_v57  ;;  %v3357_v18 = vsel %vm1929_vm10, %v5578_v2, %v9672_v27 }
 0x78f   : > { %v8669_v32 = vpop.permute.xlu0 %5715  ;;  %v8671_v41 = vpop.permute.xlu1 %5705  ;;  %4125 = vmatpush.msra.mxu1 %v3144_v50 }
 0x790   : > { %v5708_v5 = vunpack.i.h.bf16 %v8671_v41  ;;  %v9671_v43 = vunpack.i.l.bf16 %v8671_v41  ;;  %v8688_v57 = vpop.permute.xlu2 %5755  ;;  %v5717_v2 = vunpack.i.l.bf16 %v8669_v32 }
 0x791   : > { %4126 = vmatpush.msra.mxu1 %v3137_v60  ;;  %v5757_v63 = vunpack.i.l.bf16 %v8688_v57  ;;  %v5758_v27 = vunpack.i.h.bf16 %v8688_v57 }
 0x792   : > { %4127 = vmatmul.f32.vlgmr.msra.gmra.mxu1 %v8676_v26  ;;  %v3463_v28 = vsel %vm2036_vm11, %v5678_v36, %v9671_v43  ;;  %v3456_v40 = vsel %vm2036_vm11, %v5683_v22, %v5708_v5  ;;  %v8700_v36 = vld [vmem:[%s9408_s6 + $0x10] sm:$0xff]  ;;  %v5672_v22 = vunpack.i.l.bf16 %v8626_v31 }
 0x793   : > { %4165 = vmatpush.msrb.mxu2 %v3463_v28 }
 0x795   : > { %4166 = vmatpush.msrb.mxu2 %v3456_v40 }
 0x797   : > { %v5731_v50 = vpop.permute.xlu0 %5730  ;;  %v5721_v62 = vpop.permute.xlu1 %5720  ;;  %4167 = vmatpush.msrb.mxu2 %v3357_v18 }
 0x798   : > { %v5733_v60 = vunpack.i.h.bf16 %v5731_v50  ;;  %v5732_v28 = vunpack.i.l.bf16 %v5731_v50  ;;  %v5723_v10 = vunpack.i.h.bf16 %v5721_v62  ;;  %v5722_v43 = vunpack.i.l.bf16 %v5721_v62 }
 0x799   : > { %4168 = vmatpush.msrb.mxu2 %v8391_v16  ;;  %v8715_v16 = vld [vmem:[%s9408_s6 + $0x8] sm:$0xff]  ;;  %v5673_v50 = vunpack.i.h.bf16 %v8626_v31  ;;  %v5718_v62 = vunpack.i.h.bf16 %v8669_v32  ;;  %v10024_v31 = vunpack.i.l.bf16 %v8444_v34 }
 0x79a   : > { %4130 = vmatmul.f32.gmra.mxu1 %v8700_v36  ;;  %v3914_v40 = vsel %vm899_vm3, %v5722_v43, %v5723_v10  ;;  %v3915_v18 = vsel %vm899_vm3, %v5723_v10, %v5757_v63  ;;  %v3907_v43 = vsel %vm899_vm3, %v5732_v28, %v5733_v60  ;;  %v3908_v10 = vsel %vm899_vm3, %v5733_v60, %v5758_v27 }
 0x79b   : > { %4148 = vmatpush.msra.mxu0 %v3914_v40  ;;  %4169 = vmatpush.msrb.mxu2 %v8429_v8  ;;  %v5687_v8 = vunpack.i.l.bf16 %v8639_v4  ;;  %v3810_v40 = vsel %vm767_vm2, %v10024_v31, %v5672_v22  ;;  %v3811_v28 = vsel %vm767_vm2, %v5672_v22, %v5717_v2  ;;  %v5688_v60 = vunpack.i.h.bf16 %v8639_v4 }
 0x79c   : > { %4194 = vmatpush.msrb.mxu3 %v3915_v18  ;;  %v3804_v31 = vsel %vm767_vm2, %v5673_v50, %v5718_v62  ;;  %v9676_v22 = vunpack.i.l.bf16 %v8630_v49  ;;  %v10026_v4 = vunpack.i.l.bf16 %v8568_v52 }
 0x79d   : > { %4149 = vmatpush.msra.mxu0 %v3907_v43  ;;  %4170 = vmatpush.msrb.mxu2 %v8398_v9  ;;  %v10025_v43 = vunpack.i.h.bf16 %v8444_v34 }
 0x79e   : > { %4195 = vmatpush.msrb.mxu3 %v3908_v10  ;;  %5117 = vmatmul.msk.f32.vlgmr.msra.gmra.mxu0 %vm2688_vm13, %v8715_v16  ;;  %v3704_v34 = vsel %vm2277_vm12, %v10026_v4, %v5687_v8  ;;  %v9674_v4 = vunpack.i.h.bf16 %v8650_v35 }
 0x79f   : > { %4203 = vmatpush.msrb.mxu0 %v3810_v40  ;;  %v8733_v9 = vpop.permute.xlu0 %5745  ;;  %v5736_v18 = vpop.permute.xlu1 %5735  ;;  %4171 = vmatpush.msrb.mxu2 %v8455_v56  ;;  %v3803_v10 = vsel %vm767_vm2, %v10025_v43, %v5673_v50  ;;  %v5712_v40 = vunpack.i.l.bf16 %v8605_v39  ;;  %v9673_v56 = vunpack.i.h.bf16 %v8630_v49  ;;  %v3705_v50 = vsel %vm2277_vm12, %v5687_v8, %v9676_v22  ;;  %v8760_v43 = vld [vmem:[%s9408_s6 + $0x18] sm:$0xff] }
 0x7a0   : > { %4249 = vmatpush.msra.mxu3 %v3811_v28  ;;  %v9675_v28 = vunpack.i.l.bf16 %v8650_v35  ;;  %v8770_v8 = vpop.permute.xlu2 %5770  ;;  %v10033_v22 = vunpack.i.h.bf16 %v8376_v37 }
 0x7a1   : > { %5119 = vmatmul.msk.f32.vlgmr.msrb.gmra.mxu3 %vm2688_vm13, %v8715_v16  ;;  %4204 = vmatpush.msrb.mxu0 %v3803_v10  ;;  %v10027_v10 = vunpack.i.h.bf16 %v8568_v52  ;;  %v5773_v32 = vunpack.i.h.bf16 %v8770_v8 }
 0x7a2   : > { %4250 = vmatpush.msra.mxu3 %v3804_v31  ;;  %4172 = vmatpush.msrb.mxu2 %v8344_v24  ;;  %v5713_v24 = vunpack.i.h.bf16 %v8605_v39  ;;  %v10028_v39 = vunpack.i.l.bf16 %v8448_v58  ;;  %v3599_v52 = vsel %vm519_vm0, %v5712_v40, %v9675_v28 }
 0x7a3   : > { %4173 = vmatmul.f32.vlgmr.msrb.gmra.mxu2 %v8676_v26  ;;  %4205 = vmatpush.msrb.mxu0 %v3704_v34  ;;  %v3697_v31 = vsel %vm2277_vm12, %v10027_v10, %v5688_v60  ;;  %v3698_v34 = vsel %vm2277_vm12, %v5688_v60, %v9673_v56  ;;  %v10029_v60 = vunpack.i.h.bf16 %v8448_v58  ;;  %v10030_v58 = vunpack.i.l.bf16 %v8671_v41 }
 0x7a4   : > { %4251 = vmatpush.msra.mxu3 %v3705_v50  ;;  %v3598_v50 = vsel %vm519_vm0, %v10028_v39, %v5712_v40  ;;  %v3592_v56 = vsel %vm519_vm0, %v5713_v24, %v9674_v4  ;;  %v5737_v39 = vunpack.i.l.bf16 %v5736_v18  ;;  %v5738_v40 = vunpack.i.h.bf16 %v5736_v18 }
 0x7a5   : > { %4206 = vmatpush.msrb.mxu0 %v3697_v31  ;;  %v10031_v4 = vunpack.i.h.bf16 %v8463_v61  ;;  %v10034_v41 = vunpack.i.l.bf16 %v8376_v37 }
 0x7a6   : > { %4252 = vmatpush.msra.mxu3 %v3698_v34  ;;  %5118 = vmatmul.msk.f32.gmra.mxu0 %vm2688_vm13, %v8760_v43  ;;  %v3591_v34 = vsel %vm519_vm0, %v10029_v60, %v5713_v24  ;;  %v3464_v24 = vsel %vm2036_vm11, %v10030_v58, %v5737_v39  ;;  %v3457_v18 = vsel %vm2036_vm11, %v5708_v5, %v5738_v40  ;;  %v10032_v58 = vunpack.i.l.bf16 %v8463_v61 }
 0x7a7   : > { %4207 = vmatpush.msrb.mxu0 %v3598_v50  ;;  %v8780_v10 = vpop.permute.xlu0 %5760  ;;  %v8782_v31 = vpop.permute.xlu1 %5750  ;;  %v3351_v5 = vsel %vm1929_vm10, %v10034_v41, %v10033_v22  ;;  %v10035_v61 = vunpack.i.h.bf16 %v8364_v15 }
 0x7a8   : > { %4253 = vmatpush.msra.mxu3 %v3599_v52  ;;  %v5753_v57 = vunpack.i.h.bf16 %v8782_v31 }
 0x7a9   : > { %4208 = vmatpush.msrb.mxu0 %v3591_v34  ;;  %5120 = vmatmul.msk.f32.gmra.mxu3 %vm2688_vm13, %v8760_v43  ;;  %v8809_v34 = vpop.permute.xlu2 %5785 }
 0x7aa   : > { %4254 = vmatpush.msra.mxu3 %v3592_v56 }
 0x7ab   : > { %4176 = vmatmul.f32.gmra.mxu2 %v8700_v36  ;;  %4209 = vmatpush.msrb.mxu0 %v8221_v45 }
 0x7ac   : > { %4255 = vmatpush.msra.mxu3 %v8274_v25 }
 0x7ad   : > { %4210 = vmatpush.msrb.mxu0 %v8192_v59 }
 0x7ae   : > { %4256 = vmatpush.msra.mxu3 %v8262_v13 }
 0x7af   : > { %4211 = vmatpush.msrb.mxu0 %v3464_v24  ;;  %v8800_v50 = vpop.permute.xlu0 %5775  ;;  %v8802_v52 = vpop.permute.xlu1 %5765  ;;  %v3358_v24 = vsel %vm1929_vm10, %v10032_v58, %v10031_v4  ;;  %v10036_v4 = vunpack.i.l.bf16 %v8364_v15  ;;  %v5747_v15 = vunpack.i.l.bf16 %v8733_v9 }
 0x7b0   : > { %v5768_v56 = vunpack.i.h.bf16 %v8802_v52  ;;  %v5767_v60 = vunpack.i.l.bf16 %v8802_v52 }
 0x7b1   : > { %4212 = vmatpush.msrb.mxu0 %v3457_v18 }
 0x7b2   : > { %v3465_v28 = vsel %vm2036_vm11, %v5737_v39, %v5767_v60  ;;  %v3458_v18 = vsel %vm2036_vm11, %v5738_v40, %v5768_v56  ;;  %v3252_v39 = vsel %vm1822_vm9, %v10036_v4, %v10035_v61  ;;  %v10038_v40 = vunpack.i.l.bf16 %v8378_v48  ;;  %v8850_v4 = vpop.permute.xlu2 %5800 }
 0x7b3   : > { %4213 = vmatpush.msrb.mxu0 %v3358_v24  ;;  %4257 = vmatpush.msra.mxu3 %v3465_v28  ;;  %v10037_v24 = vunpack.i.h.bf16 %v8378_v48  ;;  %v5748_v48 = vunpack.i.h.bf16 %v8733_v9 }
 0x7b5   : > { %4214 = vmatpush.msrb.mxu0 %v3351_v5  ;;  %4258 = vmatpush.msra.mxu3 %v3458_v18  ;;  %v3245_v41 = vsel %vm1822_vm9, %v10038_v40, %v10037_v24  ;;  %v10039_v5 = vunpack.i.h.bf16 %v8442_v19  ;;  %v10040_v18 = vunpack.i.l.bf16 %v8442_v19  ;;  %v5772_v24 = vunpack.i.l.bf16 %v8770_v8 }
 0x7b7   : > { %4215 = vmatpush.msrb.mxu0 %v3252_v39  ;;  %v8832_v28 = vpop.permute.xlu0 %5790  ;;  %v5781_v58 = vpop.permute.xlu1 %5780  ;;  %4259 = vmatpush.msra.mxu3 %v8482_v14  ;;  %v3146_v61 = vsel %vm1609_vm8, %v10040_v18, %v10039_v5  ;;  %v10042_v39 = vunpack.i.l.bf16 %v8333_v54  ;;  %v5763_v5 = vunpack.i.h.bf16 %v8780_v10 }
 0x7b8   : > { %v5783_v37 = vunpack.i.h.bf16 %v5781_v58  ;;  %v5782_v22 = vunpack.i.l.bf16 %v5781_v58  ;;  %v5793_v52 = vunpack.i.h.bf16 %v8832_v28 }
 0x7b9   : > { %4216 = vmatpush.msrb.mxu0 %v3245_v41  ;;  %4260 = vmatpush.msra.mxu3 %v8518_v21  ;;  %v10041_v21 = vunpack.i.h.bf16 %v8333_v54 }
 0x7ba   : > { %v3916_v14 = vsel %vm899_vm3, %v5757_v63, %v5782_v22  ;;  %v3909_v58 = vsel %vm899_vm3, %v5758_v27, %v5783_v37  ;;  %v5752_v63 = vunpack.i.l.bf16 %v8782_v31  ;;  %v10043_v31 = vunpack.i.l.bf16 %v8630_v49  ;;  %v8896_v18 = vpop.permute.xlu2 %5815 }
 0x7bb   : > { %4217 = vmatpush.msrb.mxu0 %v3146_v61  ;;  %4240 = vmatpush.msrb.mxu1 %v3916_v14  ;;  %v3139_v19 = vsel %vm1609_vm8, %v10042_v39, %v10041_v21  ;;  %v10045_v61 = vunpack.i.l.bf16 %v8650_v35 }
 0x7bc   : > { %4261 = vmatpush.msra.mxu3 %v8552_v51  ;;  %v3812_v51 = vsel %vm767_vm2, %v5717_v2, %v5747_v15  ;;  %v3706_v40 = vsel %vm2277_vm12, %v10043_v31, %v5752_v63  ;;  %v5788_v31 = vunpack.i.h.bf16 %v8809_v34 }
 0x7bd   : > { %4218 = vmatpush.msrb.mxu0 %v3139_v19  ;;  %4241 = vmatpush.msrb.mxu1 %v3909_v58  ;;  %v3600_v8 = vsel %vm519_vm0, %v10045_v61, %v5772_v24  ;;  %v5778_v19 = vunpack.i.h.bf16 %v8800_v50  ;;  %v3806_v58 = vsel %vm767_vm2, %v5748_v48, %v5763_v5 }
 0x7be   : > { %4219 = vmatmul.f32.vlgmr.msrb.gmra.mxu0 %v8676_v26  ;;  %4262 = vmatpush.msra.mxu3 %v8436_v29  ;;  %v3805_v29 = vsel %vm767_vm2, %v5718_v62, %v5748_v48  ;;  %v10044_v62 = vunpack.i.h.bf16 %v8630_v49  ;;  %v5777_v49 = vunpack.i.l.bf16 %v8800_v50  ;;  %v3594_v61 = vsel %vm519_vm0, %v5773_v32, %v5788_v31 }
 0x7bf   : > { %4295 = vmatpush.msra.mxu1 %v3812_v51  ;;  %v8868_v54 = vpop.permute.xlu0 %5805  ;;  %v8870_v9 = vpop.permute.xlu1 %5795  ;;  %v3700_v48 = vsel %vm2277_vm12, %v5753_v57, %v5778_v19 }
 0x7c0   : > { %v5807_v27 = vunpack.i.l.bf16 %v8868_v54  ;;  %5121 = vmatmul.msk.f32.vlgmr.msrb.gmra.mxu1 %vm2688_vm13, %v8715_v16  ;;  %4263 = vmatpush.msra.mxu3 %v8559_v30  ;;  %v5808_v2 = vunpack.i.h.bf16 %v8868_v54  ;;  %v5762_v30 = vunpack.i.l.bf16 %v8780_v10  ;;  %v5797_v51 = vunpack.i.l.bf16 %v8870_v9 }
 0x7c1   : > { %4296 = vmatpush.msra.mxu1 %v3805_v29  ;;  %v5798_v29 = vunpack.i.h.bf16 %v8870_v9 }
 0x7c2   : > { %4264 = vmatpush.msra.mxu3 %v8525_v1  ;;  %v3917_v41 = vsel %vm899_vm3, %v5782_v22, %v5807_v27  ;;  %v3699_v1 = vsel %vm2277_vm12, %v10044_v62, %v5753_v57  ;;  %v3910_v22 = vsel %vm899_vm3, %v5783_v37, %v5808_v2  ;;  %v3813_v14 = vsel %vm767_vm2, %v5747_v15, %v5762_v30  ;;  %v8939_v62 = vpop.permute.xlu2 %5825 }
 0x7c3   : > { %4265 = vmatmul.f32.vlgmr.msra.gmra.mxu3 %v8676_v26  ;;  %4297 = vmatpush.msra.mxu1 %v3706_v40  ;;  %v10046_v37 = vunpack.i.h.bf16 %v8650_v35  ;;  %v5787_v15 = vunpack.i.l.bf16 %v8809_v34  ;;  %v3707_v35 = vsel %vm2277_vm12, %v5752_v63, %v5777_v49  ;;  %v5658_v40 = vunpack.i.h.bf16 %v8467_v44  ;;  %v10058_v34 = vld [vmem:[#allocation76_spill] sm:$0xff] }
 0x7c4   : > { %4286 = vmatpush.msra.mxu2 %v3917_v41  ;;  %v3466_v41 = vsel %vm2036_vm11, %v5767_v60, %v5797_v51  ;;  %v5792_v60 = vunpack.i.l.bf16 %v8832_v28 }
 0x7c5   : > { %4298 = vmatpush.msra.mxu1 %v3699_v1  ;;  %v3593_v39 = vsel %vm519_vm0, %v10046_v37, %v5773_v32  ;;  %v3601_v63 = vsel %vm519_vm0, %v5772_v24, %v5787_v15  ;;  %v10048_v37 = vunpack.i.h.bf16 %v8500_v7  ;;  %v10049_v32 = vunpack.i.l.bf16 %v8500_v7 }
 0x7c6   : > { %4222 = vmatmul.f32.gmra.mxu0 %v8700_v36  ;;  %4287 = vmatpush.msra.mxu2 %v3910_v22  ;;  %v3459_v22 = vsel %vm2036_vm11, %v5768_v56, %v5798_v29  ;;  %v10050_v7 = vunpack.i.h.bf16 %v8530_v46 }
 0x7c7   : > { %5123 = vmatmul.msk.f32.vlgmr.msra.gmra.mxu2 %vm2688_vm13, %v8715_v16  ;;  %4299 = vmatpush.msra.mxu1 %v3600_v8  ;;  %v8911_v21 = vpop.permute.xlu1 %5810  ;;  %v10047_v8 = vunpack.i.l.bf16 %v8467_v44  ;;  %v3353_v44 = vsel %vm1929_vm10, %v10049_v32, %v10048_v37  ;;  %v5818_v37 = vunpack.i.h.bf16 %v8896_v18 }
 0x7c8   : > { %4341 = vmatpush.msrb.mxu2 %v3813_v14  ;;  %5122 = vmatmul.msk.f32.gmra.mxu1 %vm2688_vm13, %v8760_v43  ;;  %v5812_v56 = vunpack.i.l.bf16 %v8911_v21  ;;  %v5813_v28 = vunpack.i.h.bf16 %v8911_v21 }
 0x7c9   : > { %4300 = vmatpush.msra.mxu1 %v3593_v39  ;;  %v3360_v24 = vsel %vm1929_vm10, %v10047_v8, %v5658_v40 }
 0x7ca   : > { %4342 = vmatpush.msrb.mxu2 %v3806_v58  ;;  %v3814_v58 = vsel %vm767_vm2, %v5762_v30, %v5792_v60  ;;  %v3807_v30 = vsel %vm767_vm2, %v5763_v5, %v5793_v52  ;;  %v10053_v60 = vunpack.i.l.bf16 %v8420_v42  ;;  %v3460_v10 = vsel %vm2036_vm11, %v5798_v29, %v5813_v28 }
 0x7cb   : > { %4268 = vmatmul.f32.gmra.mxu3 %v8700_v36  ;;  %4301 = vmatpush.msra.mxu1 %v8271_v12  ;;  %vm4989_vm2 = vcmask 48128  }
 0x7cc   : > { %4343 = vmatpush.msrb.mxu2 %v3707_v35  ;;  %v10051_v35 = vunpack.i.l.bf16 %v8530_v46  ;;  %v3346_v46 = vpop.permute.xlu0 %3345 }
 0x7cd   : > { %4302 = vmatpush.msra.mxu1 %v8258_v53  ;;  %v3361_v29 = vsel %vm1929_vm10, %v5658_v40, %v3346_v46 }
 0x7ce   : > { %4344 = vmatpush.msrb.mxu2 %v3700_v48  ;;  %v3254_v54 = vsel %vm1822_vm9, %v10051_v35, %v10050_v7  ;;  %v3467_v48 = vsel %vm2036_vm11, %v5797_v51, %v5812_v56  ;;  %v5817_v51 = vunpack.i.l.bf16 %v8896_v18  ;;  %v10062_v35 = vld [vmem:[#allocation47_spill] sm:$0xff] }
 0x7cf   : > { %5124 = vmatmul.msk.f32.gmra.mxu2 %vm2688_vm13, %v8760_v43  ;;  %4303 = vmatpush.msra.mxu1 %v3466_v41  ;;  %v5821_v9 = vpop.permute.xlu1 %5820  ;;  %v5698_v21 = vunpack.i.h.bf16 %v10062_v35 }
 0x7d0   : > { %4345 = vmatpush.msrb.mxu2 %v3601_v63  ;;  %v5823_v57 = vunpack.i.h.bf16 %v5821_v9  ;;  %v5822_v1 = vunpack.i.l.bf16 %v5821_v9  ;;  %v5836_v63 = vpop.permute.xlu2 %5835  ;;  %v3602_v18 = vsel %vm519_vm0, %v5787_v15, %v5817_v51 }
 0x7d1   : > { %4304 = vmatpush.msra.mxu1 %v3459_v22  ;;  %v5837_v8 = vunpack.i.l.bf16 %v5836_v63  ;;  %v5838_v32 = vunpack.i.h.bf16 %v5836_v63 }
 0x7d2   : > { %4346 = vmatpush.msrb.mxu2 %v3594_v61  ;;  %v3918_v14 = vsel %vm899_vm3, %v5807_v27, %v5822_v1  ;;  %v3911_v39 = vsel %vm899_vm3, %v5808_v2, %v5823_v57  ;;  %v5802_v27 = vunpack.i.l.bf16 %v8850_v4  ;;  %v5803_v2 = vunpack.i.h.bf16 %v8850_v4 }
 0x7d3   : > { %4305 = vmatpush.msra.mxu1 %v3360_v24  ;;  %4332 = vmatpush.msra.mxu0 %v3918_v14  ;;  %v10052_v4 = vunpack.i.h.bf16 %v8420_v42  ;;  %v10054_v24 = vunpack.i.h.bf16 %v8532_v3  ;;  %v10055_v42 = vunpack.i.l.bf16 %v8532_v3  ;;  %v10057_v3 = vunpack.i.l.bf16 %v8498_v20 }
 0x7d4   : > { %4347 = vmatpush.msrb.mxu2 %v8317_v33  ;;  %v3708_v5 = vsel %vm2277_vm12, %v5777_v49, %v5802_v27  ;;  %v3701_v49 = vsel %vm2277_vm12, %v5778_v19, %v5803_v2  ;;  %v3595_v19 = vsel %vm519_vm0, %v5788_v31, %v5818_v37  ;;  %v3348_v15 = vpop.permute.xlu0 %3347  ;;  %v10059_v31 = vld [vmem:[#allocation38_spill] sm:$0xff]  ;;  %v10064_v2 = vld [vmem:[#allocation68_spill] sm:$0xff]  ;;  %vm4985_vm0 = vcmask 31744  }
 0x7d5   : > { %4306 = vmatpush.msra.mxu1 %v3353_v44  ;;  %4333 = vmatpush.msra.mxu0 %v3911_v39  ;;  %v3247_v61 = vsel %vm1822_vm9, %v10053_v60, %v10052_v4  ;;  %v3148_v14 = vsel %vm1609_vm8, %v10055_v42, %v10054_v24  ;;  %v10056_v44 = vunpack.i.h.bf16 %v8498_v20  ;;  %v5693_v40 = vunpack.i.h.bf16 %v10059_v31 }
 0x7d6   : > { %4348 = vmatpush.msrb.mxu2 %v8295_v0  ;;  %5125 = vmatmul.msk.f32.vlgmr.msra.gmra.mxu0 %vm2688_vm13, %v8715_v16 }
 0x7d7   : > { %4387 = vmatpush.msrb.mxu0 %v3814_v58  ;;  %4307 = vmatpush.msra.mxu1 %v3254_v54  ;;  %v5831_v41 = vpop.permute.xlu1 %5830  ;;  %v3141_v39 = vsel %vm1609_vm8, %v10057_v3, %v10056_v44  ;;  %v10061_v58 = vunpack.i.l.bf16 %v10059_v31  ;;  %v4825_v31 = vld [vmem:[#allocation5 + $0x310] sm:$0xff] }
 0x7d8   : > { %4349 = vmatpush.msrb.mxu2 %v3467_v48  ;;  %v5833_v9 = vunpack.i.h.bf16 %v5831_v41  ;;  %v5832_v22 = vunpack.i.l.bf16 %v5831_v41  ;;  %v5663_v48 = vunpack.i.h.bf16 %v10064_v2 }
 0x7d9   : > { %4388 = vmatpush.msrb.mxu0 %v3807_v30  ;;  %4308 = vmatpush.msra.mxu1 %v3247_v61  ;;  %v3355_v7 = vsel %vm1929_vm10, %v10061_v58, %v5693_v40  ;;  %v10066_v30 = vunpack.i.l.bf16 %v10062_v35  ;;  %v4617_v40 = vld [vmem:[#allocation5 + $0x150] sm:$0xff] }
 0x7da   : > { %4350 = vmatpush.msrb.mxu2 %v3460_v10  ;;  %v3919_v52 = vsel %vm899_vm3, %v5822_v1, %v5832_v22  ;;  %v3912_v1 = vsel %vm899_vm3, %v5823_v57, %v5833_v9  ;;  %v3920_v50 = vsel %vm899_vm3, %v5832_v22, %v5837_v8  ;;  %v3913_v20 = vsel %vm899_vm3, %v5833_v9, %v5838_v32  ;;  %v4721_v58 = vld [vmem:[#allocation5 + $0x230] sm:$0xff] }
 0x7db   : > { %4389 = vmatpush.msrb.mxu0 %v3708_v5  ;;  %4309 = vmatpush.msra.mxu1 %v3148_v14  ;;  %v3362_v57 = vsel %vm1929_vm10, %v3346_v46, %v3348_v15  ;;  %v3150_v46 = vsel %vm1609_vm8, %v10066_v30, %v5698_v21  ;;  %v4461_v15 = vld [vmem:[#allocation5] sm:$0xff]  ;;  %v4670_v21 = vld [vmem:[#allocation5 + $0x1c8] sm:$0xff]  ;;  %vm4991_vm3 = vcmask 56320  }
 0x7dc   : > { %4378 = vmatpush.msrb.mxu3 %v3919_v52  ;;  %4351 = vmatpush.msrb.mxu2 %v3361_v29  ;;  %v9079_v51 = vpop.permute.xlu0 %4097 }
 0x7dd   : > { %4390 = vmatpush.msrb.mxu0 %v3701_v49  ;;  %4310 = vmatpush.msra.mxu1 %v3141_v39  ;;  %v10068_v49 = vld [vmem:[#allocation74_spill] sm:$0xff] }
 0x7de   : > { %4379 = vmatpush.msrb.mxu3 %v3912_v1  ;;  %4352 = vmatpush.msrb.mxu2 %v8566_v55  ;;  %v5827_v55 = vunpack.i.l.bf16 %v8939_v62  ;;  %v10069_v1 = vld [vmem:[#allocation67_spill] sm:$0xff] }
 0x7df   : > { %4311 = vmatmul.f32.vlgmr.msra.gmra.mxu1 %v8676_v26  ;;  %4391 = vmatpush.msrb.mxu0 %v3602_v18 }
 0x7e0   : > { %4424 = vmatpush.msrb.mxu1 %v3920_v50  ;;  %4353 = vmatpush.msrb.mxu2 %v8660_v38  ;;  %v5828_v38 = vunpack.i.h.bf16 %v8939_v62  ;;  %v5703_v62 = vunpack.i.h.bf16 %v8641_v17 }
 0x7e1   : > { %5126 = vmatmul.msk.f32.gmra.mxu0 %vm2688_vm13, %v8760_v43  ;;  %5127 = vmatmul.msk.f32.vlgmr.msrb.gmra.mxu3 %vm2688_vm13, %v8715_v16 }
 0x7e2   : > { %4425 = vmatpush.msrb.mxu1 %v3913_v20  ;;  %4392 = vmatpush.msrb.mxu0 %v3595_v19 }
 0x7e3   : > { %4354 = vmatpush.msrb.mxu2 %v8615_v23  ;;  %v3468_v23 = vsel %vm2036_vm11, %v5812_v56, %v5827_v55  ;;  %v10060_v56 = vld [vmem:[#allocation93_spill] sm:$0xff]  ;;  %v4669_v55 = vld [vmem:[#allocation5 + $0x1c0] sm:$0xff] }
 0x7e4   : > { %4393 = vmatpush.msrb.mxu0 %v8314_v47  ;;  %v5668_v27 = vunpack.i.h.bf16 %v10060_v56  ;;  %v10065_v41 = vunpack.i.l.bf16 %v10060_v56 }
 0x7e5   : > { %4355 = vmatpush.msrb.mxu2 %v8586_v6  ;;  %v3461_v6 = vsel %vm2036_vm11, %v5813_v28, %v5828_v38  ;;  %v10063_v28 = vunpack.i.l.bf16 %v8641_v17  ;;  %v10067_v17 = vunpack.i.l.bf16 %v10064_v2  ;;  %v10070_v38 = vld [vmem:[#allocation65_spill] sm:$0xff] }
 0x7e6   : > { %4394 = vmatpush.msrb.mxu0 %v8292_v11  ;;  %v3249_v63 = vsel %vm1822_vm9, %v10065_v41, %v5668_v27  ;;  %v4468_v27 = vld [vmem:[#allocation5 + $0x38] sm:$0xff] }
 0x7e7   : > { %4356 = vmatpush.msrb.mxu2 %v10058_v34  ;;  %4314 = vmatmul.f32.gmra.mxu1 %v8700_v36  ;;  %v3256_v54 = vsel %vm1822_vm9, %v10063_v28, %v5703_v62  ;;  %v3143_v9 = vsel %vm1609_vm8, %v10067_v17, %v5663_v48  ;;  %v4773_v62 = vld [vmem:[#allocation5 + $0x2a0] sm:$0xff]  ;;  %v4572_v2 = vld [vmem:[#allocation5 + $0x118] sm:$0xff]  ;;  %v4929_v48 = vld [vmem:[#allocation5 + $0x3f0] sm:$0xff] }
 0x7e8   : > { %4357 = vmatmul.f32.vlgmr.msrb.gmra.mxu2 %v8676_v26  ;;  %4395 = vmatpush.msrb.mxu0 %v3468_v23  ;;  %v4513_v23 = vld [vmem:[#allocation5 + $0x70] sm:$0xff] }
 0x7e9   : > { %5128 = vmatmul.msk.f32.gmra.mxu3 %vm2688_vm13, %v8760_v43 }
 0x7ea   : > { %4396 = vmatpush.msrb.mxu0 %v3461_v6  ;;  %v4565_v6 = vld [vmem:[#allocation5 + $0xe0] sm:$0xff] }
 0x7ec   : > { %4397 = vmatpush.msrb.mxu0 %v3362_v57 }
 0x7ee   : > { %4398 = vmatpush.msrb.mxu0 %v3355_v7  ;;  %v4877_v7 = vld [vmem:[#allocation5 + $0x380] sm:$0xff] }
 0x7ef   : > { %5129 = vmatmul.msk.f32.vlgmr.msrb.gmra.mxu1 %vm2688_vm13, %v8715_v16 }
 0x7f0   : > { %4360 = vmatmul.f32.gmra.mxu2 %v8700_v36  ;;  %4399 = vmatpush.msrb.mxu0 %v3256_v54 }
 0x7f2   : > { %4400 = vmatpush.msrb.mxu0 %v3249_v63 }
 0x7f4   : > { %4401 = vmatpush.msrb.mxu0 %v3150_v46 }
 0x7f6   : > { %4402 = vmatpush.msrb.mxu0 %v3143_v9  ;;  %v4676_v9 = vld [vmem:[#allocation5 + $0x1f8] sm:$0xff] }
 0x7f7   : > { %4403 = vmatmul.f32.vlgmr.msrb.gmra.mxu0 %v8676_v26  ;;  %5130 = vmatmul.msk.f32.gmra.mxu1 %vm2688_vm13, %v8760_v43  ;;  %v9082_v26 = vpop.permute.xlu1 %4102 }
 0x7ff   : > { %4406 = vmatmul.f32.gmra.mxu0 %v8700_v36 }
 0x80f   : > { %v4128_v16 = vpop.f32.mrf.mxu1 }
 0x810   : > { %v4129_v24 = vadd.f32 %v4128_v16, %v9079_v51  ;;  %v4728_v16 = vld [vmem:[#allocation5 + $0x268] sm:$0xff] }
 0x817   : > { %v4131_v4 = vpop.f32.mrf.mxu1 }
 0x818   : > { %v4132_v43 = vadd.f32 %v4131_v4, %v9082_v26  ;;  %v4514_v4 = vld [vmem:[#allocation5 + $0x78] sm:$0xff] }
 0x81b   : > { %v4151_v22 = vpop.f32.mrf.mxu0 }
 0x81c   : > { %v4152_v52 = vadd.f32 %v4151_v22, %v4129_v24  ;;  %v4832_v22 = vld [vmem:[#allocation5 + $0x348] sm:$0xff] }
 0x81e   : > { %v4433_v37 = vadd.f32 %v4152_v52, %v10068_v49 }
 0x820   : > { %v4447_v20 = vmax.f32 %v4433_v37, 0.0 }
 0x822   : > { %v4683_v28 = vmul.f32 %v4669_v55, %v4447_v20  ;;  %v4527_v54 = vmul.f32 %v4513_v23, %v4447_v20  ;;  %v4475_v30 = vmul.f32 %v4461_v15, %v4447_v20  ;;  %v4839_v46 = vmul.f32 %v4825_v31, %v4447_v20 }
 0x823   : > { %v4154_v10 = vpop.f32.mrf.mxu0  ;;  %v4631_v17 = vmul.f32 %v4617_v40, %v4447_v20  ;;  %v9099_v24 = vmul.f32 %v4877_v7, %v4447_v20 }
 0x824   : > { %v4197_v61 = vpop.f32.mrf.mxu3  ;;  %v4155_v29 = vadd.f32 %v4154_v10, %v4132_v43  ;;  %v4787_v10 = vmul.f32 %v4773_v62, %v4447_v20  ;;  %v4826_v43 = vld [vmem:[#allocation5 + $0x318] sm:$0xff] }
 0x825   : > { %v4884_v62 = vld [vmem:[#allocation5 + $0x3b8] sm:$0xff] }
 0x826   : > { %v4174_v60 = vpop.f32.mrf.mxu2  ;;  %v4440_v50 = vadd.f32 %v4155_v29, %v10069_v1  ;;  %v4566_v29 = vld [vmem:[#allocation5 + $0xe8] sm:$0xff]  ;;  %v10072_v1 = vld [vmem:[#allocation86_spill] sm:$0xff] }
 0x827   : > { %v4175_v36 = vadd.f32 %v4174_v60, %v9079_v51  ;;  %v4462_v60 = vld [vmem:[#allocation5 + $0x8] sm:$0xff] }
 0x828   : > { %v9096_v57 = vmax.f32 %v4440_v50, 0.0 }
 0x829   : > { %v4198_v32 = vadd.f32 %v4197_v61, %v4175_v36  ;;  %v4579_v61 = vmul.f32 %v4565_v6, %v4447_v20  ;;  %v4618_v36 = vld [vmem:[#allocation5 + $0x158] sm:$0xff] }
 0x82a   : > { %10071 = vst [vmem:[#allocation49_spill] sm:$0xff] %v9096_v57  ;;  %v9102_v49 = vmul.f32 %v4468_v27, %v9096_v57  ;;  %v9105_v37 = vmul.f32 %v4572_v2, %v9096_v57  ;;  %v9116_v23 = vmul.f32 %v4728_v16, %v9096_v57  ;;  %v9119_v15 = vmul.f32 %v4832_v22, %v9096_v57  ;;  %v4878_v2 = vld [vmem:[#allocation5 + $0x388] sm:$0xff] }
 0x82b   : > { %v4434_v34 = vadd.f32 %v4198_v32, %v10070_v38  ;;  %v4943_v32 = vmul.f32 %v4929_v48, %v4447_v20  ;;  %v4774_v38 = vld [vmem:[#allocation5 + $0x2a8] sm:$0xff]  ;;  %v4930_v48 = vld [vmem:[#allocation5 + $0x3f8] sm:$0xff] }
 0x82c   : > { %v4200_v14 = vpop.f32.mrf.mxu3 }
 0x82d   : > { %v4448_v41 = vmax.f32 %v4434_v34, 0.0  ;;  %v4722_v34 = vld [vmem:[#allocation5 + $0x238] sm:$0xff] }
 0x82e   : > { %v4177_v42 = vpop.f32.mrf.mxu2 }
 0x82f   : > { %v4178_v19 = vadd.f32 %v4177_v42, %v9082_v26  ;;  %v4520_v42 = vld [vmem:[#allocation5 + $0xa8] sm:$0xff]  ;;  %v4684_v31 = vmul.f32 %v4670_v21, %v4448_v41  ;;  %v4528_v40 = vmul.f32 %v4514_v4, %v4448_v41  ;;  %v4632_v7 = vmul.f32 %v4618_v36, %v4448_v41 }
 0x830   : > { %v9122_v6 = vmul.f32 %v4520_v42, %v9096_v57  ;;  %v4788_v22 = vmul.f32 %v4774_v38, %v4448_v41  ;;  %v4736_v21 = vmul.f32 %v4722_v34, %v4448_v41  ;;  %v9131_v42 = vmul.f32 %v4884_v62, %v9096_v57  ;;  %v4729_v62 = vld [vmem:[#allocation5 + $0x270] sm:$0xff] }
 0x831   : > { %v4201_v35 = vadd.f32 %v4200_v14, %v4178_v19  ;;  %v9138_v36 = vadd.f32 %v4528_v40, %v4527_v54 }
 0x832   : > { %v9152_v54 = vadd.f32 %v4788_v22, %v4787_v10  ;;  %v4463_v22 = vld [vmem:[#allocation5 + $0x10] sm:$0xff] }
 0x833   : > { %v4441_v50 = vadd.f32 %v4201_v35, %v10072_v1  ;;  %v4580_v35 = vmul.f32 %v4566_v29, %v4448_v41  ;;  %v4469_v29 = vld [vmem:[#allocation5 + $0x40] sm:$0xff]  ;;  %v4944_v1 = vmul.f32 %v4930_v48, %v4448_v41 }
 0x835   : > { %v9127_v4 = vmax.f32 %v4441_v50, 0.0  ;;  %v9146_v34 = vadd.f32 %v4580_v35, %v4579_v61  ;;  %v4625_v35 = vld [vmem:[#allocation5 + $0x190] sm:$0xff] }
 0x837   : > { %v4483_v61 = vmul.f32 %v4469_v29, %v9127_v4  ;;  %v4743_v48 = vmul.f32 %v4729_v62, %v9127_v4  ;;  %v4567_v62 = vld [vmem:[#allocation5 + $0xf0] sm:$0xff] }
 0x83b   : > { %v4220_v8 = vpop.f32.mrf.mxu0 }
 0x83c   : > { %v4221_v56 = vadd.f32 %v4220_v8, %v9079_v51  ;;  %v4735_v8 = vmul.f32 %v4721_v58, %v4447_v20  ;;  %v4476_v20 = vmul.f32 %v4462_v60, %v4448_v41  ;;  %v4840_v58 = vmul.f32 %v4826_v43, %v4448_v41 }
 0x83d   : > { %v4243_v5 = vpop.f32.mrf.mxu1  ;;  %v9136_v43 = vadd.f32 %v4684_v31, %v4683_v28 }
 0x83e   : > { %v4244_v14 = vadd.f32 %v4243_v5, %v4221_v56  ;;  %v9113_v5 = vmul.f32 %v4676_v9, %v9096_v57  ;;  %v4624_v56 = vld [vmem:[#allocation5 + $0x188] sm:$0xff]  ;;  %v9140_v38 = vadd.f32 %v4476_v20, %v4475_v30  ;;  %v9142_v50 = vadd.f32 %v4840_v58, %v4839_v46  ;;  %v4885_v30 = vld [vmem:[#allocation5 + $0x3c0] sm:$0xff]  ;;  %v4671_v58 = vld [vmem:[#allocation5 + $0x1d0] sm:$0xff] }
 0x83f   : > { %v9154_v40 = vadd.f32 %v4736_v21, %v4735_v8  ;;  %v4827_v21 = vld [vmem:[#allocation5 + $0x320] sm:$0xff] }
 0x840   : > { %v4435_v9 = vadd.f32 %v4244_v14, %v8192_v59  ;;  %v4573_v59 = vld [vmem:[#allocation5 + $0x120] sm:$0xff] }
 0x841   : > { %v4677_v14 = vld [vmem:[#allocation5 + $0x200] sm:$0xff] }
 0x843   : > { %v9092_v18 = vpop.f32.mrf.mxu0 }
 0x845   : > { %v9087_v44 = vpop.f32.mrf.mxu1 }
 0x846   : > { %v4266_v3 = vpop.f32.mrf.mxu3 }
 0x847   : > { %v4267_v27 = vadd.f32 %v4266_v3, %v9079_v51  ;;  %v9134_v3 = vmul.f32 %v4624_v56, %v9096_v57  ;;  %v9148_v56 = vmax.f32 %v4435_v9, 0.0  ;;  %v4224_v9 = vadd.f32 %v9092_v18, %v9082_v26  ;;  %v4518_v57 = vld [vmem:[#allocation5 + $0x98] sm:$0xff] }
 0x84a   : > { %v9089_v39 = vpop.f32.mrf.mxu2 }
 0x84b   : > { %v4290_v60 = vadd.f32 %v9089_v39, %v4267_v27  ;;  %v9144_v39 = vadd.f32 %v4632_v7, %v4631_v17  ;;  %v4833_v27 = vld [vmem:[#allocation5 + $0x350] sm:$0xff]  ;;  %v4587_v7 = vmul.f32 %v4573_v59, %v9127_v4  ;;  %v9176_v59 = vmul.f32 %v4885_v30, %v9127_v4 }
 0x84d   : > { %v4436_v46 = vadd.f32 %v4290_v60, %v8262_v13  ;;  %v9167_v13 = vadd.f32 %v4944_v1, %v4943_v32  ;;  %v4847_v60 = vmul.f32 %v4833_v27, %v9127_v4  ;;  %v4685_v32 = vmul.f32 %v4671_v58, %v9148_v56 }
 0x84e   : > { %v9108_v19 = vpop.f32.mrf.mxu3  ;;  %v9181_v1 = vmul.f32 %v4625_v35, %v9127_v4  ;;  %v9186_v27 = vadd.f32 %v4483_v61, %v9102_v49  ;;  %v4464_v35 = vld [vmem:[#allocation5 + $0x18] sm:$0xff]  ;;  %v4247_v49 = vadd.f32 %v9087_v44, %v4224_v9  ;;  %v4673_v9 = vld [vmem:[#allocation5 + $0x1e0] sm:$0xff] }
 0x84f   : > { %v9183_v18 = vmax.f32 %v4436_v46, 0.0  ;;  %v4477_v46 = vmul.f32 %v4463_v22, %v9148_v56  ;;  %v4270_v44 = vadd.f32 %v9108_v19, %v9082_v26 }
 0x850   : > { %v4442_v19 = vadd.f32 %v4247_v49, %v8221_v45 }
 0x852   : > { %v9110_v55 = vpop.f32.mrf.mxu2 }
 0x853   : > { %v4335_v52 = vpop.f32.mrf.mxu0 }
 0x85c   : > { %v4312_v63 = vpop.f32.mrf.mxu1 }
 0x85d   : > { %v4313_v16 = vadd.f32 %v4312_v63, %v9079_v51  ;;  %v4892_v63 = vmul.f32 %v4878_v2, %v4448_v41  ;;  %v4521_v41 = vld [vmem:[#allocation5 + $0xb0] sm:$0xff] }
 0x85e   : > { %v9160_v2 = vpop.f32.mrf.mxu0  ;;  %v9173_v29 = vmul.f32 %v4521_v41, %v9127_v4  ;;  %v4775_v41 = vld [vmem:[#allocation5 + $0x2b0] sm:$0xff] }
 0x85f   : > { %v4336_v28 = vadd.f32 %v4335_v52, %v4313_v16  ;;  %v4691_v52 = vmul.f32 %v4677_v14, %v9127_v4  ;;  %v9164_v8 = vadd.f32 %v4892_v63, %v9099_v24  ;;  %v4515_v16 = vld [vmem:[#allocation5 + $0x80] sm:$0xff]  ;;  %v4789_v22 = vmul.f32 %v4775_v41, %v9148_v56 }
 0x860   : > { %v4619_v63 = vld [vmem:[#allocation5 + $0x160] sm:$0xff]  ;;  %v4529_v58 = vmul.f32 %v4515_v16, %v9148_v56  ;;  %v4581_v16 = vmul.f32 %v4567_v62, %v9148_v56  ;;  %v4293_v62 = vadd.f32 %v9110_v55, %v4270_v44 }
 0x861   : > { %v4437_v24 = vadd.f32 %v4336_v28, %v8258_v53  ;;  %v9192_v30 = vadd.f32 %v4691_v52, %v9113_v5  ;;  %v4672_v28 = vld [vmem:[#allocation5 + $0x1d8] sm:$0xff]  ;;  %v4633_v61 = vmul.f32 %v4619_v63, %v9148_v56  ;;  %v9204_v5 = vadd.f32 %v4847_v60, %v9119_v15  ;;  %v4465_v15 = vld [vmem:[#allocation5 + $0x20] sm:$0xff] }
 0x862   : > { %v4698_v52 = vadd.f32 %v9136_v43, %v4685_v32  ;;  %v4478_v60 = vmul.f32 %v4464_v35, %v9183_v18  ;;  %v4542_v43 = vadd.f32 %v9138_v36, %v4529_v58  ;;  %v4490_v32 = vadd.f32 %v9140_v38, %v4477_v46  ;;  %v4466_v35 = vld [vmem:[#allocation5 + $0x28] sm:$0xff] }
 0x864   : > { %v9150_v31 = vpop.f32.mrf.mxu1  ;;  %v4381_v17 = vpop.f32.mrf.mxu3 }
 0x865   : > { %v4316_v36 = vadd.f32 %v9150_v31, %v9082_v26  ;;  %v4620_v31 = vld [vmem:[#allocation5 + $0x168] sm:$0xff] }
 0x86b   : > { %v4358_v20 = vpop.f32.mrf.mxu2 }
 0x86c   : > { %v4359_v10 = vadd.f32 %v4358_v20, %v9079_v51  ;;  %v9189_v20 = vadd.f32 %v4587_v7, %v9105_v37  ;;  %v9201_v37 = vadd.f32 %v4743_v48, %v9116_v23  ;;  %v4427_v7 = vpop.f32.mrf.mxu1  ;;  %v4517_v23 = vld [vmem:[#allocation5 + $0x90] sm:$0xff] }
 0x86e   : > { %v4382_v14 = vadd.f32 %v4381_v17, %v4359_v10  ;;  %v4516_v17 = vld [vmem:[#allocation5 + $0x88] sm:$0xff]  ;;  %v4841_v10 = vmul.f32 %v4827_v21, %v9148_v56  ;;  %v4686_v21 = vmul.f32 %v4672_v28, %v9183_v18 }
 0x86f   : > { %v4530_v48 = vmul.f32 %v4516_v17, %v9183_v18  ;;  %v4674_v17 = vld [vmem:[#allocation5 + $0x1e8] sm:$0xff] }
 0x870   : > { %v4438_v53 = vadd.f32 %v4382_v14, %v8295_v0  ;;  %v9206_v0 = vmax.f32 %v4437_v24, 0.0  ;;  %v9221_v63 = vadd.f32 %v9142_v50, %v4841_v10  ;;  %v4699_v46 = vadd.f32 %v4698_v52, %v4686_v21 }
 0x871   : > { %v4543_v55 = vadd.f32 %v4542_v43, %v4530_v48  ;;  %v4491_v10 = vadd.f32 %v4490_v32, %v4478_v60  ;;  %v9241_v52 = vadd.f32 %v9152_v54, %v4789_v22  ;;  %v4339_v21 = vadd.f32 %v9160_v2, %v4316_v36  ;;  %v4675_v48 = vld [vmem:[#allocation5 + $0x1f0] sm:$0xff]  ;;  %v4519_v60 = vld [vmem:[#allocation5 + $0xa0] sm:$0xff]  ;;  %v4568_v54 = vld [vmem:[#allocation5 + $0xf8] sm:$0xff] }
 0x872   : > { %v9216_v24 = vmax.f32 %v4438_v53, 0.0  ;;  %v4646_v53 = vadd.f32 %v9144_v39, %v4633_v61  ;;  %v4687_v38 = vmul.f32 %v4673_v9, %v9206_v0  ;;  %v4531_v50 = vmul.f32 %v4517_v23, %v9206_v0  ;;  %v4828_v61 = vld [vmem:[#allocation5 + $0x328] sm:$0xff]  ;;  %v4384_v9 = vpop.f32.mrf.mxu3  ;;  %v4467_v43 = vld [vmem:[#allocation5 + $0x30] sm:$0xff] }
 0x873   : > { %v4361_v41 = vpop.f32.mrf.mxu2  ;;  %v4479_v58 = vmul.f32 %v4465_v15, %v9206_v0 }
 0x874   : > { %v4404_v14 = vpop.f32.mrf.mxu0  ;;  %v4688_v49 = vmul.f32 %v4674_v17, %v9216_v24  ;;  %v4532_v44 = vmul.f32 %v4518_v57, %v9216_v24  ;;  %v4480_v39 = vmul.f32 %v4466_v35, %v9216_v24  ;;  %v4700_v15 = vadd.f32 %v4699_v46, %v4687_v38  ;;  %v4621_v17 = vld [vmem:[#allocation5 + $0x170] sm:$0xff]  ;;  %v4430_v2 = vpop.f32.mrf.mxu1  ;;  %v4470_v46 = vld [vmem:[#allocation5 + $0x48] sm:$0xff] }
 0x875   : > { %v4405_v28 = vadd.f32 %v4404_v14, %v9079_v51  ;;  %v4362_v51 = vadd.f32 %v4361_v41, %v9082_v26  ;;  %v9236_v14 = vmax.f32 %v4442_v19, 0.0  ;;  %v4544_v57 = vadd.f32 %v4543_v55, %v4531_v50 }
 0x876   : > { %v4492_v32 = vadd.f32 %v4491_v10, %v4479_v58  ;;  %v4443_v41 = vadd.f32 %v4293_v62, %v8274_v25  ;;  %v4701_v35 = vadd.f32 %v4700_v15, %v4688_v49  ;;  %v4444_v55 = vadd.f32 %v4339_v21, %v8271_v12  ;;  %v4830_v10 = vld [vmem:[#allocation5 + $0x338] sm:$0xff] }
 0x877   : > { %v4428_v45 = vadd.f32 %v4427_v7, %v4405_v28  ;;  %v4594_v7 = vadd.f32 %v9146_v34, %v4581_v16  ;;  %v4829_v28 = vld [vmem:[#allocation5 + $0x330] sm:$0xff]  ;;  %v4634_v34 = vmul.f32 %v4620_v31, %v9183_v18  ;;  %v4385_v16 = vadd.f32 %v4384_v9, %v4362_v51 }
 0x878   : > { %v4545_v36 = vadd.f32 %v4544_v57, %v4532_v44  ;;  %v4493_v38 = vadd.f32 %v4492_v32, %v4480_v39  ;;  %v4843_v51 = vmul.f32 %v4829_v28, %v9206_v0  ;;  %v4635_v49 = vmul.f32 %v4621_v17, %v9206_v0 }
 0x879   : > { %v4439_v23 = vadd.f32 %v4428_v45, %v8292_v11  ;;  %v4842_v11 = vmul.f32 %v4828_v61, %v9183_v18  ;;  %v4569_v45 = vld [vmem:[#allocation5 + $0x100] sm:$0xff]  ;;  %v4622_v61 = vld [vmem:[#allocation5 + $0x178] sm:$0xff]  ;;  %v4582_v44 = vmul.f32 %v4568_v54, %v9183_v18  ;;  %v4647_v57 = vadd.f32 %v4646_v53, %v4634_v34  ;;  %v4571_v54 = vld [vmem:[#allocation5 + $0x110] sm:$0xff] }
 0x87a   : > { %v4583_v12 = vmul.f32 %v4569_v45, %v9206_v0  ;;  %v4484_v21 = vmul.f32 %v4470_v46, %v9236_v14  ;;  %v4445_v32 = vadd.f32 %v4385_v16, %v8317_v33  ;;  %v4844_v28 = vmul.f32 %v4830_v10, %v9216_v24 }
 0x87b   : > { %v9245_v19 = vmax.f32 %v4439_v23, 0.0  ;;  %v4570_v23 = vld [vmem:[#allocation5 + $0x108] sm:$0xff]  ;;  %v4855_v15 = vadd.f32 %v9221_v63, %v4842_v11  ;;  %v4636_v17 = vmul.f32 %v4622_v61, %v9216_v24  ;;  %v4648_v53 = vadd.f32 %v4647_v57, %v4635_v49  ;;  %v4473_v49 = vld [vmem:[#allocation5 + $0x60] sm:$0xff] }
 0x87c   : > { %v4407_v22 = vpop.f32.mrf.mxu0  ;;  %v4584_v11 = vmul.f32 %v4570_v23, %v9216_v24  ;;  %v4595_v34 = vadd.f32 %v4594_v7, %v4582_v44  ;;  %v9274_v7 = vmax.f32 %v4445_v32, 0.0  ;;  %v4498_v44 = vadd.f32 %v9186_v27, %v4484_v21  ;;  %v4574_v57 = vld [vmem:[#allocation5 + $0x128] sm:$0xff] }
 0x87d   : > { %v4408_v50 = vadd.f32 %v4407_v22, %v9082_v26  ;;  %v4689_v58 = vmul.f32 %v4675_v48, %v9245_v19  ;;  %v4533_v25 = vmul.f32 %v4519_v60, %v9245_v19  ;;  %v4481_v62 = vmul.f32 %v4467_v43, %v9245_v19  ;;  %v4831_v48 = vld [vmem:[#allocation5 + $0x340] sm:$0xff]  ;;  %v4776_v22 = vld [vmem:[#allocation5 + $0x2b8] sm:$0xff] }
 0x87e   : > { %v4623_v60 = vld [vmem:[#allocation5 + $0x180] sm:$0xff]  ;;  %v9260_v43 = vmax.f32 %v4443_v41, 0.0  ;;  %v4856_v63 = vadd.f32 %v4855_v15, %v4843_v51  ;;  %v9266_v41 = vmax.f32 %v4444_v55, 0.0  ;;  %v4845_v16 = vmul.f32 %v4831_v48, %v9245_v19  ;;  %v4725_v51 = vld [vmem:[#allocation5 + $0x250] sm:$0xff] }
 0x87f   : > { %v4431_v39 = vadd.f32 %v4430_v2, %v4408_v50  ;;  %v4702_v26 = vadd.f32 %v4701_v35, %v4689_v58  ;;  %v4546_v31 = vadd.f32 %v4545_v36, %v4533_v25  ;;  %v4494_v9 = vadd.f32 %v4493_v38, %v4481_v62  ;;  %v4723_v2 = vld [vmem:[#allocation5 + $0x240] sm:$0xff]  ;;  %v4471_v35 = vld [vmem:[#allocation5 + $0x50] sm:$0xff]  ;;  %v4724_v50 = vld [vmem:[#allocation5 + $0x248] sm:$0xff] }
 0x880   : > { %v4637_v36 = vmul.f32 %v4623_v60, %v9245_v19  ;;  %v4777_v38 = vld [vmem:[#allocation5 + $0x2c0] sm:$0xff]  ;;  %v4585_v58 = vmul.f32 %v4571_v54, %v9245_v19  ;;  %v4596_v25 = vadd.f32 %v4595_v34, %v4583_v12  ;;  %v4472_v62 = vld [vmem:[#allocation5 + $0x58] sm:$0xff]  ;;  %v4790_v45 = vmul.f32 %v4776_v22, %v9183_v18  ;;  %v4678_v12 = vld [vmem:[#allocation5 + $0x208] sm:$0xff] }
 0x881   : > { %4703 = vadd.xlane.f32.xlu0 %v4702_v26  ;;  %4547 = vadd.xlane.f32.xlu1 %v4546_v31  ;;  %v4446_v33 = vadd.f32 %v4431_v39, %v8314_v47  ;;  %v4737_v46 = vmul.f32 %v4723_v2, %v9148_v56  ;;  %v4857_v55 = vadd.f32 %v4856_v63, %v4844_v28  ;;  %v4778_v39 = vld [vmem:[#allocation5 + $0x2c8] sm:$0xff]  ;;  %v4726_v60 = vld [vmem:[#allocation5 + $0x258] sm:$0xff]  ;;  %v4879_v34 = vld [vmem:[#allocation5 + $0x390] sm:$0xff] }
 0x882   : > { %4495 = vadd.xlane.f32.xlu2 %v4494_v9  ;;  %v4649_v10 = vadd.f32 %v4648_v53, %v4636_v17  ;;  %v4485_v47 = vmul.f32 %v4471_v35, %v9260_v43  ;;  %v4597_v61 = vadd.f32 %v4596_v25, %v4584_v11  ;;  %v4791_v26 = vmul.f32 %v4777_v38, %v9206_v0  ;;  %v4474_v28 = vld [vmem:[#allocation5 + $0x68] sm:$0xff]  ;;  %v4779_v17 = vld [vmem:[#allocation5 + $0x2d0] sm:$0xff]  ;;  %v4727_v53 = vld [vmem:[#allocation5 + $0x260] sm:$0xff] }
 0x883   : > { %v4738_v31 = vmul.f32 %v4724_v50, %v9183_v18  ;;  %v9280_v9 = vmax.f32 %v4446_v33, 0.0  ;;  %v4858_v23 = vadd.f32 %v4857_v55, %v4845_v16  ;;  %v4486_v15 = vmul.f32 %v4472_v62, %v9266_v41  ;;  %v4575_v11 = vld [vmem:[#allocation5 + $0x130] sm:$0xff]  ;;  %v4880_v25 = vld [vmem:[#allocation5 + $0x398] sm:$0xff] }
 0x884   : > { %v4650_v48 = vadd.f32 %v4649_v10, %v4637_v36  ;;  %v4598_v32 = vadd.f32 %v4597_v61, %v4585_v58  ;;  %v4803_v54 = vadd.f32 %v9241_v52, %v4790_v45  ;;  %v4739_v27 = vmul.f32 %v4725_v51, %v9206_v0  ;;  %v4679_v16 = vld [vmem:[#allocation5 + $0x210] sm:$0xff]  ;;  %v4680_v10 = vld [vmem:[#allocation5 + $0x218] sm:$0xff] }
 0x885   : > { %v4750_v21 = vadd.f32 %v9154_v40, %v4737_v46  ;;  %v4487_v22 = vmul.f32 %v4473_v49, %v9274_v7  ;;  %v4499_v2 = vadd.f32 %v4498_v44, %v4485_v47  ;;  %v4792_v63 = vmul.f32 %v4778_v39, %v9216_v24  ;;  %v4576_v46 = vld [vmem:[#allocation5 + $0x138] sm:$0xff]  ;;  %v4881_v44 = vld [vmem:[#allocation5 + $0x3a0] sm:$0xff] }
 0x886   : > { %v4740_v35 = vmul.f32 %v4726_v60, %v9216_v24  ;;  %v4588_v52 = vmul.f32 %v4574_v57, %v9236_v14  ;;  %v4692_v36 = vmul.f32 %v4678_v12, %v9236_v14  ;;  %v4488_v40 = vmul.f32 %v4474_v28, %v9280_v9 }
 0x887   : > { %v4751_v33 = vadd.f32 %v4750_v21, %v4738_v31  ;;  %v4500_v38 = vadd.f32 %v4499_v2, %v4486_v15  ;;  %v4793_v50 = vmul.f32 %v4779_v17, %v9245_v19  ;;  %v4804_v58 = vadd.f32 %v4803_v54, %v4791_v26  ;;  %v4577_v31 = vld [vmem:[#allocation5 + $0x140] sm:$0xff]  ;;  %v4882_v17 = vld [vmem:[#allocation5 + $0x3a8] sm:$0xff]  ;;  %v4730_v54 = vld [vmem:[#allocation5 + $0x278] sm:$0xff] }
 0x888   : > { %v4741_v62 = vmul.f32 %v4727_v53, %v9245_v19  ;;  %v4589_v55 = vmul.f32 %v4575_v11, %v9260_v43  ;;  %v4893_v47 = vmul.f32 %v4879_v34, %v9148_v56  ;;  %v4693_v49 = vmul.f32 %v4679_v16, %v9260_v43  ;;  %v4883_v11 = vld [vmem:[#allocation5 + $0x3b0] sm:$0xff]  ;;  %v4731_v34 = vld [vmem:[#allocation5 + $0x280] sm:$0xff] }
 0x889   : > { %4859 = vadd.xlane.f32.xlu0 %v4858_v23  ;;  %4651 = vadd.xlane.f32.xlu1 %v4650_v48  ;;  %v4752_v45 = vadd.f32 %v4751_v33, %v4739_v27  ;;  %v4501_v51 = vadd.f32 %v4500_v38, %v4487_v22  ;;  %v4805_v61 = vadd.f32 %v4804_v58, %v4792_v63  ;;  %v4681_v48 = vld [vmem:[#allocation5 + $0x220] sm:$0xff]  ;;  %v4834_v27 = vld [vmem:[#allocation5 + $0x358] sm:$0xff]  ;;  %v4682_v22 = vld [vmem:[#allocation5 + $0x228] sm:$0xff] }
 0x88a   : > { %4599 = vadd.xlane.f32.xlu2 %v4598_v32  ;;  %v9299_v39 = vadd.f32 %v9173_v29, %v9122_v6  ;;  %v4602_v23 = vadd.f32 %v9189_v20, %v4588_v52  ;;  %v4706_v15 = vadd.f32 %v9192_v30, %v4692_v36  ;;  %v4894_v60 = vmul.f32 %v4880_v25, %v9183_v18  ;;  %v4578_v29 = vld [vmem:[#allocation5 + $0x148] sm:$0xff]  ;;  %v4835_v36 = vld [vmem:[#allocation5 + $0x360] sm:$0xff] }
 0x88b   : > { %v4753_v26 = vadd.f32 %v4752_v45, %v4740_v35  ;;  %v4502_v57 = vadd.f32 %v4501_v51, %v4488_v40  ;;  %v4806_v12 = vadd.f32 %v4805_v61, %v4793_v50  ;;  %v4590_v32 = vmul.f32 %v4576_v46, %v9266_v41  ;;  %v4522_v35 = vld [vmem:[#allocation5 + $0xb8] sm:$0xff]  ;;  %v4523_v25 = vld [vmem:[#allocation5 + $0xc0] sm:$0xff]  ;;  %v4732_v46 = vld [vmem:[#allocation5 + $0x288] sm:$0xff] }
 0x88c   : > { %v4694_v28 = vmul.f32 %v4680_v10, %v9266_v41  ;;  %v4603_v21 = vadd.f32 %v4602_v23, %v4589_v55  ;;  %v4895_v20 = vmul.f32 %v4881_v44, %v9206_v0  ;;  %v4906_v2 = vadd.f32 %v9164_v8, %v4893_v47  ;;  %v4836_v10 = vld [vmem:[#allocation5 + $0x368] sm:$0xff]  ;;  %v4733_v23 = vld [vmem:[#allocation5 + $0x290] sm:$0xff] }
 0x88d   : > { %v4754_v6 = vadd.f32 %v4753_v26, %v4741_v62  ;;  %v4591_v30 = vmul.f32 %v4577_v31, %v9274_v7  ;;  %v4695_v63 = vmul.f32 %v4681_v48, %v9274_v7  ;;  %v4707_v53 = vadd.f32 %v4706_v15, %v4693_v49  ;;  %v4524_v44 = vld [vmem:[#allocation5 + $0xc8] sm:$0xff]  ;;  %v4837_v15 = vld [vmem:[#allocation5 + $0x370] sm:$0xff] }
 0x88e   : > { %v4896_v33 = vmul.f32 %v4882_v17, %v9216_v24  ;;  %v4907_v52 = vadd.f32 %v4906_v2, %v4894_v60  ;;  %v4744_v16 = vmul.f32 %v4730_v54, %v9236_v14  ;;  %v4848_v40 = vmul.f32 %v4834_v27, %v9236_v14  ;;  %v4525_v54 = vld [vmem:[#allocation5 + $0xd0] sm:$0xff]  ;;  %v4886_v27 = vld [vmem:[#allocation5 + $0x3c8] sm:$0xff] }
 0x88f   : > { %v4592_v8 = vmul.f32 %v4578_v29, %v9280_v9  ;;  %v4604_v38 = vadd.f32 %v4603_v21, %v4590_v32  ;;  %v4696_v50 = vmul.f32 %v4682_v22, %v9280_v9  ;;  %v4708_v58 = vadd.f32 %v4707_v53, %v4694_v28  ;;  %v4838_v21 = vld [vmem:[#allocation5 + $0x378] sm:$0xff] }
 0x890   : > { %v4897_v62 = vmul.f32 %v4883_v11, %v9245_v19  ;;  %v4908_v45 = vadd.f32 %v4907_v52, %v4895_v20  ;;  %v4745_v55 = vmul.f32 %v4731_v34, %v9260_v43  ;;  %v4536_v47 = vmul.f32 %v4522_v35, %v9236_v14  ;;  %v4626_v53 = vld [vmem:[#allocation5 + $0x198] sm:$0xff]  ;;  %v4887_v35 = vld [vmem:[#allocation5 + $0x3d0] sm:$0xff] }
 0x891   : > { %4503 = vadd.xlane.f32.xlu0 %v4502_v57  ;;  %4807 = vadd.xlane.f32.xlu1 %v4806_v12  ;;  %v4605_v51 = vadd.f32 %v4604_v38, %v4591_v30  ;;  %v4709_v61 = vadd.f32 %v4708_v58, %v4695_v63  ;;  %v4849_v49 = vmul.f32 %v4835_v36, %v9260_v43  ;;  %v4526_v30 = vld [vmem:[#allocation5 + $0xd8] sm:$0xff]  ;;  %v4932_v63 = vld [vmem:[#allocation5 + $0x408] sm:$0xff] }
 0x892   : > { %4755 = vadd.xlane.f32.xlu2 %v4754_v6  ;;  %v4913_v26 = vadd.f32 %v9176_v59, %v9131_v42  ;;  %v4909_v31 = vadd.f32 %v4908_v45, %v4896_v33  ;;  %v4758_v48 = vadd.f32 %v9201_v37, %v4744_v16  ;;  %v4862_v60 = vadd.f32 %v9204_v5, %v4848_v40  ;;  %v4931_v6 = vld [vmem:[#allocation5 + $0x400] sm:$0xff]  ;;  %v4734_v42 = vld [vmem:[#allocation5 + $0x298] sm:$0xff] }
 0x893   : > { %v4537_v57 = vmul.f32 %v4523_v25, %v9260_v43  ;;  %v4606_v12 = vadd.f32 %v4605_v51, %v4592_v8  ;;  %v4710_v32 = vadd.f32 %v4709_v61, %v4696_v50  ;;  %v4746_v28 = vmul.f32 %v4732_v46, %v9266_v41  ;;  %v4627_v8 = vld [vmem:[#allocation5 + $0x1a0] sm:$0xff]  ;;  %v4888_v58 = vld [vmem:[#allocation5 + $0x3d8] sm:$0xff]  ;;  %v4933_v25 = vld [vmem:[#allocation5 + $0x410] sm:$0xff] }
 0x894   : > { %v4850_v17 = vmul.f32 %v4836_v10, %v9266_v41  ;;  %v4910_v29 = vadd.f32 %v4909_v31, %v4897_v62  ;;  %v4759_v59 = vadd.f32 %v4758_v48, %v4745_v55  ;;  %v4538_v37 = vmul.f32 %v4524_v44, %v9266_v41  ;;  %v4628_v10 = vld [vmem:[#allocation5 + $0x1a8] sm:$0xff]  ;;  %v4889_v61 = vld [vmem:[#allocation5 + $0x3e0] sm:$0xff]  ;;  %v4934_v44 = vld [vmem:[#allocation5 + $0x418] sm:$0xff] }
 0x895   : > { %v4550_v22 = vadd.f32 %v9299_v39, %v4536_v47  ;;  %v4747_v5 = vmul.f32 %v4733_v23, %v9274_v7  ;;  %v4851_v20 = vmul.f32 %v4837_v15, %v9274_v7  ;;  %v4863_v2 = vadd.f32 %v4862_v60, %v4849_v49 }
 0x896   : > { %v4539_v11 = vmul.f32 %v4525_v54, %v9274_v7  ;;  %v4900_v33 = vmul.f32 %v4886_v27, %v9236_v14  ;;  %v4945_v52 = vmul.f32 %v4931_v6, %v9148_v56  ;;  %v4748_v39 = vmul.f32 %v4734_v42, %v9280_v9  ;;  %v4630_v6 = vld [vmem:[#allocation5 + $0x1b8] sm:$0xff]  ;;  %v4782_v42 = vld [vmem:[#allocation5 + $0x2e8] sm:$0xff] }
 0x897   : > { %v4551_v34 = vadd.f32 %v4550_v22, %v4537_v57  ;;  %v4760_v16 = vadd.f32 %v4759_v59, %v4746_v28  ;;  %v4852_v36 = vmul.f32 %v4838_v21, %v9280_v9  ;;  %v4864_v40 = vadd.f32 %v4863_v2, %v4850_v17  ;;  %v4629_v57 = vld [vmem:[#allocation5 + $0x1b0] sm:$0xff]  ;;  %v4890_v28 = vld [vmem:[#allocation5 + $0x3e8] sm:$0xff]  ;;  %v4935_v17 = vld [vmem:[#allocation5 + $0x420] sm:$0xff] }
 0x898   : > { %v4540_v38 = vmul.f32 %v4526_v30, %v9280_v9  ;;  %v4946_v62 = vmul.f32 %v4932_v63, %v9183_v18  ;;  %v4640_v45 = vmul.f32 %v4626_v53, %v9236_v14  ;;  %v4901_v56 = vmul.f32 %v4887_v35, %v9260_v43  ;;  %v4783_v2 = vld [vmem:[#allocation5 + $0x2f0] sm:$0xff] }
 0x899   : > { %4607 = vadd.xlane.f32.xlu0 %v4606_v12  ;;  %4711 = vadd.xlane.f32.xlu1 %v4710_v32  ;;  %v4552_v50 = vadd.f32 %v4551_v34, %v4538_v37  ;;  %v4761_v46 = vadd.f32 %v4760_v16, %v4747_v5  ;;  %v4865_v55 = vadd.f32 %v4864_v40, %v4851_v20  ;;  %v4781_v12 = vld [vmem:[#allocation5 + $0x2e0] sm:$0xff] }
 0x89a   : > { %4911 = vadd.xlane.f32.xlu2 %v4910_v29  ;;  %v4653_v47 = vadd.f32 %v9181_v1, %v9134_v3  ;;  %v4914_v49 = vadd.f32 %v4913_v26, %v4900_v33  ;;  %v4958_v31 = vadd.f32 %v9167_v13, %v4945_v52  ;;  %v4641_v23 = vmul.f32 %v4627_v8, %v9260_v43  ;;  %v4780_v29 = vld [vmem:[#allocation5 + $0x2d8] sm:$0xff]  ;;  %v4785_v8 = vld [vmem:[#allocation5 + $0x300] sm:$0xff] }
 0x89b   : > { %v4553_v51 = vadd.f32 %v4552_v50, %v4539_v11  ;;  %v4762_v48 = vadd.f32 %v4761_v46, %v4748_v39  ;;  %v4866_v18 = vadd.f32 %v4865_v55, %v4852_v36  ;;  %v4902_v15 = vmul.f32 %v4888_v58, %v9266_v41  ;;  %v4784_v33 = vld [vmem:[#allocation5 + $0x2f8] sm:$0xff] }
 0x89c   : > { %v4947_v60 = vmul.f32 %v4933_v25, %v9206_v0  ;;  %v4959_v3 = vadd.f32 %v4958_v31, %v4946_v62  ;;  %v4642_v1 = vmul.f32 %v4628_v10, %v9266_v41  ;;  %v4654_v26 = vadd.f32 %v4653_v47, %v4640_v45  ;;  %v4786_v25 = vld [vmem:[#allocation5 + $0x308] sm:$0xff]  ;;  %v4938_v45 = vld [vmem:[#allocation5 + $0x438] sm:$0xff]  ;;  %v4939_v10 = vld [vmem:[#allocation5 + $0x440] sm:$0xff] }
 0x89d   : > { %v4554_v32 = vadd.f32 %v4553_v51, %v4540_v38  ;;  %v4903_v13 = vmul.f32 %v4889_v61, %v9274_v7  ;;  %v4915_v54 = vadd.f32 %v4914_v49, %v4901_v56  ;;  %v4948_v27 = vmul.f32 %v4934_v44, %v9216_v24  ;;  %v10073_v24 = vld [vmem:[#allocation49_spill] sm:$0xff]  ;;  %v4936_v62 = vld [vmem:[#allocation5 + $0x428] sm:$0xff] }
 0x89e   : > { %v4643_v0 = vmul.f32 %v4629_v57, %v9274_v7  ;;  %v4655_v59 = vadd.f32 %v4654_v26, %v4641_v23  ;;  %v4795_v21 = vmul.f32 %v4781_v12, %v9127_v4  ;;  %v4904_v37 = vmul.f32 %v4890_v28, %v9280_v9  ;;  %v4940_v44 = vld [vmem:[#allocation5 + $0x448] sm:$0xff]  ;;  %v4942_v12 = vld [vmem:[#allocation5 + $0x458] sm:$0xff] }
 0x89f   : > { %v4916_v22 = vadd.f32 %v4915_v54, %v4902_v15  ;;  %v4949_v5 = vmul.f32 %v4935_v17, %v9245_v19  ;;  %v4960_v20 = vadd.f32 %v4959_v3, %v4947_v60  ;;  %v4644_v30 = vmul.f32 %v4630_v6, %v9280_v9  ;;  %v4937_v19 = vld [vmem:[#allocation5 + $0x430] sm:$0xff] }
 0x8a0   : > { %v4656_v63 = vadd.f32 %v4655_v59, %v4642_v1  ;;  %v4794_v53 = vmul.f32 %v4780_v29, %v10073_v24  ;;  %v4796_v11 = vmul.f32 %v4782_v42, %v9236_v14  ;;  %v4797_v39 = vmul.f32 %v4783_v2, %v9260_v43 }
 0x8a1   : > { %4763 = vadd.xlane.f32.xlu0 %v4762_v48  ;;  %4867 = vadd.xlane.f32.xlu1 %v4866_v18  ;;  %v4917_v34 = vadd.f32 %v4916_v22, %v4903_v13  ;;  %v4961_v35 = vadd.f32 %v4960_v20, %v4948_v27  ;;  %v4798_v50 = vmul.f32 %v4784_v33, %v9266_v41  ;;  %v4941_v18 = vld [vmem:[#allocation5 + $0x450] sm:$0xff] }
 0x8a2   : > { %4555 = vadd.xlane.f32.xlu2 %v4554_v32  ;;  %v4657_v52 = vadd.f32 %v4656_v63, %v4643_v0  ;;  %v4809_v16 = vadd.f32 %v4795_v21, %v4794_v53  ;;  %v4799_v46 = vmul.f32 %v4785_v8, %v9274_v7  ;;  %v4951_v56 = vmul.f32 %v4937_v19, %v9127_v4 }
 0x8a3   : > { %v4918_v36 = vadd.f32 %v4917_v34, %v4904_v37  ;;  %v4962_v40 = vadd.f32 %v4961_v35, %v4949_v5  ;;  %v4800_v47 = vmul.f32 %v4786_v25, %v9280_v9  ;;  %v4950_v61 = vmul.f32 %v4936_v62, %v10073_v24 }
 0x8a4   : > { %v4658_v38 = vadd.f32 %v4657_v52, %v4644_v30  ;;  %v4810_v58 = vadd.f32 %v4809_v16, %v4796_v11  ;;  %v4952_v49 = vmul.f32 %v4938_v45, %v9236_v14  ;;  %v4953_v23 = vmul.f32 %v4939_v10, %v9260_v43 }
 0x8a5   : > { %v4965_v48 = vadd.f32 %v4951_v56, %v4950_v61  ;;  %v4954_v60 = vmul.f32 %v4940_v44, %v9266_v41  ;;  %v4955_v4 = vmul.f32 %v4941_v18, %v9274_v7  ;;  %v4956_v28 = vmul.f32 %v4942_v12, %v9280_v9 }
 0x8a6   : > { %v4811_v55 = vadd.f32 %v4810_v58, %v4797_v39 }
 0x8a7   : > { %v4966_v57 = vadd.f32 %v4965_v48, %v4952_v49 }
 0x8a8   : > { %v4812_v51 = vadd.f32 %v4811_v55, %v4798_v50 }
 0x8a9   : > { %4919 = vadd.xlane.f32.xlu0 %v4918_v36  ;;  %4963 = vadd.xlane.f32.xlu1 %v4962_v40  ;;  %v4967_v32 = vadd.f32 %v4966_v57, %v4953_v23 }
 0x8aa   : > { %4659 = vadd.xlane.f32.xlu2 %v4658_v38  ;;  %v4813_v31 = vadd.f32 %v4812_v51, %v4799_v46 }
 0x8ab   : > { %v4968_v17 = vadd.f32 %v4967_v32, %v4954_v60 }
 0x8ac   : > { %v4814_v15 = vadd.f32 %v4813_v31, %v4800_v47 }
 0x8ad   : > { %v4969_v3 = vadd.f32 %v4968_v17, %v4955_v4 }
 0x8af   : > { %v4970_v14 = vadd.f32 %v4969_v3, %v4956_v28 }
 0x8b2   : > { %4815 = vadd.xlane.f32.xlu2 %v4814_v15 }
 0x8ba   : > { %4971 = vadd.xlane.f32.xlu2 %v4970_v14 }
 0x8f4   : > { %v4704_v1 = vpop.xlane.xlu0 %4703  ;;  %v4548_v26 = vpop.xlane.xlu1 %4547 }
 0x8f5   : > { %v4496_v43 = vpop.xlane.xlu2 %4495 }
 0x8fc   : > { %v4860_v13 = vpop.xlane.xlu0 %4859  ;;  %v4652_v54 = vpop.xlane.xlu1 %4651 }
 0x8fd   : > { %v4600_v27 = vpop.xlane.xlu2 %4599 }
 0x904   : > { %v4504_v6 = vpop.xlane.xlu0 %4503  ;;  %v4808_v29 = vpop.xlane.xlu1 %4807 }
 0x905   : > { %v4756_v41 = vpop.xlane.xlu2 %4755  ;;  %v4505_v59 = vadd.f32 %v4504_v6, %v4496_v43 }
 0x907   : > { %v4506_v37 = vrot.slane %v4505_v59, 4 }
 0x909   : > { %v4507_v30 = vadd.f32 %v4506_v37, %v4505_v59 }
 0x90b   : > { %v4508_v33 = vrot.slane %v4507_v30, 2 }
 0x90c   : > { %v4608_v42 = vpop.xlane.xlu0 %4607  ;;  %v4712_v7 = vpop.xlane.xlu1 %4711 }
 0x90d   : > { %v4912_v0 = vpop.xlane.xlu2 %4911  ;;  %v4609_v21 = vadd.f32 %v4608_v42, %v4600_v27  ;;  %v4713_v2 = vadd.f32 %v4712_v7, %v4704_v1  ;;  %v4509_v58 = vadd.f32 %v4508_v33, %v4507_v30 }
 0x90f   : > { %v4610_v20 = vrot.slane %v4609_v21, 4  ;;  %v4714_v35 = vrot.slane %v4713_v2, 4  ;;  %v4510_v51 = vrot.slane %v4509_v58, 1 }
 0x911   : > { %v4611_v34 = vadd.f32 %v4610_v20, %v4609_v21  ;;  %v4715_v50 = vadd.f32 %v4714_v35, %v4713_v2  ;;  %v4511_v12 = vadd.f32 %v4510_v51, %v4509_v58 }
 0x913   : > { %v4612_v38 = vrot.slane %v4611_v34, 2  ;;  %v4716_v47 = vrot.slane %v4715_v50, 2 }
 0x914   : > { %v4764_v9 = vpop.xlane.xlu0 %4763  ;;  %v4868_v53 = vpop.xlane.xlu1 %4867 }
 0x915   : > { %v4556_v22 = vpop.xlane.xlu2 %4555  ;;  %v4765_v24 = vadd.f32 %v4764_v9, %v4756_v41  ;;  %v4869_v39 = vadd.f32 %v4868_v53, %v4860_v13  ;;  %v4613_v10 = vadd.f32 %v4612_v38, %v4611_v34  ;;  %v4717_v57 = vadd.f32 %v4716_v47, %v4715_v50 }
 0x916   : > { %v4557_v5 = vadd.f32 %v4556_v22, %v4548_v26 }
 0x917   : > { %v4766_v36 = vrot.slane %v4765_v24, 4  ;;  %v4870_v62 = vrot.slane %v4869_v39, 4  ;;  %v4614_v60 = vrot.slane %v4613_v10, 1  ;;  %v4718_v13 = vrot.slane %v4717_v57, 1 }
 0x918   : > { %v4558_v63 = vrot.slane %v4557_v5, 4 }
 0x919   : > { %v4767_v46 = vadd.f32 %v4766_v36, %v4765_v24  ;;  %v4871_v49 = vadd.f32 %v4870_v62, %v4869_v39  ;;  %v4615_v43 = vadd.f32 %v4614_v60, %v4613_v10  ;;  %v4719_v37 = vadd.f32 %v4718_v13, %v4717_v57 }
 0x91a   : > { %v4559_v11 = vadd.f32 %v4558_v63, %v4557_v5 }
 0x91b   : > { %v4768_v23 = vrot.slane %v4767_v46, 2  ;;  %v4872_v28 = vrot.slane %v4871_v49, 2 }
 0x91c   : > { %v4560_v52 = vrot.slane %v4559_v11, 2  ;;  %v4920_v8 = vpop.xlane.xlu0 %4919  ;;  %v4964_v41 = vpop.xlane.xlu1 %4963 }
 0x91d   : > { %v4660_v16 = vpop.xlane.xlu2 %4659  ;;  %v4921_v45 = vadd.f32 %v4920_v8, %v4912_v0  ;;  %v4769_v3 = vadd.f32 %v4768_v23, %v4767_v46  ;;  %v4873_v27 = vadd.f32 %v4872_v28, %v4871_v49 }
 0x91e   : > { %v4561_v40 = vadd.f32 %v4560_v52, %v4559_v11  ;;  %v4661_v19 = vadd.f32 %v4660_v16, %v4652_v54 }
 0x91f   : > { %v4922_v44 = vrot.slane %v4921_v45, 4  ;;  %v4770_v0 = vrot.slane %v4769_v3, 1  ;;  %v4874_v30 = vrot.slane %v4873_v27, 1 }
 0x920   : > { %v4662_v25 = vrot.slane %v4661_v19, 4  ;;  %v4562_v55 = vrot.slane %v4561_v40, 1 }
 0x921   : > { %v4923_v17 = vadd.f32 %v4922_v44, %v4921_v45  ;;  %v4771_v2 = vadd.f32 %v4770_v0, %v4769_v3  ;;  %v4875_v33 = vadd.f32 %v4874_v30, %v4873_v27 }
 0x922   : > { %v4663_v56 = vadd.f32 %v4662_v25, %v4661_v19  ;;  %v4563_v48 = vadd.f32 %v4562_v55, %v4561_v40  ;;  %v4997_v40 = vld [vmem:[%s9411_s9] sm:$0x1] }
 0x923   : > { %v4924_v6 = vrot.slane %v4923_v17, 2 }
 0x924   : > { %v4664_v61 = vrot.slane %v4663_v56, 2  ;;  %v4980_v14 = vsel %vm2036_vm11, %v4511_v12, %v4563_v48 }
 0x925   : > { %v4816_v31 = vpop.xlane.xlu2 %4815  ;;  %v4925_v5 = vadd.f32 %v4924_v6, %v4923_v17 }
 0x926   : > { %v4665_v18 = vadd.f32 %v4664_v61, %v4663_v56  ;;  %v4817_v15 = vadd.f32 %v4816_v31, %v4808_v29  ;;  %v4982_v29 = vsel %vm4981_vm14, %v4980_v14, %v4615_v43 }
 0x927   : > { %v4926_v34 = vrot.slane %v4925_v5, 1 }
 0x928   : > { %v4666_v4 = vrot.slane %v4665_v18, 1  ;;  %v4818_v32 = vrot.slane %v4817_v15, 4 }
 0x929   : > { %v4927_v36 = vadd.f32 %v4926_v34, %v4925_v5 }
 0x92a   : > { %v4667_v1 = vadd.f32 %v4666_v4, %v4665_v18  ;;  %v4819_v26 = vadd.f32 %v4818_v32, %v4817_v15 }
 0x92c   : > { %v4820_v54 = vrot.slane %v4819_v26, 2  ;;  %v4984_v59 = vsel %vm4983_vm15, %v4982_v29, %v4667_v1 }
 0x92d   : > { %v4972_v42 = vpop.xlane.xlu2 %4971  ;;  %v4986_v20 = vsel %vm4985_vm0, %v4984_v59, %v4719_v37 }
 0x92e   : > { %v4821_v7 = vadd.f32 %v4820_v54, %v4819_v26  ;;  %v4973_v21 = vadd.f32 %v4972_v42, %v4964_v41  ;;  %v4988_v53 = vsel %vm4987_vm1, %v4986_v20, %v4771_v2 }
 0x930   : > { %v4822_v9 = vrot.slane %v4821_v7, 1  ;;  %v4974_v22 = vrot.slane %v4973_v21, 4 }
 0x932   : > { %v4823_v63 = vadd.f32 %v4822_v9, %v4821_v7  ;;  %v4975_v24 = vadd.f32 %v4974_v22, %v4973_v21 }
 0x934   : > { %v4976_v11 = vrot.slane %v4975_v24, 2  ;;  %v4990_v35 = vsel %vm4989_vm2, %v4988_v53, %v4823_v63 }
 0x935   : > { %v4992_v39 = vsel %vm4991_vm3, %v4990_v35, %v4875_v33 }
 0x936   : > { %v4977_v52 = vadd.f32 %v4976_v11, %v4975_v24  ;;  %v4994_v19 = vsel %vm4993_vm4, %v4992_v39, %v4927_v36 }
 0x938   : > { %v4978_v16 = vrot.slane %v4977_v52, 1 }
 0x93a   : > { %v4979_v8 = vadd.f32 %v4978_v16, %v4977_v52 }
 0x93c   : > { %v4996_v38 = vsel %vm4995_vm5, %v4994_v19, %v4979_v8 }
 0x93d   : > { %v4998_v50 = vadd.f32 %v4997_v40, %v4996_v38 }
 0x93f   : > { %5000 = vst.msk [vmem:[%s366_s25] sm:$0x1] %vm4999_vm6, %v4998_v50 }
 0x940   : > { %5896 = shalt.err (!%p5893_p8)
}
 0x941   : > { %5138 = dma.vmem_to_hbm [thread:$0]  (%p6048_p5), %s5013_s26, 16, %s5015_s28, %s5002_s17  }
 0x942 PF: > { %p5150_p9 = scmp.ge.s32.totalorder %s5935_s16, 2  ;;  %s5026_s18 = sand.u32 1, %s5923_s13  }
 0x943   : > { %s5027_s25 = scalar_lea.sflag [#allocation7], %s5026_s18 }
 0x944   : > { %p5145_p10 = pnand %p5150_p9, %p6052_p6 }
 0x946   : > { %p5146_p11 = pneg %p5145_p10 }
 0x948   : > { %5918 = dma.done.wait (%p5146_p11), %s5027_s25, 16  }
 0x949   : > { %5920 = vsyncadd (%p5146_p11), %s5027_s25, 4294967280  ;;  %p21_p12 = scmp.ge.s32.totalorder %s6035_s19, 4   ;;  %s10074_s13 = smov %s5927_s14 }
 0x94a   : > { %s10075_s14 = smov %s5931_s15  ;;  %s10076_s15 = smov %s6046_s22 }
 0x94b   : > { %s10077_s16 = smov %s6035_s19  ;;  %23 = sbr.rel (!%p21_p12) target bundleno = 4 (0x4), region = 117 }
 0x950   :  { %5032 = vsyncpa [#allocation6], 1 }
 0x951   :  { %5034 = vsyncpa [#allocation6 + $0x1], 1 }
 0x952   :  { %5035 = vsyncpa [#allocation7], 1 }
 0x953   :  { %5037 = vsyncpa [#allocation7 + $0x1], 1 }

</bundles_post_ra>
